<compile_context>
chip_gen: v6e
topology: v6e:2x2x1
jax: 0.10.0
libtpu: 0.0.40
codegen_flags: <defaults>
</compile_context>

<pallas_src>
import jax
import jax.numpy as jnp
import numpy as np
from jax.experimental import pallas as pl
from jax.experimental.pallas import tpu as pltpu


def _round_up(x, m):
    return (x + m - 1) // m * m


# --------------------------------------------------------------------------- #
# Banded ("pooled-column-order") conv weight.
#
# For a stride-1 VALID Conv2d, conv output row oi is
#     row(oi) = sum_di  x_row(oi + di) @ Wd[di]
# where x_row(r) is the flattened NHWC image row (W*Cin wide) and Wd[di] is a
# (W*Cin, 2*PW*Cout) block-Toeplitz matrix whose output columns are ordered
# (q, pj, f) with q = pooling-column parity (output column oj = 2*pj + q).
# The 2x2 max-pool over columns is then max of two contiguous lane halves.
# --------------------------------------------------------------------------- #
def _banded_conv_weight(w_oihw, w_in, pw):
    w = np.asarray(jax.device_get(w_oihw), np.float32)   # (Cout, Cin, kh, kw)
    cout, cin, kh, kw = w.shape
    wd = np.zeros((kh, w_in * cin, 2 * pw * cout), np.float32)
    for di in range(kh):
        for dj in range(kw):
            blk = w[:, :, di, dj].T                       # (Cin, Cout)
            for q in range(2):
                for pj in range(pw):
                    jcol = 2 * pj + q + dj                # input column index
                    wd[di,
                       jcol * cin:(jcol + 1) * cin,
                       q * pw * cout + pj * cout:
                       q * pw * cout + (pj + 1) * cout] = blk
    return jnp.asarray(wd, jnp.bfloat16)


# ------------------- in-kernel im2col conv + 2x2 max-pool ------------------- #

def _conv_pool_body(x_ref, w_ref, n, kh, ph, pwc, wcin):
    """Conv + 2x2 max-pool of image `n` (pre-bias/ReLU), via 2*kh MXU dots.

    x_ref block: (NB, H//2, 2*W*Cin) "pair rows" (image rows 2r, 2r+1 side by
    side), so the row 2*pi + p + di needed for row-parity p and kernel row di
    is the static, stride-free slice [pi + e//2, (e%2)*W*Cin : ...], e = p+di.
    Returns (ph, pw*cout) f32 with columns ordered (pj, f).
    """
    pooled = None
    for p in range(2):                                    # pre-pool row parity
        acc = None
        for di in range(kh):
            e = p + di
            r0, off = e // 2, (e % 2) * wcin
            lhs = x_ref[n, r0:r0 + ph, off:off + wcin]    # (ph, W*Cin) bf16
            t = jnp.dot(lhs, w_ref[di], preferred_element_type=jnp.float32)
            acc = t if acc is None else acc + t
        m = jnp.maximum(acc[:, :pwc], acc[:, pwc:])       # column pool (q)
        pooled = m if pooled is None else jnp.maximum(pooled, m)   # row pool
    return pooled


def _make_conv_pool_kernel(nb, kh, ph, pwc, wcin):
    def kernel(x_ref, w_ref, b_ref, o_ref):
        b = b_ref[...]                                    # (1, pwc) f32
        for n in range(nb):
            pooled = _conv_pool_body(x_ref, w_ref, n, kh, ph, pwc, wcin)
            o_ref[n] = jnp.maximum(pooled + b, 0.0).astype(o_ref.dtype)
    return kernel


def conv_relu_pool(x_pairs, w_banded, b_tiled, *, nb=8):
    """Conv2d(stride 1, VALID) + ReLU + MaxPool2d(2,2), in-kernel im2col.

    x_pairs:  (N, H//2, 2*W*Cin) bf16
    w_banded: (kh, W*Cin, 2*PW*Cout) bf16 (from _banded_conv_weight)
    b_tiled:  (1, PW*Cout) f32 (bias tiled PW times)
    returns   (N, PH, PW*Cout) bf16, row layout = NHWC flatten per pooled row.
    """
    n_img, h2, wc2 = x_pairs.shape
    kh, wcin, two_pwc = w_banded.shape
    assert wcin == wc2 // 2
    pwc = two_pwc // 2
    ph = (2 * h2 - kh + 1) // 2

    nb_eff = max(1, min(nb, n_img // 2)) if n_img >= 2 else 1   # grid >= 2 steps
    n_pad = _round_up(n_img, nb_eff)
    if n_pad != n_img:
        x_pairs = jnp.pad(x_pairs, ((0, n_pad - n_img), (0, 0), (0, 0)))
    grid = (n_pad // nb_eff,)

    flops = 2 * n_pad * 2 * kh * ph * wcin * two_pwc
    bytes_acc = (n_pad * (h2 * wc2 + ph * pwc) * 2
                 + w_banded.size * 2 + b_tiled.size * 4)

    out = pl.pallas_call(
        _make_conv_pool_kernel(nb_eff, kh, ph, pwc, wcin),
        out_shape=jax.ShapeDtypeStruct((n_pad, ph, pwc), jnp.bfloat16),
        grid=grid,
        in_specs=[pl.BlockSpec((nb_eff, h2, wc2), lambda i: (i, 0, 0)),
                  pl.BlockSpec((kh, wcin, two_pwc), lambda i: (0, 0, 0)),
                  pl.BlockSpec((1, pwc), lambda i: (0, 0))],
        out_specs=pl.BlockSpec((nb_eff, ph, pwc), lambda i: (i, 0, 0)),
        compiler_params=pltpu.CompilerParams(
            dimension_semantics=("parallel",),        # v7x: images split over 2 TCs
            vmem_limit_bytes=32 * 1024 * 1024),       # working set is < 0.5 MB
        cost_estimate=pl.CostEstimate(flops=flops, transcendentals=0,
                                      bytes_accessed=bytes_acc),
    )(x_pairs, w_banded, b_tiled)
    return out[:n_img]


# ------------------ fused conv2 + ReLU + pool + fc1/fc2/fc3 ----------------- #

def _make_conv2_mlp_kernel(nb, kh, ph, pwc, wcin):
    def kernel(x_ref, wc_ref, bc_ref, w1_ref, b1_ref, w2_ref, b2_ref,
               w3_ref, b3_ref, o_ref, act_ref):
        bc = bc_ref[...]
        # conv2 + ReLU + 2x2 max-pool, one image at a time, into VMEM scratch.
        for n in range(nb):
            pooled = _conv_pool_body(x_ref, wc_ref, n, kh, ph, pwc, wcin)
            act_ref[n] = jnp.maximum(pooled + bc, 0.0).astype(act_ref.dtype)
        # fc1 as a sum over the ph row-blocks (no in-kernel flatten/relayout).
        h = None
        for pi in range(ph):
            t = jnp.dot(act_ref[:, pi, :], w1_ref[pi],
                        preferred_element_type=jnp.float32)
            h = t if h is None else h + t
        h = jnp.maximum(h + b1_ref[...], 0.0)
        h = jnp.dot(h.astype(jnp.bfloat16), w2_ref[...],
                    preferred_element_type=jnp.float32)
        h = jnp.maximum(h + b2_ref[...], 0.0)
        o = jnp.dot(h.astype(jnp.bfloat16), w3_ref[...],
                    preferred_element_type=jnp.float32) + b3_ref[...]
        o_ref[0] = o                                      # (nb, 128) lane-dense
    return kernel


def conv2_mlp_fused(a_pairs, wc, bc, w1, b1, w2, b2, w3, b3, *, nb=8):
    """a_pairs: (N, PH1//2, 2*PW1*Cout1) bf16 -> logits (N, 128) f32 (padded)."""
    n_img, h2, wc2 = a_pairs.shape
    kh, wcin, two_pwc = wc.shape
    assert wcin == wc2 // 2
    pwc = two_pwc // 2
    ph = (2 * h2 - kh + 1) // 2
    h1, hd2, cpad = w1.shape[2], w2.shape[1], w3.shape[1]

    nb_eff = max(1, min(nb, n_img // 2)) if n_img >= 2 else 1   # grid >= 2 steps
    n_pad = _round_up(n_img, nb_eff)
    if n_pad != n_img:
        a_pairs = jnp.pad(a_pairs, ((0, n_pad - n_img), (0, 0), (0, 0)))
    steps = n_pad // nb_eff

    flops = 2 * n_pad * (2 * kh * ph * wcin * two_pwc
                         + ph * pwc * h1 + h1 * hd2 + hd2 * cpad)
    bytes_acc = (n_pad * (h2 * wc2 * 2 + cpad * 4)
                 + (wc.size + w1.size + w2.size + w3.size) * 2
                 + (bc.size + b1.size + b2.size + b3.size) * 4)

    out = pl.pallas_call(
        _make_conv2_mlp_kernel(nb_eff, kh, ph, pwc, wcin),
        out_shape=jax.ShapeDtypeStruct((steps, nb_eff, cpad), jnp.float32),
        grid=(steps,),
        in_specs=[pl.BlockSpec((nb_eff, h2, wc2), lambda i: (i, 0, 0)),
                  pl.BlockSpec(wc.shape, lambda i: (0, 0, 0)),
                  pl.BlockSpec(bc.shape, lambda i: (0, 0)),
                  pl.BlockSpec(w1.shape, lambda i: (0, 0, 0)),
                  pl.BlockSpec(b1.shape, lambda i: (0, 0)),
                  pl.BlockSpec(w2.shape, lambda i: (0, 0)),
                  pl.BlockSpec(b2.shape, lambda i: (0, 0)),
                  pl.BlockSpec(w3.shape, lambda i: (0, 0)),
                  pl.BlockSpec(b3.shape, lambda i: (0, 0))],
        out_specs=pl.BlockSpec((1, nb_eff, cpad), lambda i: (i, 0, 0)),
        scratch_shapes=[pltpu.VMEM((nb_eff, ph, pwc), jnp.bfloat16)],
        compiler_params=pltpu.CompilerParams(
            dimension_semantics=("parallel",),
            vmem_limit_bytes=32 * 1024 * 1024),           # resident set ~0.8 MB
        cost_estimate=pl.CostEstimate(flops=flops, transcendentals=0,
                                      bytes_accessed=bytes_acc),
    )(a_pairs, wc, bc, w1, b1, w2, b2, w3, b3)
    return out.reshape(steps * nb_eff, cpad)[:n_img]


# ------------------------------ parameters ---------------------------------- #

def init_params(key, num_classes=7):
    """PyTorch-layout parameters with PyTorch's default U(-1/sqrt(fan_in), ...)."""
    def uni(k, shape, fan_in):
        bound = 1.0 / jnp.sqrt(jnp.float32(fan_in))
        return jax.random.uniform(k, shape, jnp.float32, -bound, bound)

    ks = jax.random.split(key, 10)
    return {
        "conv1_w": uni(ks[0], (6, 3, 5, 5), 3 * 5 * 5),
        "conv1_b": uni(ks[1], (6,), 3 * 5 * 5),
        "conv2_w": uni(ks[2], (16, 6, 5, 5), 6 * 5 * 5),
        "conv2_b": uni(ks[3], (16,), 6 * 5 * 5),
        "fc1_w": uni(ks[4], (120, 16 * 9 * 9), 16 * 9 * 9),   # torch (out, in)
        "fc1_b": uni(ks[5], (120,), 16 * 9 * 9),
        "fc2_w": uni(ks[6], (84, 120), 120),
        "fc2_b": uni(ks[7], (84,), 120),
        "fc3_w": uni(ks[8], (num_classes, 84), 84),
        "fc3_b": uni(ks[9], (num_classes,), 84),
    }


def prepare_params(p, *, in_hw=48):
    """One-time repack of torch-layout params to kernel layout:
    conv weights -> banded (kh, W*Cin, 2*PW*Cout) bf16 matrices (pool column
    order baked in); conv biases tiled to (1, PW*Cout); fc weights -> (in, out)
    bf16 with the NCHW-flatten permutation folded into fc1 and hidden/output
    dims zero-padded to 128 lanes."""
    kh = 5
    w_in = in_hw
    pw1 = (w_in - kh + 1) // 2            # 22
    pw2 = (pw1 - kh + 1) // 2             # 9
    cout2 = p["conv2_w"].shape[0]         # 16
    h1p = h2p = cp = 128                  # lane-padded MLP dims

    # fc1: (120, 16*9*9) torch (c,h,w) flatten -> (pi, pj*Cout2 + f, 120).
    w1 = p["fc1_w"].reshape(-1, cout2, pw2, pw2)           # (h1, c, h, w)
    w1 = jnp.transpose(w1, (2, 3, 1, 0))                   # (h, w, c, h1)
    w1 = w1.reshape(pw2, pw2 * cout2, -1)                  # (pi, w*c, h1)
    h1, h2, c = w1.shape[-1], p["fc2_w"].shape[0], p["fc3_w"].shape[0]

    return {
        "conv1_w": _banded_conv_weight(p["conv1_w"], w_in, pw1),
        "conv1_b": jnp.tile(p["conv1_b"], pw1).reshape(1, -1).astype(jnp.float32),
        "conv2_w": _banded_conv_weight(p["conv2_w"], pw1, pw2),
        "conv2_b": jnp.tile(p["conv2_b"], pw2).reshape(1, -1).astype(jnp.float32),
        "fc1_w": jnp.pad(w1, ((0, 0), (0, 0), (0, h1p - h1))).astype(jnp.bfloat16),
        "fc1_b": jnp.pad(p["fc1_b"], (0, h1p - h1)).reshape(1, -1),
        "fc2_w": jnp.pad(p["fc2_w"].T, ((0, h1p - h1), (0, h2p - h2))).astype(jnp.bfloat16),
        "fc2_b": jnp.pad(p["fc2_b"], (0, h2p - h2)).reshape(1, -1),
        "fc3_w": jnp.pad(p["fc3_w"].T, ((0, h2p - h2), (0, cp - c))).astype(jnp.bfloat16),
        "fc3_b": jnp.pad(p["fc3_b"], (0, cp - c)).reshape(1, -1),
    }


# ------------------------------- forward ------------------------------------ #

def convnet_forward(q, x, *, num_classes=7):
    """x: (N, 3, 48, 48) f32 NCHW -> logits (N, num_classes) f32."""
    n, cin, h, w = x.shape
    # One NCHW->NHWC transpose, bf16 cast done immediately, then a FREE reshape
    # into pair-row layout (two image rows per row) for the in-kernel im2col.
    x = jnp.transpose(x, (0, 2, 3, 1)).astype(jnp.bfloat16)
    x = x.reshape(n, h // 2, 2 * w * cin)                        # (N, 24, 288)
    a = conv_relu_pool(x, q["conv1_w"], q["conv1_b"])            # (N, 22, 132)
    a = a.reshape(n, a.shape[1] // 2, 2 * a.shape[2])            # (N, 11, 264) free
    logits = conv2_mlp_fused(a, q["conv2_w"], q["conv2_b"],
                             q["fc1_w"], q["fc1_b"], q["fc2_w"], q["fc2_b"],
                             q["fc3_w"], q["fc3_b"])             # (N, 128)
    return logits[:, :num_classes]


def convnet_reference(p, x):
    """Pure-JAX f32 reference with PyTorch semantics (sanity check only)."""
    def conv(x, w, b):
        y = jax.lax.conv_general_dilated(
            x, w, window_strides=(1, 1), padding="VALID",
            dimension_numbers=("NCHW", "OIHW", "NCHW"))
        return jax.nn.relu(y + b[None, :, None, None])

    def pool(x):
        return jax.lax.reduce_window(x, -jnp.inf, jax.lax.max,
                                     (1, 1, 2, 2), (1, 1, 2, 2), "VALID")

    x = pool(conv(x, p["conv1_w"], p["conv1_b"]))
    x = pool(conv(x, p["conv2_w"], p["conv2_b"]))
    x = x.reshape(x.shape[0], -1)
    x = jax.nn.relu(x @ p["fc1_w"].T + p["fc1_b"])
    x = jax.nn.relu(x @ p["fc2_w"].T + p["fc2_b"])
    return x @ p["fc3_w"].T + p["fc3_b"]


if __name__ == "__main__":
    key = jax.random.PRNGKey(0)
    k_params, k_x = jax.random.split(key)

    params = init_params(k_params, num_classes=7)
    prep = prepare_params(params)
    # Input spatial size 48 is what fc1's 16*9*9 implies: ((48-4)/2 - 4)/2 = 9.
    x = jax.random.normal(k_x, (2, 3, 48, 48), dtype=jnp.float32)

    logits = jax.jit(convnet_forward)(prep, x)
    jax.block_until_ready(logits)
    assert logits.shape == (2, 7), logits.shape

    # Sanity check vs. the f32 reference (loose tolerance: matmuls run in bf16).
    ref = jax.jit(convnet_reference)(params, x)
    err = float(jnp.max(jnp.abs(logits - ref)))
    assert err < 5e-2, f"max |logits - ref| = {err}"

    print("KERNEL_OK")
</pallas_src>

<mosaic_0001>
module attributes {stable_mosaic.version = 11 : i64} {
  func.func @kernel(%arg0: i32, %arg1: memref<1x24x288xbf16, #tpu.memory_space<vmem>>, %arg2: memref<5x144x264xbf16, #tpu.memory_space<vmem>>, %arg3: memref<1x132xf32, #tpu.memory_space<vmem>>, %arg4: memref<1x22x132xbf16, #tpu.memory_space<vmem>>) attributes {dimension_semantics = [#tpu.dimension_semantics<parallel>], iteration_bounds = array<i64: 2>, scalar_prefetch = 0 : i64, scratch_operands = 0 : i64, tpu.core_type = #tpu.core_type<tc>, window_params = [{transform_indices = @transform_0, window_bounds = array<i64: 1, 24, 288>}, {pipeline_mode = #tpu.pipeline_mode<synchronous>, transform_indices = @transform_1, window_bounds = array<i64: 5, 144, 264>}, {pipeline_mode = #tpu.pipeline_mode<synchronous>, transform_indices = @transform_2, window_bounds = array<i64: 1, 132>}, {transform_indices = @transform_3, window_bounds = array<i64: 1, 22, 132>}]} {
    %c0 = arith.constant 0 : index
    %c0_0 = arith.constant 0 : index
    %0 = vector.load %arg3[%c0, %c0_0] : memref<1x132xf32, #tpu.memory_space<vmem>>, vector<1x132xf32>
    %c0_1 = arith.constant 0 : index
    %c0_2 = arith.constant 0 : index
    %c0_3 = arith.constant 0 : index
    %1 = vector.load %arg1[%c0_1, %c0_2, %c0_3] : memref<1x24x288xbf16, #tpu.memory_space<vmem>>, vector<1x22x144xbf16>
    %2 = vector.shape_cast %1 : vector<1x22x144xbf16> to vector<22x144xbf16>
    %c0_4 = arith.constant 0 : index
    %c0_5 = arith.constant 0 : index
    %c0_6 = arith.constant 0 : index
    %3 = vector.load %arg2[%c0_4, %c0_5, %c0_6] : memref<5x144x264xbf16, #tpu.memory_space<vmem>>, vector<1x144x264xbf16>
    %4 = vector.shape_cast %3 : vector<1x144x264xbf16> to vector<144x264xbf16>
    %cst = arith.constant dense<0.000000e+00> : vector<22x264xf32>
    %5 = tpu.matmul %2, %4, %cst {dimension_numbers = #tpu.dot_dimension_numbers<[1], [0], [0], [1], [0, 0, 1, 1], [], []>} : vector<22x144xbf16>, vector<144x264xbf16>, vector<22x264xf32> -> vector<22x264xf32>
    %c0_7 = arith.constant 0 : index
    %c0_8 = arith.constant 0 : index
    %c144 = arith.constant 144 : index
    %6 = vector.load %arg1[%c0_7, %c0_8, %c144] : memref<1x24x288xbf16, #tpu.memory_space<vmem>>, vector<1x22x144xbf16>
    %7 = vector.shape_cast %6 : vector<1x22x144xbf16> to vector<22x144xbf16>
    %c1 = arith.constant 1 : index
    %c0_9 = arith.constant 0 : index
    %c0_10 = arith.constant 0 : index
    %8 = vector.load %arg2[%c1, %c0_9, %c0_10] : memref<5x144x264xbf16, #tpu.memory_space<vmem>>, vector<1x144x264xbf16>
    %9 = vector.shape_cast %8 : vector<1x144x264xbf16> to vector<144x264xbf16>
    %cst_11 = arith.constant dense<0.000000e+00> : vector<22x264xf32>
    %10 = tpu.matmul %7, %9, %cst_11 {dimension_numbers = #tpu.dot_dimension_numbers<[1], [0], [0], [1], [0, 0, 1, 1], [], []>} : vector<22x144xbf16>, vector<144x264xbf16>, vector<22x264xf32> -> vector<22x264xf32>
    %11 = arith.addf %5, %10 : vector<22x264xf32>
    %c0_12 = arith.constant 0 : index
    %c1_13 = arith.constant 1 : index
    %c0_14 = arith.constant 0 : index
    %12 = vector.load %arg1[%c0_12, %c1_13, %c0_14] : memref<1x24x288xbf16, #tpu.memory_space<vmem>>, vector<1x22x144xbf16>
    %13 = vector.shape_cast %12 : vector<1x22x144xbf16> to vector<22x144xbf16>
    %c2 = arith.constant 2 : index
    %c0_15 = arith.constant 0 : index
    %c0_16 = arith.constant 0 : index
    %14 = vector.load %arg2[%c2, %c0_15, %c0_16] : memref<5x144x264xbf16, #tpu.memory_space<vmem>>, vector<1x144x264xbf16>
    %15 = vector.shape_cast %14 : vector<1x144x264xbf16> to vector<144x264xbf16>
    %cst_17 = arith.constant dense<0.000000e+00> : vector<22x264xf32>
    %16 = tpu.matmul %13, %15, %cst_17 {dimension_numbers = #tpu.dot_dimension_numbers<[1], [0], [0], [1], [0, 0, 1, 1], [], []>} : vector<22x144xbf16>, vector<144x264xbf16>, vector<22x264xf32> -> vector<22x264xf32>
    %17 = arith.addf %11, %16 : vector<22x264xf32>
    %c0_18 = arith.constant 0 : index
    %c1_19 = arith.constant 1 : index
    %c144_20 = arith.constant 144 : index
    %18 = vector.load %arg1[%c0_18, %c1_19, %c144_20] : memref<1x24x288xbf16, #tpu.memory_space<vmem>>, vector<1x22x144xbf16>
    %19 = vector.shape_cast %18 : vector<1x22x144xbf16> to vector<22x144xbf16>
    %c3 = arith.constant 3 : index
    %c0_21 = arith.constant 0 : index
    %c0_22 = arith.constant 0 : index
    %20 = vector.load %arg2[%c3, %c0_21, %c0_22] : memref<5x144x264xbf16, #tpu.memory_space<vmem>>, vector<1x144x264xbf16>
    %21 = vector.shape_cast %20 : vector<1x144x264xbf16> to vector<144x264xbf16>
    %cst_23 = arith.constant dense<0.000000e+00> : vector<22x264xf32>
    %22 = tpu.matmul %19, %21, %cst_23 {dimension_numbers = #tpu.dot_dimension_numbers<[1], [0], [0], [1], [0, 0, 1, 1], [], []>} : vector<22x144xbf16>, vector<144x264xbf16>, vector<22x264xf32> -> vector<22x264xf32>
    %23 = arith.addf %17, %22 : vector<22x264xf32>
    %c0_24 = arith.constant 0 : index
    %c2_25 = arith.constant 2 : index
    %c0_26 = arith.constant 0 : index
    %24 = vector.load %arg1[%c0_24, %c2_25, %c0_26] : memref<1x24x288xbf16, #tpu.memory_space<vmem>>, vector<1x22x144xbf16>
    %25 = vector.shape_cast %24 : vector<1x22x144xbf16> to vector<22x144xbf16>
    %c4 = arith.constant 4 : index
    %c0_27 = arith.constant 0 : index
    %c0_28 = arith.constant 0 : index
    %26 = vector.load %arg2[%c4, %c0_27, %c0_28] : memref<5x144x264xbf16, #tpu.memory_space<vmem>>, vector<1x144x264xbf16>
    %27 = vector.shape_cast %26 : vector<1x144x264xbf16> to vector<144x264xbf16>
    %cst_29 = arith.constant dense<0.000000e+00> : vector<22x264xf32>
    %28 = tpu.matmul %25, %27, %cst_29 {dimension_numbers = #tpu.dot_dimension_numbers<[1], [0], [0], [1], [0, 0, 1, 1], [], []>} : vector<22x144xbf16>, vector<144x264xbf16>, vector<22x264xf32> -> vector<22x264xf32>
    %29 = arith.addf %23, %28 : vector<22x264xf32>
    %30 = vector.extract_strided_slice %29 {offsets = [0, 0], sizes = [22, 132], strides = [1, 1]} : vector<22x264xf32> to vector<22x132xf32>
    %31 = vector.extract_strided_slice %29 {offsets = [0, 132], sizes = [22, 132], strides = [1, 1]} : vector<22x264xf32> to vector<22x132xf32>
    %32 = arith.maximumf %30, %31 : vector<22x132xf32>
    %c0_30 = arith.constant 0 : index
    %c0_31 = arith.constant 0 : index
    %c144_32 = arith.constant 144 : index
    %33 = vector.load %arg1[%c0_30, %c0_31, %c144_32] : memref<1x24x288xbf16, #tpu.memory_space<vmem>>, vector<1x22x144xbf16>
    %34 = vector.shape_cast %33 : vector<1x22x144xbf16> to vector<22x144xbf16>
    %c0_33 = arith.constant 0 : index
    %c0_34 = arith.constant 0 : index
    %c0_35 = arith.constant 0 : index
    %35 = vector.load %arg2[%c0_33, %c0_34, %c0_35] : memref<5x144x264xbf16, #tpu.memory_space<vmem>>, vector<1x144x264xbf16>
    %36 = vector.shape_cast %35 : vector<1x144x264xbf16> to vector<144x264xbf16>
    %cst_36 = arith.constant dense<0.000000e+00> : vector<22x264xf32>
    %37 = tpu.matmul %34, %36, %cst_36 {dimension_numbers = #tpu.dot_dimension_numbers<[1], [0], [0], [1], [0, 0, 1, 1], [], []>} : vector<22x144xbf16>, vector<144x264xbf16>, vector<22x264xf32> -> vector<22x264xf32>
    %c0_37 = arith.constant 0 : index
    %c1_38 = arith.constant 1 : index
    %c0_39 = arith.constant 0 : index
    %38 = vector.load %arg1[%c0_37, %c1_38, %c0_39] : memref<1x24x288xbf16, #tpu.memory_space<vmem>>, vector<1x22x144xbf16>
    %39 = vector.shape_cast %38 : vector<1x22x144xbf16> to vector<22x144xbf16>
    %c1_40 = arith.constant 1 : index
    %c0_41 = arith.constant 0 : index
    %c0_42 = arith.constant 0 : index
    %40 = vector.load %arg2[%c1_40, %c0_41, %c0_42] : memref<5x144x264xbf16, #tpu.memory_space<vmem>>, vector<1x144x264xbf16>
    %41 = vector.shape_cast %40 : vector<1x144x264xbf16> to vector<144x264xbf16>
    %cst_43 = arith.constant dense<0.000000e+00> : vector<22x264xf32>
    %42 = tpu.matmul %39, %41, %cst_43 {dimension_numbers = #tpu.dot_dimension_numbers<[1], [0], [0], [1], [0, 0, 1, 1], [], []>} : vector<22x144xbf16>, vector<144x264xbf16>, vector<22x264xf32> -> vector<22x264xf32>
    %43 = arith.addf %37, %42 : vector<22x264xf32>
    %c0_44 = arith.constant 0 : index
    %c1_45 = arith.constant 1 : index
    %c144_46 = arith.constant 144 : index
    %44 = vector.load %arg1[%c0_44, %c1_45, %c144_46] : memref<1x24x288xbf16, #tpu.memory_space<vmem>>, vector<1x22x144xbf16>
    %45 = vector.shape_cast %44 : vector<1x22x144xbf16> to vector<22x144xbf16>
    %c2_47 = arith.constant 2 : index
    %c0_48 = arith.constant 0 : index
    %c0_49 = arith.constant 0 : index
    %46 = vector.load %arg2[%c2_47, %c0_48, %c0_49] : memref<5x144x264xbf16, #tpu.memory_space<vmem>>, vector<1x144x264xbf16>
    %47 = vector.shape_cast %46 : vector<1x144x264xbf16> to vector<144x264xbf16>
    %cst_50 = arith.constant dense<0.000000e+00> : vector<22x264xf32>
    %48 = tpu.matmul %45, %47, %cst_50 {dimension_numbers = #tpu.dot_dimension_numbers<[1], [0], [0], [1], [0, 0, 1, 1], [], []>} : vector<22x144xbf16>, vector<144x264xbf16>, vector<22x264xf32> -> vector<22x264xf32>
    %49 = arith.addf %43, %48 : vector<22x264xf32>
    %c0_51 = arith.constant 0 : index
    %c2_52 = arith.constant 2 : index
    %c0_53 = arith.constant 0 : index
    %50 = vector.load %arg1[%c0_51, %c2_52, %c0_53] : memref<1x24x288xbf16, #tpu.memory_space<vmem>>, vector<1x22x144xbf16>
    %51 = vector.shape_cast %50 : vector<1x22x144xbf16> to vector<22x144xbf16>
    %c3_54 = arith.constant 3 : index
    %c0_55 = arith.constant 0 : index
    %c0_56 = arith.constant 0 : index
    %52 = vector.load %arg2[%c3_54, %c0_55, %c0_56] : memref<5x144x264xbf16, #tpu.memory_space<vmem>>, vector<1x144x264xbf16>
    %53 = vector.shape_cast %52 : vector<1x144x264xbf16> to vector<144x264xbf16>
    %cst_57 = arith.constant dense<0.000000e+00> : vector<22x264xf32>
    %54 = tpu.matmul %51, %53, %cst_57 {dimension_numbers = #tpu.dot_dimension_numbers<[1], [0], [0], [1], [0, 0, 1, 1], [], []>} : vector<22x144xbf16>, vector<144x264xbf16>, vector<22x264xf32> -> vector<22x264xf32>
    %55 = arith.addf %49, %54 : vector<22x264xf32>
    %c0_58 = arith.constant 0 : index
    %c2_59 = arith.constant 2 : index
    %c144_60 = arith.constant 144 : index
    %56 = vector.load %arg1[%c0_58, %c2_59, %c144_60] : memref<1x24x288xbf16, #tpu.memory_space<vmem>>, vector<1x22x144xbf16>
    %57 = vector.shape_cast %56 : vector<1x22x144xbf16> to vector<22x144xbf16>
    %c4_61 = arith.constant 4 : index
    %c0_62 = arith.constant 0 : index
    %c0_63 = arith.constant 0 : index
    %58 = vector.load %arg2[%c4_61, %c0_62, %c0_63] : memref<5x144x264xbf16, #tpu.memory_space<vmem>>, vector<1x144x264xbf16>
    %59 = vector.shape_cast %58 : vector<1x144x264xbf16> to vector<144x264xbf16>
    %cst_64 = arith.constant dense<0.000000e+00> : vector<22x264xf32>
    %60 = tpu.matmul %57, %59, %cst_64 {dimension_numbers = #tpu.dot_dimension_numbers<[1], [0], [0], [1], [0, 0, 1, 1], [], []>} : vector<22x144xbf16>, vector<144x264xbf16>, vector<22x264xf32> -> vector<22x264xf32>
    %61 = arith.addf %55, %60 : vector<22x264xf32>
    %62 = vector.extract_strided_slice %61 {offsets = [0, 0], sizes = [22, 132], strides = [1, 1]} : vector<22x264xf32> to vector<22x132xf32>
    %63 = vector.extract_strided_slice %61 {offsets = [0, 132], sizes = [22, 132], strides = [1, 1]} : vector<22x264xf32> to vector<22x132xf32>
    %64 = arith.maximumf %62, %63 : vector<22x132xf32>
    %65 = arith.maximumf %32, %64 : vector<22x132xf32>
    %66 = vector.broadcast %0 : vector<1x132xf32> to vector<22x132xf32>
    %67 = arith.addf %65, %66 : vector<22x132xf32>
    %cst_65 = arith.constant 0.000000e+00 : f32
    %68 = vector.broadcast %cst_65 : f32 to vector<22x132xf32>
    %69 = arith.maximumf %67, %68 : vector<22x132xf32>
    %70 = arith.truncf %69 : vector<22x132xf32> to vector<22x132xbf16>
    %c0_66 = arith.constant 0 : index
    %c0_67 = arith.constant 0 : index
    %c0_68 = arith.constant 0 : index
    %71 = vector.load %arg4[%c0_66, %c0_67, %c0_68] : memref<1x22x132xbf16, #tpu.memory_space<vmem>>, vector<1x22x132xbf16>
    %72 = vector.shape_cast %71 : vector<1x22x132xbf16> to vector<22x132xbf16>
    %73 = vector.shape_cast %70 : vector<22x132xbf16> to vector<1x22x132xbf16>
    tpu.vector_store %arg4[%c0_66, %c0_67, %c0_68], %73 {strides = array<i32>} : memref<1x22x132xbf16, #tpu.memory_space<vmem>>, vector<1x22x132xbf16>,
    return
  }
  func.func @transform_0(%arg0: i32) -> (i32, i32, i32) {
    %c0_i32 = arith.constant 0 : i32
    %c0_i32_0 = arith.constant 0 : i32
    %c0_i32_1 = arith.constant 0 : i32
    return %arg0, %c0_i32, %c0_i32_0 : i32, i32, i32
  }
  func.func @transform_1(%arg0: i32) -> (i32, i32, i32) {
    %c0_i32 = arith.constant 0 : i32
    %c0_i32_0 = arith.constant 0 : i32
    %c0_i32_1 = arith.constant 0 : i32
    %c0_i32_2 = arith.constant 0 : i32
    return %c0_i32, %c0_i32_0, %c0_i32_1 : i32, i32, i32
  }
  func.func @transform_2(%arg0: i32) -> (i32, i32) {
    %c0_i32 = arith.constant 0 : i32
    %c0_i32_0 = arith.constant 0 : i32
    %c0_i32_1 = arith.constant 0 : i32
    return %c0_i32, %c0_i32_0 : i32, i32
  }
  func.func @transform_3(%arg0: i32) -> (i32, i32, i32) {
    %c0_i32 = arith.constant 0 : i32
    %c0_i32_0 = arith.constant 0 : i32
    %c0_i32_1 = arith.constant 0 : i32
    return %arg0, %c0_i32, %c0_i32_0 : i32, i32, i32
  }
}

module attributes {stable_mosaic.version = 11 : i64} {
  func.func @kernel(%arg0: i32, %arg1: memref<1x11x264xbf16, #tpu.memory_space<vmem>>, %arg2: memref<5x132x288xbf16, #tpu.memory_space<vmem>>, %arg3: memref<1x144xf32, #tpu.memory_space<vmem>>, %arg4: memref<9x144x128xbf16, #tpu.memory_space<vmem>>, %arg5: memref<1x128xf32, #tpu.memory_space<vmem>>, %arg6: memref<128x128xbf16, #tpu.memory_space<vmem>>, %arg7: memref<1x128xf32, #tpu.memory_space<vmem>>, %arg8: memref<128x128xbf16, #tpu.memory_space<vmem>>, %arg9: memref<1x128xf32, #tpu.memory_space<vmem>>, %arg10: memref<1x1x128xf32, #tpu.memory_space<vmem>>, %arg11: memref<1x9x144xbf16, #tpu.memory_space<vmem>>) attributes {dimension_semantics = [#tpu.dimension_semantics<parallel>], iteration_bounds = array<i64: 2>, scalar_prefetch = 0 : i64, scratch_operands = 1 : i64, tpu.core_type = #tpu.core_type<tc>, window_params = [{transform_indices = @transform_0, window_bounds = array<i64: 1, 11, 264>}, {pipeline_mode = #tpu.pipeline_mode<synchronous>, transform_indices = @transform_1, window_bounds = array<i64: 5, 132, 288>}, {pipeline_mode = #tpu.pipeline_mode<synchronous>, transform_indices = @transform_2, window_bounds = array<i64: 1, 144>}, {pipeline_mode = #tpu.pipeline_mode<synchronous>, transform_indices = @transform_3, window_bounds = array<i64: 9, 144, 128>}, {pipeline_mode = #tpu.pipeline_mode<synchronous>, transform_indices = @transform_4, window_bounds = array<i64: 1, 128>}, {pipeline_mode = #tpu.pipeline_mode<synchronous>, transform_indices = @transform_5, window_bounds = array<i64: 128, 128>}, {pipeline_mode = #tpu.pipeline_mode<synchronous>, transform_indices = @transform_6, window_bounds = array<i64: 1, 128>}, {pipeline_mode = #tpu.pipeline_mode<synchronous>, transform_indices = @transform_7, window_bounds = array<i64: 128, 128>}, {pipeline_mode = #tpu.pipeline_mode<synchronous>, transform_indices = @transform_8, window_bounds = array<i64: 1, 128>}, {transform_indices = @transform_9, window_bounds = array<i64: 1, 1, 128>}]} {
    %c0 = arith.constant 0 : index
    %c0_0 = arith.constant 0 : index
    %0 = vector.load %arg3[%c0, %c0_0] : memref<1x144xf32, #tpu.memory_space<vmem>>, vector<1x144xf32>
    %c0_1 = arith.constant 0 : index
    %c0_2 = arith.constant 0 : index
    %c0_3 = arith.constant 0 : index
    %1 = vector.load %arg1[%c0_1, %c0_2, %c0_3] : memref<1x11x264xbf16, #tpu.memory_space<vmem>>, vector<1x9x132xbf16>
    %2 = vector.shape_cast %1 : vector<1x9x132xbf16> to vector<9x132xbf16>
    %c0_4 = arith.constant 0 : index
    %c0_5 = arith.constant 0 : index
    %c0_6 = arith.constant 0 : index
    %3 = vector.load %arg2[%c0_4, %c0_5, %c0_6] : memref<5x132x288xbf16, #tpu.memory_space<vmem>>, vector<1x132x288xbf16>
    %4 = vector.shape_cast %3 : vector<1x132x288xbf16> to vector<132x288xbf16>
    %cst = arith.constant dense<0.000000e+00> : vector<9x288xf32>
    %5 = tpu.matmul %2, %4, %cst {dimension_numbers = #tpu.dot_dimension_numbers<[1], [0], [0], [1], [0, 0, 1, 1], [], []>} : vector<9x132xbf16>, vector<132x288xbf16>, vector<9x288xf32> -> vector<9x288xf32>
    %c0_7 = arith.constant 0 : index
    %c0_8 = arith.constant 0 : index
    %c132 = arith.constant 132 : index
    %6 = vector.load %arg1[%c0_7, %c0_8, %c132] : memref<1x11x264xbf16, #tpu.memory_space<vmem>>, vector<1x9x132xbf16>
    %7 = vector.shape_cast %6 : vector<1x9x132xbf16> to vector<9x132xbf16>
    %c1 = arith.constant 1 : index
    %c0_9 = arith.constant 0 : index
    %c0_10 = arith.constant 0 : index
    %8 = vector.load %arg2[%c1, %c0_9, %c0_10] : memref<5x132x288xbf16, #tpu.memory_space<vmem>>, vector<1x132x288xbf16>
    %9 = vector.shape_cast %8 : vector<1x132x288xbf16> to vector<132x288xbf16>
    %cst_11 = arith.constant dense<0.000000e+00> : vector<9x288xf32>
    %10 = tpu.matmul %7, %9, %cst_11 {dimension_numbers = #tpu.dot_dimension_numbers<[1], [0], [0], [1], [0, 0, 1, 1], [], []>} : vector<9x132xbf16>, vector<132x288xbf16>, vector<9x288xf32> -> vector<9x288xf32>
    %11 = arith.addf %5, %10 : vector<9x288xf32>
    %c0_12 = arith.constant 0 : index
    %c1_13 = arith.constant 1 : index
    %c0_14 = arith.constant 0 : index
    %12 = vector.load %arg1[%c0_12, %c1_13, %c0_14] : memref<1x11x264xbf16, #tpu.memory_space<vmem>>, vector<1x9x132xbf16>
    %13 = vector.shape_cast %12 : vector<1x9x132xbf16> to vector<9x132xbf16>
    %c2 = arith.constant 2 : index
    %c0_15 = arith.constant 0 : index
    %c0_16 = arith.constant 0 : index
    %14 = vector.load %arg2[%c2, %c0_15, %c0_16] : memref<5x132x288xbf16, #tpu.memory_space<vmem>>, vector<1x132x288xbf16>
    %15 = vector.shape_cast %14 : vector<1x132x288xbf16> to vector<132x288xbf16>
    %cst_17 = arith.constant dense<0.000000e+00> : vector<9x288xf32>
    %16 = tpu.matmul %13, %15, %cst_17 {dimension_numbers = #tpu.dot_dimension_numbers<[1], [0], [0], [1], [0, 0, 1, 1], [], []>} : vector<9x132xbf16>, vector<132x288xbf16>, vector<9x288xf32> -> vector<9x288xf32>
    %17 = arith.addf %11, %16 : vector<9x288xf32>
    %c0_18 = arith.constant 0 : index
    %c1_19 = arith.constant 1 : index
    %c132_20 = arith.constant 132 : index
    %18 = vector.load %arg1[%c0_18, %c1_19, %c132_20] : memref<1x11x264xbf16, #tpu.memory_space<vmem>>, vector<1x9x132xbf16>
    %19 = vector.shape_cast %18 : vector<1x9x132xbf16> to vector<9x132xbf16>
    %c3 = arith.constant 3 : index
    %c0_21 = arith.constant 0 : index
    %c0_22 = arith.constant 0 : index
    %20 = vector.load %arg2[%c3, %c0_21, %c0_22] : memref<5x132x288xbf16, #tpu.memory_space<vmem>>, vector<1x132x288xbf16>
    %21 = vector.shape_cast %20 : vector<1x132x288xbf16> to vector<132x288xbf16>
    %cst_23 = arith.constant dense<0.000000e+00> : vector<9x288xf32>
    %22 = tpu.matmul %19, %21, %cst_23 {dimension_numbers = #tpu.dot_dimension_numbers<[1], [0], [0], [1], [0, 0, 1, 1], [], []>} : vector<9x132xbf16>, vector<132x288xbf16>, vector<9x288xf32> -> vector<9x288xf32>
    %23 = arith.addf %17, %22 : vector<9x288xf32>
    %c0_24 = arith.constant 0 : index
    %c2_25 = arith.constant 2 : index
    %c0_26 = arith.constant 0 : index
    %24 = vector.load %arg1[%c0_24, %c2_25, %c0_26] : memref<1x11x264xbf16, #tpu.memory_space<vmem>>, vector<1x9x132xbf16>
    %25 = vector.shape_cast %24 : vector<1x9x132xbf16> to vector<9x132xbf16>
    %c4 = arith.constant 4 : index
    %c0_27 = arith.constant 0 : index
    %c0_28 = arith.constant 0 : index
    %26 = vector.load %arg2[%c4, %c0_27, %c0_28] : memref<5x132x288xbf16, #tpu.memory_space<vmem>>, vector<1x132x288xbf16>
    %27 = vector.shape_cast %26 : vector<1x132x288xbf16> to vector<132x288xbf16>
    %cst_29 = arith.constant dense<0.000000e+00> : vector<9x288xf32>
    %28 = tpu.matmul %25, %27, %cst_29 {dimension_numbers = #tpu.dot_dimension_numbers<[1], [0], [0], [1], [0, 0, 1, 1], [], []>} : vector<9x132xbf16>, vector<132x288xbf16>, vector<9x288xf32> -> vector<9x288xf32>
    %29 = arith.addf %23, %28 : vector<9x288xf32>
    %30 = vector.extract_strided_slice %29 {offsets = [0, 0], sizes = [9, 144], strides = [1, 1]} : vector<9x288xf32> to vector<9x144xf32>
    %31 = vector.extract_strided_slice %29 {offsets = [0, 144], sizes = [9, 144], strides = [1, 1]} : vector<9x288xf32> to vector<9x144xf32>
    %32 = arith.maximumf %30, %31 : vector<9x144xf32>
    %c0_30 = arith.constant 0 : index
    %c0_31 = arith.constant 0 : index
    %c132_32 = arith.constant 132 : index
    %33 = vector.load %arg1[%c0_30, %c0_31, %c132_32] : memref<1x11x264xbf16, #tpu.memory_space<vmem>>, vector<1x9x132xbf16>
    %34 = vector.shape_cast %33 : vector<1x9x132xbf16> to vector<9x132xbf16>
    %c0_33 = arith.constant 0 : index
    %c0_34 = arith.constant 0 : index
    %c0_35 = arith.constant 0 : index
    %35 = vector.load %arg2[%c0_33, %c0_34, %c0_35] : memref<5x132x288xbf16, #tpu.memory_space<vmem>>, vector<1x132x288xbf16>
    %36 = vector.shape_cast %35 : vector<1x132x288xbf16> to vector<132x288xbf16>
    %cst_36 = arith.constant dense<0.000000e+00> : vector<9x288xf32>
    %37 = tpu.matmul %34, %36, %cst_36 {dimension_numbers = #tpu.dot_dimension_numbers<[1], [0], [0], [1], [0, 0, 1, 1], [], []>} : vector<9x132xbf16>, vector<132x288xbf16>, vector<9x288xf32> -> vector<9x288xf32>
    %c0_37 = arith.constant 0 : index
    %c1_38 = arith.constant 1 : index
    %c0_39 = arith.constant 0 : index
    %38 = vector.load %arg1[%c0_37, %c1_38, %c0_39] : memref<1x11x264xbf16, #tpu.memory_space<vmem>>, vector<1x9x132xbf16>
    %39 = vector.shape_cast %38 : vector<1x9x132xbf16> to vector<9x132xbf16>
    %c1_40 = arith.constant 1 : index
    %c0_41 = arith.constant 0 : index
    %c0_42 = arith.constant 0 : index
    %40 = vector.load %arg2[%c1_40, %c0_41, %c0_42] : memref<5x132x288xbf16, #tpu.memory_space<vmem>>, vector<1x132x288xbf16>
    %41 = vector.shape_cast %40 : vector<1x132x288xbf16> to vector<132x288xbf16>
    %cst_43 = arith.constant dense<0.000000e+00> : vector<9x288xf32>
    %42 = tpu.matmul %39, %41, %cst_43 {dimension_numbers = #tpu.dot_dimension_numbers<[1], [0], [0], [1], [0, 0, 1, 1], [], []>} : vector<9x132xbf16>, vector<132x288xbf16>, vector<9x288xf32> -> vector<9x288xf32>
    %43 = arith.addf %37, %42 : vector<9x288xf32>
    %c0_44 = arith.constant 0 : index
    %c1_45 = arith.constant 1 : index
    %c132_46 = arith.constant 132 : index
    %44 = vector.load %arg1[%c0_44, %c1_45, %c132_46] : memref<1x11x264xbf16, #tpu.memory_space<vmem>>, vector<1x9x132xbf16>
    %45 = vector.shape_cast %44 : vector<1x9x132xbf16> to vector<9x132xbf16>
    %c2_47 = arith.constant 2 : index
    %c0_48 = arith.constant 0 : index
    %c0_49 = arith.constant 0 : index
    %46 = vector.load %arg2[%c2_47, %c0_48, %c0_49] : memref<5x132x288xbf16, #tpu.memory_space<vmem>>, vector<1x132x288xbf16>
    %47 = vector.shape_cast %46 : vector<1x132x288xbf16> to vector<132x288xbf16>
    %cst_50 = arith.constant dense<0.000000e+00> : vector<9x288xf32>
    %48 = tpu.matmul %45, %47, %cst_50 {dimension_numbers = #tpu.dot_dimension_numbers<[1], [0], [0], [1], [0, 0, 1, 1], [], []>} : vector<9x132xbf16>, vector<132x288xbf16>, vector<9x288xf32> -> vector<9x288xf32>
    %49 = arith.addf %43, %48 : vector<9x288xf32>
    %c0_51 = arith.constant 0 : index
    %c2_52 = arith.constant 2 : index
    %c0_53 = arith.constant 0 : index
    %50 = vector.load %arg1[%c0_51, %c2_52, %c0_53] : memref<1x11x264xbf16, #tpu.memory_space<vmem>>, vector<1x9x132xbf16>
    %51 = vector.shape_cast %50 : vector<1x9x132xbf16> to vector<9x132xbf16>
    %c3_54 = arith.constant 3 : index
    %c0_55 = arith.constant 0 : index
    %c0_56 = arith.constant 0 : index
    %52 = vector.load %arg2[%c3_54, %c0_55, %c0_56] : memref<5x132x288xbf16, #tpu.memory_space<vmem>>, vector<1x132x288xbf16>
    %53 = vector.shape_cast %52 : vector<1x132x288xbf16> to vector<132x288xbf16>
    %cst_57 = arith.constant dense<0.000000e+00> : vector<9x288xf32>
    %54 = tpu.matmul %51, %53, %cst_57 {dimension_numbers = #tpu.dot_dimension_numbers<[1], [0], [0], [1], [0, 0, 1, 1], [], []>} : vector<9x132xbf16>, vector<132x288xbf16>, vector<9x288xf32> -> vector<9x288xf32>
    %55 = arith.addf %49, %54 : vector<9x288xf32>
    %c0_58 = arith.constant 0 : index
    %c2_59 = arith.constant 2 : index
    %c132_60 = arith.constant 132 : index
    %56 = vector.load %arg1[%c0_58, %c2_59, %c132_60] : memref<1x11x264xbf16, #tpu.memory_space<vmem>>, vector<1x9x132xbf16>
    %57 = vector.shape_cast %56 : vector<1x9x132xbf16> to vector<9x132xbf16>
    %c4_61 = arith.constant 4 : index
    %c0_62 = arith.constant 0 : index
    %c0_63 = arith.constant 0 : index
    %58 = vector.load %arg2[%c4_61, %c0_62, %c0_63] : memref<5x132x288xbf16, #tpu.memory_space<vmem>>, vector<1x132x288xbf16>
    %59 = vector.shape_cast %58 : vector<1x132x288xbf16> to vector<132x288xbf16>
    %cst_64 = arith.constant dense<0.000000e+00> : vector<9x288xf32>
    %60 = tpu.matmul %57, %59, %cst_64 {dimension_numbers = #tpu.dot_dimension_numbers<[1], [0], [0], [1], [0, 0, 1, 1], [], []>} : vector<9x132xbf16>, vector<132x288xbf16>, vector<9x288xf32> -> vector<9x288xf32>
    %61 = arith.addf %55, %60 : vector<9x288xf32>
    %62 = vector.extract_strided_slice %61 {offsets = [0, 0], sizes = [9, 144], strides = [1, 1]} : vector<9x288xf32> to vector<9x144xf32>
    %63 = vector.extract_strided_slice %61 {offsets = [0, 144], sizes = [9, 144], strides = [1, 1]} : vector<9x288xf32> to vector<9x144xf32>
    %64 = arith.maximumf %62, %63 : vector<9x144xf32>
    %65 = arith.maximumf %32, %64 : vector<9x144xf32>
    %66 = vector.broadcast %0 : vector<1x144xf32> to vector<9x144xf32>
    %67 = arith.addf %65, %66 : vector<9x144xf32>
    %cst_65 = arith.constant 0.000000e+00 : f32
    %68 = vector.broadcast %cst_65 : f32 to vector<9x144xf32>
    %69 = arith.maximumf %67, %68 : vector<9x144xf32>
    %70 = arith.truncf %69 : vector<9x144xf32> to vector<9x144xbf16>
    %c0_66 = arith.constant 0 : index
    %c0_67 = arith.constant 0 : index
    %c0_68 = arith.constant 0 : index
    %71 = vector.load %arg11[%c0_66, %c0_67, %c0_68] : memref<1x9x144xbf16, #tpu.memory_space<vmem>>, vector<1x9x144xbf16>
    %72 = vector.shape_cast %71 : vector<1x9x144xbf16> to vector<9x144xbf16>
    %73 = vector.shape_cast %70 : vector<9x144xbf16> to vector<1x9x144xbf16>
    tpu.vector_store %arg11[%c0_66, %c0_67, %c0_68], %73 {strides = array<i32>} : memref<1x9x144xbf16, #tpu.memory_space<vmem>>, vector<1x9x144xbf16>,
    %c0_69 = arith.constant 0 : index
    %c0_70 = arith.constant 0 : index
    %c0_71 = arith.constant 0 : index
    %74 = vector.load %arg11[%c0_69, %c0_70, %c0_71] : memref<1x9x144xbf16, #tpu.memory_space<vmem>>, vector<1x1x144xbf16>
    %75 = vector.shape_cast %74 : vector<1x1x144xbf16> to vector<1x144xbf16>
    %c0_72 = arith.constant 0 : index
    %c0_73 = arith.constant 0 : index
    %c0_74 = arith.constant 0 : index
    %76 = vector.load %arg4[%c0_72, %c0_73, %c0_74] : memref<9x144x128xbf16, #tpu.memory_space<vmem>>, vector<1x144x128xbf16>
    %77 = vector.shape_cast %76 : vector<1x144x128xbf16> to vector<144x128xbf16>
    %cst_75 = arith.constant dense<0.000000e+00> : vector<1x128xf32>
    %78 = tpu.matmul %75, %77, %cst_75 {dimension_numbers = #tpu.dot_dimension_numbers<[1], [0], [0], [1], [0, 0, 1, 1], [], []>} : vector<1x144xbf16>, vector<144x128xbf16>, vector<1x128xf32> -> vector<1x128xf32>
    %c0_76 = arith.constant 0 : index
    %c1_77 = arith.constant 1 : index
    %c0_78 = arith.constant 0 : index
    %79 = vector.load %arg11[%c0_76, %c1_77, %c0_78] : memref<1x9x144xbf16, #tpu.memory_space<vmem>>, vector<1x1x144xbf16>
    %80 = vector.shape_cast %79 : vector<1x1x144xbf16> to vector<1x144xbf16>
    %c1_79 = arith.constant 1 : index
    %c0_80 = arith.constant 0 : index
    %c0_81 = arith.constant 0 : index
    %81 = vector.load %arg4[%c1_79, %c0_80, %c0_81] : memref<9x144x128xbf16, #tpu.memory_space<vmem>>, vector<1x144x128xbf16>
    %82 = vector.shape_cast %81 : vector<1x144x128xbf16> to vector<144x128xbf16>
    %cst_82 = arith.constant dense<0.000000e+00> : vector<1x128xf32>
    %83 = tpu.matmul %80, %82, %cst_82 {dimension_numbers = #tpu.dot_dimension_numbers<[1], [0], [0], [1], [0, 0, 1, 1], [], []>} : vector<1x144xbf16>, vector<144x128xbf16>, vector<1x128xf32> -> vector<1x128xf32>
    %84 = arith.addf %78, %83 : vector<1x128xf32>
    %c0_83 = arith.constant 0 : index
    %c2_84 = arith.constant 2 : index
    %c0_85 = arith.constant 0 : index
    %85 = vector.load %arg11[%c0_83, %c2_84, %c0_85] : memref<1x9x144xbf16, #tpu.memory_space<vmem>>, vector<1x1x144xbf16>
    %86 = vector.shape_cast %85 : vector<1x1x144xbf16> to vector<1x144xbf16>
    %c2_86 = arith.constant 2 : index
    %c0_87 = arith.constant 0 : index
    %c0_88 = arith.constant 0 : index
    %87 = vector.load %arg4[%c2_86, %c0_87, %c0_88] : memref<9x144x128xbf16, #tpu.memory_space<vmem>>, vector<1x144x128xbf16>
    %88 = vector.shape_cast %87 : vector<1x144x128xbf16> to vector<144x128xbf16>
    %cst_89 = arith.constant dense<0.000000e+00> : vector<1x128xf32>
    %89 = tpu.matmul %86, %88, %cst_89 {dimension_numbers = #tpu.dot_dimension_numbers<[1], [0], [0], [1], [0, 0, 1, 1], [], []>} : vector<1x144xbf16>, vector<144x128xbf16>, vector<1x128xf32> -> vector<1x128xf32>
    %90 = arith.addf %84, %89 : vector<1x128xf32>
    %c0_90 = arith.constant 0 : index
    %c3_91 = arith.constant 3 : index
    %c0_92 = arith.constant 0 : index
    %91 = vector.load %arg11[%c0_90, %c3_91, %c0_92] : memref<1x9x144xbf16, #tpu.memory_space<vmem>>, vector<1x1x144xbf16>
    %92 = vector.shape_cast %91 : vector<1x1x144xbf16> to vector<1x144xbf16>
    %c3_93 = arith.constant 3 : index
    %c0_94 = arith.constant 0 : index
    %c0_95 = arith.constant 0 : index
    %93 = vector.load %arg4[%c3_93, %c0_94, %c0_95] : memref<9x144x128xbf16, #tpu.memory_space<vmem>>, vector<1x144x128xbf16>
    %94 = vector.shape_cast %93 : vector<1x144x128xbf16> to vector<144x128xbf16>
    %cst_96 = arith.constant dense<0.000000e+00> : vector<1x128xf32>
    %95 = tpu.matmul %92, %94, %cst_96 {dimension_numbers = #tpu.dot_dimension_numbers<[1], [0], [0], [1], [0, 0, 1, 1], [], []>} : vector<1x144xbf16>, vector<144x128xbf16>, vector<1x128xf32> -> vector<1x128xf32>
    %96 = arith.addf %90, %95 : vector<1x128xf32>
    %c0_97 = arith.constant 0 : index
    %c4_98 = arith.constant 4 : index
    %c0_99 = arith.constant 0 : index
    %97 = vector.load %arg11[%c0_97, %c4_98, %c0_99] : memref<1x9x144xbf16, #tpu.memory_space<vmem>>, vector<1x1x144xbf16>
    %98 = vector.shape_cast %97 : vector<1x1x144xbf16> to vector<1x144xbf16>
    %c4_100 = arith.constant 4 : index
    %c0_101 = arith.constant 0 : index
    %c0_102 = arith.constant 0 : index
    %99 = vector.load %arg4[%c4_100, %c0_101, %c0_102] : memref<9x144x128xbf16, #tpu.memory_space<vmem>>, vector<1x144x128xbf16>
    %100 = vector.shape_cast %99 : vector<1x144x128xbf16> to vector<144x128xbf16>
    %cst_103 = arith.constant dense<0.000000e+00> : vector<1x128xf32>
    %101 = tpu.matmul %98, %100, %cst_103 {dimension_numbers = #tpu.dot_dimension_numbers<[1], [0], [0], [1], [0, 0, 1, 1], [], []>} : vector<1x144xbf16>, vector<144x128xbf16>, vector<1x128xf32> -> vector<1x128xf32>
    %102 = arith.addf %96, %101 : vector<1x128xf32>
    %c0_104 = arith.constant 0 : index
    %c5 = arith.constant 5 : index
    %c0_105 = arith.constant 0 : index
    %103 = vector.load %arg11[%c0_104, %c5, %c0_105] : memref<1x9x144xbf16, #tpu.memory_space<vmem>>, vector<1x1x144xbf16>
    %104 = vector.shape_cast %103 : vector<1x1x144xbf16> to vector<1x144xbf16>
    %c5_106 = arith.constant 5 : index
    %c0_107 = arith.constant 0 : index
    %c0_108 = arith.constant 0 : index
    %105 = vector.load %arg4[%c5_106, %c0_107, %c0_108] : memref<9x144x128xbf16, #tpu.memory_space<vmem>>, vector<1x144x128xbf16>
    %106 = vector.shape_cast %105 : vector<1x144x128xbf16> to vector<144x128xbf16>
    %cst_109 = arith.constant dense<0.000000e+00> : vector<1x128xf32>
    %107 = tpu.matmul %104, %106, %cst_109 {dimension_numbers = #tpu.dot_dimension_numbers<[1], [0], [0], [1], [0, 0, 1, 1], [], []>} : vector<1x144xbf16>, vector<144x128xbf16>, vector<1x128xf32> -> vector<1x128xf32>
    %108 = arith.addf %102, %107 : vector<1x128xf32>
    %c0_110 = arith.constant 0 : index
    %c6 = arith.constant 6 : index
    %c0_111 = arith.constant 0 : index
    %109 = vector.load %arg11[%c0_110, %c6, %c0_111] : memref<1x9x144xbf16, #tpu.memory_space<vmem>>, vector<1x1x144xbf16>
    %110 = vector.shape_cast %109 : vector<1x1x144xbf16> to vector<1x144xbf16>
    %c6_112 = arith.constant 6 : index
    %c0_113 = arith.constant 0 : index
    %c0_114 = arith.constant 0 : index
    %111 = vector.load %arg4[%c6_112, %c0_113, %c0_114] : memref<9x144x128xbf16, #tpu.memory_space<vmem>>, vector<1x144x128xbf16>
    %112 = vector.shape_cast %111 : vector<1x144x128xbf16> to vector<144x128xbf16>
    %cst_115 = arith.constant dense<0.000000e+00> : vector<1x128xf32>
    %113 = tpu.matmul %110, %112, %cst_115 {dimension_numbers = #tpu.dot_dimension_numbers<[1], [0], [0], [1], [0, 0, 1, 1], [], []>} : vector<1x144xbf16>, vector<144x128xbf16>, vector<1x128xf32> -> vector<1x128xf32>
    %114 = arith.addf %108, %113 : vector<1x128xf32>
    %c0_116 = arith.constant 0 : index
    %c7 = arith.constant 7 : index
    %c0_117 = arith.constant 0 : index
    %115 = vector.load %arg11[%c0_116, %c7, %c0_117] : memref<1x9x144xbf16, #tpu.memory_space<vmem>>, vector<1x1x144xbf16>
    %116 = vector.shape_cast %115 : vector<1x1x144xbf16> to vector<1x144xbf16>
    %c7_118 = arith.constant 7 : index
    %c0_119 = arith.constant 0 : index
    %c0_120 = arith.constant 0 : index
    %117 = vector.load %arg4[%c7_118, %c0_119, %c0_120] : memref<9x144x128xbf16, #tpu.memory_space<vmem>>, vector<1x144x128xbf16>
    %118 = vector.shape_cast %117 : vector<1x144x128xbf16> to vector<144x128xbf16>
    %cst_121 = arith.constant dense<0.000000e+00> : vector<1x128xf32>
    %119 = tpu.matmul %116, %118, %cst_121 {dimension_numbers = #tpu.dot_dimension_numbers<[1], [0], [0], [1], [0, 0, 1, 1], [], []>} : vector<1x144xbf16>, vector<144x128xbf16>, vector<1x128xf32> -> vector<1x128xf32>
    %120 = arith.addf %114, %119 : vector<1x128xf32>
    %c0_122 = arith.constant 0 : index
    %c8 = arith.constant 8 : index
    %c0_123 = arith.constant 0 : index
    %121 = vector.load %arg11[%c0_122, %c8, %c0_123] : memref<1x9x144xbf16, #tpu.memory_space<vmem>>, vector<1x1x144xbf16>
    %122 = vector.shape_cast %121 : vector<1x1x144xbf16> to vector<1x144xbf16>
    %c8_124 = arith.constant 8 : index
    %c0_125 = arith.constant 0 : index
    %c0_126 = arith.constant 0 : index
    %123 = vector.load %arg4[%c8_124, %c0_125, %c0_126] : memref<9x144x128xbf16, #tpu.memory_space<vmem>>, vector<1x144x128xbf16>
    %124 = vector.shape_cast %123 : vector<1x144x128xbf16> to vector<144x128xbf16>
    %cst_127 = arith.constant dense<0.000000e+00> : vector<1x128xf32>
    %125 = tpu.matmul %122, %124, %cst_127 {dimension_numbers = #tpu.dot_dimension_numbers<[1], [0], [0], [1], [0, 0, 1, 1], [], []>} : vector<1x144xbf16>, vector<144x128xbf16>, vector<1x128xf32> -> vector<1x128xf32>
    %126 = arith.addf %120, %125 : vector<1x128xf32>
    %c0_128 = arith.constant 0 : index
    %c0_129 = arith.constant 0 : index
    %127 = vector.load %arg5[%c0_128, %c0_129] : memref<1x128xf32, #tpu.memory_space<vmem>>, vector<1x128xf32>
    %128 = arith.addf %126, %127 : vector<1x128xf32>
    %cst_130 = arith.constant 0.000000e+00 : f32
    %129 = vector.broadcast %cst_130 : f32 to vector<1x128xf32>
    %130 = arith.maximumf %128, %129 : vector<1x128xf32>
    %131 = arith.truncf %130 : vector<1x128xf32> to vector<1x128xbf16>
    %c0_131 = arith.constant 0 : index
    %c0_132 = arith.constant 0 : index
    %132 = vector.load %arg6[%c0_131, %c0_132] : memref<128x128xbf16, #tpu.memory_space<vmem>>, vector<128x128xbf16>
    %cst_133 = arith.constant dense<0.000000e+00> : vector<1x128xf32>
    %133 = tpu.matmul %131, %132, %cst_133 {dimension_numbers = #tpu.dot_dimension_numbers<[1], [0], [0], [1], [0, 0, 1, 1], [], []>} : vector<1x128xbf16>, vector<128x128xbf16>, vector<1x128xf32> -> vector<1x128xf32>
    %c0_134 = arith.constant 0 : index
    %c0_135 = arith.constant 0 : index
    %134 = vector.load %arg7[%c0_134, %c0_135] : memref<1x128xf32, #tpu.memory_space<vmem>>, vector<1x128xf32>
    %135 = arith.addf %133, %134 : vector<1x128xf32>
    %cst_136 = arith.constant 0.000000e+00 : f32
    %136 = vector.broadcast %cst_136 : f32 to vector<1x128xf32>
    %137 = arith.maximumf %135, %136 : vector<1x128xf32>
    %138 = arith.truncf %137 : vector<1x128xf32> to vector<1x128xbf16>
    %c0_137 = arith.constant 0 : index
    %c0_138 = arith.constant 0 : index
    %139 = vector.load %arg8[%c0_137, %c0_138] : memref<128x128xbf16, #tpu.memory_space<vmem>>, vector<128x128xbf16>
    %cst_139 = arith.constant dense<0.000000e+00> : vector<1x128xf32>
    %140 = tpu.matmul %138, %139, %cst_139 {dimension_numbers = #tpu.dot_dimension_numbers<[1], [0], [0], [1], [0, 0, 1, 1], [], []>} : vector<1x128xbf16>, vector<128x128xbf16>, vector<1x128xf32> -> vector<1x128xf32>
    %c0_140 = arith.constant 0 : index
    %c0_141 = arith.constant 0 : index
    %141 = vector.load %arg9[%c0_140, %c0_141] : memref<1x128xf32, #tpu.memory_space<vmem>>, vector<1x128xf32>
    %142 = arith.addf %140, %141 : vector<1x128xf32>
    %c0_142 = arith.constant 0 : index
    %c0_143 = arith.constant 0 : index
    %c0_144 = arith.constant 0 : index
    %143 = vector.load %arg10[%c0_142, %c0_143, %c0_144] : memref<1x1x128xf32, #tpu.memory_space<vmem>>, vector<1x1x128xf32>
    %144 = vector.shape_cast %143 : vector<1x1x128xf32> to vector<1x128xf32>
    %145 = vector.shape_cast %142 : vector<1x128xf32> to vector<1x1x128xf32>
    tpu.vector_store %arg10[%c0_142, %c0_143, %c0_144], %145 {strides = array<i32>} : memref<1x1x128xf32, #tpu.memory_space<vmem>>, vector<1x1x128xf32>,
    return
  }
  func.func @transform_0(%arg0: i32) -> (i32, i32, i32) {
    %c0_i32 = arith.constant 0 : i32
    %c0_i32_0 = arith.constant 0 : i32
    %c0_i32_1 = arith.constant 0 : i32
    return %arg0, %c0_i32, %c0_i32_0 : i32, i32, i32
  }
  func.func @transform_1(%arg0: i32) -> (i32, i32, i32) {
    %c0_i32 = arith.constant 0 : i32
    %c0_i32_0 = arith.constant 0 : i32
    %c0_i32_1 = arith.constant 0 : i32
    %c0_i32_2 = arith.constant 0 : i32
    return %c0_i32, %c0_i32_0, %c0_i32_1 : i32, i32, i32
  }
  func.func @transform_2(%arg0: i32) -> (i32, i32) {
    %c0_i32 = arith.constant 0 : i32
    %c0_i32_0 = arith.constant 0 : i32
    %c0_i32_1 = arith.constant 0 : i32
    return %c0_i32, %c0_i32_0 : i32, i32
  }
  func.func @transform_3(%arg0: i32) -> (i32, i32, i32) {
    %c0_i32 = arith.constant 0 : i32
    %c0_i32_0 = arith.constant 0 : i32
    %c0_i32_1 = arith.constant 0 : i32
    %c0_i32_2 = arith.constant 0 : i32
    return %c0_i32, %c0_i32_0, %c0_i32_1 : i32, i32, i32
  }
  func.func @transform_4(%arg0: i32) -> (i32, i32) {
    %c0_i32 = arith.constant 0 : i32
    %c0_i32_0 = arith.constant 0 : i32
    %c0_i32_1 = arith.constant 0 : i32
    return %c0_i32, %c0_i32_0 : i32, i32
  }
  func.func @transform_5(%arg0: i32) -> (i32, i32) {
    %c0_i32 = arith.constant 0 : i32
    %c0_i32_0 = arith.constant 0 : i32
    %c0_i32_1 = arith.constant 0 : i32
    return %c0_i32, %c0_i32_0 : i32, i32
  }
  func.func @transform_6(%arg0: i32) -> (i32, i32) {
    %c0_i32 = arith.constant 0 : i32
    %c0_i32_0 = arith.constant 0 : i32
    %c0_i32_1 = arith.constant 0 : i32
    return %c0_i32, %c0_i32_0 : i32, i32
  }
  func.func @transform_7(%arg0: i32) -> (i32, i32) {
    %c0_i32 = arith.constant 0 : i32
    %c0_i32_0 = arith.constant 0 : i32
    %c0_i32_1 = arith.constant 0 : i32
    return %c0_i32, %c0_i32_0 : i32, i32
  }
  func.func @transform_8(%arg0: i32) -> (i32, i32) {
    %c0_i32 = arith.constant 0 : i32
    %c0_i32_0 = arith.constant 0 : i32
    %c0_i32_1 = arith.constant 0 : i32
    return %c0_i32, %c0_i32_0 : i32, i32
  }
  func.func @transform_9(%arg0: i32) -> (i32, i32, i32) {
    %c0_i32 = arith.constant 0 : i32
    %c0_i32_0 = arith.constant 0 : i32
    %c0_i32_1 = arith.constant 0 : i32
    return %arg0, %c0_i32, %c0_i32_0 : i32, i32, i32
  }
}

</mosaic_0001>

<bundles_post_ra>
// kernel: convnet_forward.2
= control target key start
LH: loop header
LB: loop body
LE: loop exit
PB: predicated region body
PF: predicated region fallthrough
CT: control target
= control target key end

     0   :  { %s3128_s12 = smov 0   ;;  %s4526_s0 = inlined_call_operand.vmem [shape: bf16[2,24,288], index: 0, kind: input, shape index: {}]   ;;  %s4527_s1 = inlined_call_operand.vmem [shape: bf16[5,144,264], index: 1, kind: input, shape index: {}]   ;;  %s4528_s2 = inlined_call_operand.vmem [shape: f32[1,132], index: 2, kind: input, shape index: {}]   ;;  %s4529_s3 = inlined_call_operand.vmem [shape: bf16[2,22,132], index: 3, kind: output, shape index: {}]  }
   0x1 LB: > { %s2510_s13 = sadd.s32 4294967295, %s3103_s12   ;;  %p2514_p0 = scmp.ge.s32.totalorder %s3103_s12, 1  ;;  %s3103_s12 = sphi %s3128_s12, %s13_s12  }
   0x2   : > { %p137_p1 = scmp.lt.s32.totalorder %s3103_s12, 3 }
   0x4   : > { %p138_p2 = pnand %p2514_p0, %p137_p1 }
   0x6   : > { %141 = sbr.rel (%p138_p2) target bundleno = 798 (0x31e), region = 32 }
   0xb   : > { %p161_p3 = scmp.lt.s32.totalorder %s2510_s13, 1  ;;  %v2877_v0 = vld [vmem:[%s4527_s1 + $0x184] ss:$12 sps:$4 sm:$0xff]   ;;  %v2879_v1 = vld [vmem:[%s4527_s1 + $0x180] ss:$12 sps:$4 sm:$0xff]   ;;  %v4531_v2 = vmov 0  }
   0xc   : > { %429 = vmatprep.subr.bf16.mxu0 %v2877_v0  ;;  %480 = vmatprep.subr.bf16.mxu1 %v4531_v2  ;;  %v2880_v3 = vld [vmem:[%s4527_s1 + $0x188] ss:$12 sps:$4 sm:$0xff]   ;;  %v2881_v4 = vld [vmem:[%s4527_s1 + $0x16c] ss:$12 sps:$4 sm:$0xff]   ;;  %v2884_v6 = vld [vmem:[%s4527_s1 + $0x170] ss:$12 sps:$4 sm:$0xff]  }
   0xd   : > { %s4728_s13 = smov (!%p161_p3, %s2510_s13), 1  ;;  %430 = vmatpush1.bf16.msra.mxu0 %v2879_v1  ;;  %v2883_v5 = vld [vmem:[%s4527_s1 + $0x168] ss:$12 sps:$4 sm:$0xff]   ;;  %481 = vmatpush1.bf16.msra.mxu1 %v2880_v3  ;;  %v2887_v8 = vld [vmem:[%s4527_s1 + $0x150] ss:$12 sps:$4 sm:$0xff]   ;;  %s3106_s11 = smov 112  }
   0xe   : > { %s2860_s24 = smul.u32 36, %s4728_s13  ;;  %431 = vmatprep.subr.bf16.mxu0 %v2881_v4  ;;  %482 = vmatprep.subr.bf16.mxu1 %v4531_v2  ;;  %v2885_v7 = vld [vmem:[%s4527_s1 + $0x154] ss:$12 sps:$4 sm:$0xff]   ;;  %v2888_v9 = vld [vmem:[%s4527_s1 + $0x158] ss:$12 sps:$4 sm:$0xff]   ;;  %vm422_vm1 = vcmask 130048  }
   0xf   : > { %v2889_v15 = vld [vmem:[%s4527_s1 + $0x13c] ss:$12 sps:$4 sm:$0xff]   ;;  %v2891_v18 = vld [vmem:[%s4527_s1 + $0x138] ss:$12 sps:$4 sm:$0xff]   ;;  %v2892_v19 = vld [vmem:[%s4527_s1 + $0x140] ss:$12 sps:$4 sm:$0xff]  }
  0x10   : > { %s3168_s6 = scalar_lea.vmem %s4526_s0, %s2860_s24  ;;  %v2893_v20 = vld [vmem:[%s4527_s1 + $0x124] ss:$12 sps:$4 sm:$0xff]   ;;  %v2895_v23 = vld [vmem:[%s4527_s1 + $0x120] ss:$12 sps:$4 sm:$0xff]   ;;  %v2896_v24 = vld [vmem:[%s4527_s1 + $0x128] ss:$12 sps:$4 sm:$0xff]  }
  0x11   : > { %v212_v10 = vld [vmem:[%s3168_s6 + $0x4] sm:$0xff]  ;;  %v3175_v11 = vld [vmem:[%s3168_s6 + $0x10] sm:$0xff]  ;;  %v214_v12 = vld [vmem:[%s3168_s6 + $0x1c] sm:$0x77]  ;;  %432 = vmatpush1.bf16.msra.mxu0 %v2883_v5  ;;  %483 = vmatpush1.bf16.msra.mxu1 %v2884_v6  ;;  %vm835_vm0 = vsmask.f32 7424 }
  0x12   : > { %v2553_v13 = vcombine.low %v212_v10, %v3175_v11  ;;  %v2555_v14 = vcombine.low %v214_v12, %v214_v12  ;;  %433 = vmatprep.subr.bf16.mxu0 %v2885_v7  ;;  %484 = vmatprep.subr.bf16.mxu1 %v4531_v2  ;;  %v2554_v16 = vcombine.high %v212_v10, %v3175_v11  ;;  %v2897_v25 = vld [vmem:[%s4527_s1 + $0x10c] ss:$12 sps:$4 sm:$0xff]   ;;  %v2899_v28 = vld [vmem:[%s4527_s1 + $0x108] ss:$12 sps:$4 sm:$0xff]   ;;  %v2900_v31 = vld [vmem:[%s4527_s1 + $0x110] ss:$12 sps:$4 sm:$0xff]  }
  0x13   : > { %v2556_v17 = vcombine.high %v214_v12, %v214_v12  ;;  %v1125_v32 = vld [vmem:[%s3168_s6 + $0x1c] sm:$0xff]  ;;  %v2904_v42 = vld [vmem:[%s4527_s1 + $0xf8] ss:$12 sps:$4 sm:$0xff]   ;;  %vm273_vm2 = vcmask 916480   ;;  %v3267_v59 = vld [vmem:[%s4527_s1 + $0xa8] ss:$12 sps:$4 sm:$0xff]  }
  0x14   : > { %265 = vrot.lane.b32.xlu0 %v2553_v13, %s3106_s11  ;;  %269 = vrot.lane.b32.xlu1 %v2555_v14, %s3106_s11  ;;  %v1171_v21 = vshll.u32 %v2553_v13, 16  ;;  %v1183_v22 = vshll.u32 %v2554_v16, 16  ;;  %v1181_v26 = vshrl.u32 %v2554_v16, 16  ;;  %v1169_v27 = vshrl.u32 %v2553_v13, 16  ;;  %v2901_v33 = vld [vmem:[%s4527_s1 + $0xf4] ss:$12 sps:$4 sm:$0xff]  }
  0x15   : > { %434 = vmatpush1.bf16.msra.mxu0 %v2887_v8  ;;  %485 = vmatpush1.bf16.msra.mxu1 %v2888_v9  ;;  %v3218_v34 = vcombine.high %v1125_v32, %v1125_v32  ;;  %v3220_v35 = vcombine.low %v1125_v32, %v1125_v32  ;;  %v2903_v40 = vld [vmem:[%s4527_s1 + $0xf0] ss:$12 sps:$4 sm:$0xff]   ;;  %v2909_v49 = vld [vmem:[%s4527_s1 + $0xd8] ss:$12 sps:$4 sm:$0xff]   ;;  %v2910_v50 = vld [vmem:[%s4527_s1 + $0xe0] ss:$12 sps:$4 sm:$0xff]  }
  0x16   : > { %435 = vmatprep.subr.bf16.mxu0 %v2889_v15  ;;  %486 = vmatprep.subr.bf16.mxu1 %v4531_v2  ;;  %v1185_v29 = vrot.slane %v1183_v22, 1  ;;  %v1173_v30 = vrot.slane %v1171_v21, 1  ;;  %v2905_v43 = vld [vmem:[%s4527_s1 + $0xdc] ss:$12 sps:$4 sm:$0xff]   ;;  %v2913_v54 = vld [vmem:[%s4527_s1 + $0x198] ss:$12 sps:$4 sm:$0xff]  }
  0x17   : > { %v1188_v37 = vshll.u32 %v3218_v34, 16  ;;  %v1176_v39 = vshll.u32 %v3220_v35, 16  ;;  %v1195_v41 = vshrl.u32 %v3218_v34, 16  ;;  %v1192_v46 = vshrl.u32 %v3220_v35, 16  ;;  %v2911_v52 = vld [vmem:[%s4527_s1 + $0x19c] ss:$12 sps:$4 sm:$0xff]  }
  0x18   : > { %267 = vrot.lane.b32.xlu0 %v2554_v16, %s3106_s11  ;;  %271 = vrot.lane.b32.xlu1 %v2556_v17, %s3106_s11  ;;  %v1186_v36 = vor.u32 %v1185_v29, %v1181_v26  ;;  %v1174_v38 = vor.u32 %v1173_v30, %v1169_v27  ;;  %v2914_v55 = vld [vmem:[%s4527_s1 + $0x1a0] ss:$12 sps:$4 sm:$0xff]   ;;  %v3272_v60 = vld [vmem:[%s4527_s1 + $0xb0] ss:$12 sps:$4 sm:$0xff]   ;;  %vm1511_vm3 = vcmask 1046528   ;;  %s3107_s7 = smov 124  }
  0x19   : > { %436 = vmatpush1.bf16.msra.mxu0 %v2891_v18  ;;  %487 = vmatpush1.bf16.msra.mxu1 %v2892_v19  ;;  %v1190_v44 = vrot.slane %v1188_v37, 1  ;;  %v1178_v45 = vrot.slane %v1176_v39, 1  ;;  %v2917_v56 = vld [vmem:[%s4527_s1 + $0xac] ss:$12 sps:$4 sm:$0xff]   ;;  %v3279_v62 = vld [vmem:[%s4527_s1 + $0x94] ss:$12 sps:$4 sm:$0xff]  }
  0x1a   : > { %437 = vmatprep.subr.bf16.mxu0 %v2893_v20  ;;  %488 = vmatprep.subr.bf16.mxu1 %v4531_v2  ;;  %v3298_v1 = vld [vmem:[%s4527_s1 + $0x90] ss:$12 sps:$4 sm:$0xff]   ;;  %v3303_v3 = vld [vmem:[%s4527_s1 + $0x98] ss:$12 sps:$4 sm:$0xff]   ;;  %v3330_v8 = vld [vmem:[%s4527_s1 + $0x80] ss:$12 sps:$4 sm:$0xff]  }
  0x1b   : > { %v1191_v47 = vsel %vm835_vm0, %v1186_v36, %v1190_v44  ;;  %v1179_v48 = vsel %vm835_vm0, %v1174_v38, %v1178_v45  ;;  %v1197_v51 = vor.u32 %v1195_v41, %v1190_v44  ;;  %v1194_v53 = vor.u32 %v1192_v46, %v1178_v45  ;;  %v3310_v4 = vld [vmem:[%s4527_s1 + $0x7c] ss:$12 sps:$4 sm:$0xff]   ;;  %v173_v5 = vld [vmem:[%s3168_s6] sm:$0xff]  ;;  %v3318_v6 = vld [vmem:[%s3168_s6 + $0xc] sm:$0xff]  ;;  %s2861_s10 = smul.u32 24, %s4728_s13 }
  0x1c   : > { %1200 = vrot.lane.b32.xlu1 %v1191_v47, %s3106_s11  ;;  %1198 = vrot.lane.b32.xlu0 %v1179_v48, %s3106_s11  ;;  %v3325_v7 = vld [vmem:[%s4527_s1 + $0x78] ss:$12 sps:$4 sm:$0xff]   ;;  %v3344_v12 = vcombine.high %v173_v5, %v3318_v6  ;;  %v3353_v13 = vld [vmem:[%s4527_s1 + $0x60] ss:$12 sps:$4 sm:$0xff]   ;;  %v3470_v32 = vcombine.low %v173_v5, %v3318_v6  ;;  %vm1796_vm4 = vcmask 1014784   ;;  %vm2446_vm5 = vcmask 1043456  }
  0x1d   : > { %438 = vmatpush1.bf16.msra.mxu0 %v2895_v23  ;;  %489 = vmatpush1.bf16.msra.mxu1 %v2896_v24  ;;  %v3341_v10 = vld [vmem:[%s4527_s1 + $0x64] ss:$12 sps:$4 sm:$0xff]   ;;  %v3358_v14 = vld [vmem:[%s4527_s1 + $0x68] ss:$12 sps:$4 sm:$0xff]   ;;  %v3365_v15 = vld [vmem:[%s4527_s1 + $0x4c] ss:$12 sps:$4 sm:$0xff]   ;;  %s170_s15 = scalar_lea.vmem %s4529_s3, %s2861_s10 }
  0x1e   : > { %439 = vmatprep.subr.bf16.mxu0 %v2897_v25  ;;  %490 = vmatprep.subr.bf16.mxu1 %v4531_v2  ;;  %v3376_v16 = vld [vmem:[%s4527_s1 + $0x48] ss:$12 sps:$4 sm:$0xff]   ;;  %v3381_v17 = vld [vmem:[%s4527_s1 + $0x50] ss:$12 sps:$4 sm:$0xff]   ;;  %v3400_v20 = vld [vmem:[%s4527_s1 + $0x38] ss:$12 sps:$4 sm:$0xff]  }
  0x1f   : > { %v3388_v18 = vld [vmem:[%s4527_s1 + $0x34] ss:$12 sps:$4 sm:$0xff]   ;;  %v3395_v19 = vld [vmem:[%s4527_s1 + $0x30] ss:$12 sps:$4 sm:$0xff]   ;;  %v3414_v22 = vld [vmem:[%s4527_s1 + $0x18] ss:$12 sps:$4 sm:$0xff]  }
  0x20   : > { %1204 = vrot.lane.b32.xlu1 %v1197_v51, %s3106_s11  ;;  %1202 = vrot.lane.b32.xlu0 %v1194_v53, %s3106_s11  ;;  %v3407_v21 = vld [vmem:[%s4527_s1 + $0x1c] ss:$12 sps:$4 sm:$0xff]   ;;  %v3419_v23 = vld [vmem:[%s4527_s1 + $0x20] ss:$12 sps:$4 sm:$0xff]   ;;  %v850_v37 = vshll.u32 %v3344_v12, 16  ;;  %vm2447_vm6 = vcmask 31748  }
  0x21   : > { %440 = vmatpush1.bf16.msra.mxu0 %v2899_v28  ;;  %491 = vmatpush1.bf16.msra.mxu1 %v2900_v31  ;;  %v3426_v24 = vld [vmem:[%s4527_s1 + $0x4] ss:$12 sps:$4 sm:$0xff]   ;;  %v3433_v25 = vld [vmem:[%s4527_s1] ss:$12 sps:$4 sm:$0xff]   ;;  %v3438_v26 = vld [vmem:[%s4527_s1 + $0x8] ss:$12 sps:$4 sm:$0xff]  }
  0x22   : > { %441 = vmatprep.subr.bf16.mxu0 %v2901_v33  ;;  %492 = vmatprep.subr.bf16.mxu1 %v4531_v2  ;;  %v3445_v27 = vld [vmem:[%s4527_s1 + $0xc4] ss:$12 sps:$4 sm:$0xff]   ;;  %v3452_v28 = vld [vmem:[%s4527_s1 + $0xc0] ss:$12 sps:$4 sm:$0xff]   ;;  %v3457_v29 = vld [vmem:[%s4527_s1 + $0xc8] ss:$12 sps:$4 sm:$0xff]  }
  0x23   : > { %v3460_v30 = vld [vmem:[%s3168_s6 + $0x18] sm:$0xff]  ;;  %v3488_v39 = vld [vmem:[%s4527_s1 + $0x260] ss:$12 sps:$4 sm:$0xff]   ;;  %v3511_v46 = vld [vmem:[%s4527_s1 + $0x248] ss:$12 sps:$4 sm:$0xff]   ;;  %vm2451_vm8 = vcmask 1042432  }
  0x24   : > { %v3467_v31 = vld [vmem:[%s4527_s1 + $0x25c] ss:$12 sps:$4 sm:$0xff]   ;;  %v3475_v36 = vcombine.high %v3460_v30, %v3460_v30  ;;  %v3483_v38 = vld [vmem:[%s4527_s1 + $0x258] ss:$12 sps:$4 sm:$0xff]   ;;  %v3506_v45 = vld [vmem:[%s4527_s1 + $0x240] ss:$12 sps:$4 sm:$0xff]  }
  0x25   : > { %442 = vmatpush1.bf16.msra.mxu0 %v2903_v40  ;;  %493 = vmatpush1.bf16.msra.mxu1 %v2904_v42  ;;  %v175_v33 = vld [vmem:[%s3168_s6 + $0x18] sm:$0x77]  ;;  %v3495_v40 = vld [vmem:[%s4527_s1 + $0x244] ss:$12 sps:$4 sm:$0xff]   ;;  %v848_v42 = vshrl.u32 %v3344_v12, 16  ;;  %vm4512_vm7 = vmor %vm2447_vm6, %vm2446_vm5  ;;  %vm2452_vm9 = vcmask 30724  }
  0x26   : > { %443 = vmatprep.subr.bf16.mxu0 %v2905_v43  ;;  %494 = vmatprep.subr.bf16.mxu1 %v4531_v2  ;;  %v2591_v41 = vcombine.high %v175_v33, %v175_v33  ;;  %v852_v43 = vrot.slane %v850_v37, 1  ;;  %v855_v44 = vshll.u32 %v3475_v36, 16  ;;  %v3518_v47 = vld [vmem:[%s4527_s1 + $0x22c] ss:$12 sps:$4 sm:$0xff]   ;;  %v2590_v48 = vcombine.low %v175_v33, %v175_v33  ;;  %v3529_v51 = vld [vmem:[%s4527_s1 + $0x228] ss:$12 sps:$4 sm:$0xff]   ;;  %vm2453_vm10 = vmor %vm2452_vm9, %vm2451_vm8 }
  0x27   : > { %v3541_v53 = vld [vmem:[%s4527_s1 + $0x214] ss:$12 sps:$4 sm:$0xff]  }
  0x28   : > { %v3580_v5 = vld [vmem:[%s4527_s1 + $0x200] ss:$12 sps:$4 sm:$0xff]   ;;  %v3599_v37 = vld [vmem:[%s4527_s1 + $0x1e8] ss:$12 sps:$4 sm:$0xff]  }
  0x29   : > { %444 = vmatpush1.bf16.msra.mxu0 %v2909_v49  ;;  %495 = vmatpush1.bf16.msra.mxu1 %v2910_v50  ;;  %v853_v49 = vor.u32 %v852_v43, %v848_v42  ;;  %v3522_v50 = vrot.slane %v855_v44, 1  ;;  %4597 = vst [vmem:[#allocation3_spill] sm:$0xff] %v3580_v5  ;;  %v3594_v33 = vld [vmem:[%s4527_s1 + $0x1e0] ss:$12 sps:$4 sm:$0xff]   ;;  %4600 = vst [vmem:[#allocation6_spill] sm:$0xff] %v3599_v37  ;;  %v3622_v44 = vcombine.low %v3460_v30, %v3460_v30 }
  0x2a   : > { %459 = vmatprep.subr.bf16.mxu0 %v2911_v52  ;;  %510 = vmatprep.subr.bf16.mxu1 %v4531_v2  ;;  %v3534_v52 = vld [vmem:[%s4527_s1 + $0x230] ss:$12 sps:$4 sm:$0xff]   ;;  %4599 = vst [vmem:[#allocation5_spill] sm:$0xff] %v3594_v33  ;;  %v3613_v42 = vld [vmem:[%s4527_s1 + $0x1c8] ss:$12 sps:$4 sm:$0xff]  }
  0x2b   : > { %4602 = vst [vmem:[#allocation8_spill] sm:$0xff] %v3613_v42  ;;  %v3618_v43 = vld [vmem:[%s4527_s1 + $0x1d0] ss:$12 sps:$4 sm:$0xff]   ;;  %v3642_v30 = vld [vmem:[%s4527_s1 + $0x1b8] ss:$12 sps:$4 sm:$0xff]  }
  0x2c   : > { %4603 = vst [vmem:[#allocation9_spill] sm:$0xff] %v3618_v43  ;;  %4606 = vst [vmem:[#allocation12_spill] sm:$0xff] %v3642_v30 }
  0x2d   : > { %460 = vmatpush2.bf16.msra.mxu0 %v2913_v54  ;;  %511 = vmatpush2.bf16.msra.mxu1 %v2914_v55  ;;  %v3545_v54 = vsel %vm835_vm0, %v853_v49, %v3522_v50  ;;  %v3552_v55 = vld [vmem:[%s4527_s1 + $0x210] ss:$12 sps:$4 sm:$0xff]   ;;  %v3630_v49 = vld [vmem:[%s4527_s1 + $0x1b4] ss:$12 sps:$4 sm:$0xff]  }
  0x2e   : > { %693 = vmatprep.subr.bf16.mxu0 %v2917_v56  ;;  %744 = vmatprep.subr.bf16.mxu1 %v4531_v2  ;;  %v3557_v56 = vld [vmem:[%s4527_s1 + $0x218] ss:$12 sps:$4 sm:$0xff]   ;;  %4604 = vst [vmem:[#allocation10_spill] sm:$0xff] %v3630_v49 }
  0x86   : > { %v266_v57 = vpop.permute.xlu0 %265  ;;  %v270_v58 = vpop.permute.xlu1 %269 }
  0x8a   : > { %v3274_v61 = vpop.permute.xlu0 %267  ;;  %v3291_v0 = vpop.permute.xlu1 %271 }
  0x8b   : > { %2584 = vmatprep.mubr.msk.bf16.mxu0 %vm422_vm1, %v3274_v61  ;;  %2586 = vmatprep.mubr.msk.bf16.mxu1 %vm422_vm1, %v3274_v61  ;;  %v3287_v63 = vsel %vm273_vm2, %v266_v57, %v3274_v61  ;;  %v3334_v9 = vsel %vm273_vm2, %v270_v58, %v3291_v0  ;;  %v3564_v57 = vld [vmem:[%s4527_s1 + $0x1fc] ss:$12 sps:$4 sm:$0xff]   ;;  %v3575_v58 = vld [vmem:[%s4527_s1 + $0x1f8] ss:$12 sps:$4 sm:$0xff]  }
  0x8c   : > { %462 = vmatmul.mubr.bf16.vlgmr.msra.gmra.mxu0 %v3287_v63  ;;  %513 = vmatmul.mubr.bf16.vlgmr.msra.gmra.mxu1 %v3287_v63  ;;  %4596 = vst [vmem:[#allocation2_spill] sm:$0xff] %v3575_v58 }
  0x8d   : > { %694 = vmatpush1.bf16.msra.mxu0 %v3267_v59  ;;  %745 = vmatpush1.bf16.msra.mxu1 %v3272_v60 }
  0x8e   : > { %695 = vmatprep.subr.bf16.mxu0 %v3279_v62  ;;  %746 = vmatprep.subr.bf16.mxu1 %v4531_v2 }
  0x8f   : > { %2585 = vmatprep.mubr.msk.bf16.mxu0 %vm422_vm1, %v3291_v0  ;;  %2587 = vmatprep.mubr.msk.bf16.mxu1 %vm422_vm1, %v3291_v0 }
  0x91   : > { %696 = vmatpush1.bf16.msra.mxu0 %v3298_v1  ;;  %747 = vmatpush1.bf16.msra.mxu1 %v3303_v3 }
  0x92   : > { %697 = vmatprep.subr.bf16.mxu0 %v3310_v4  ;;  %748 = vmatprep.subr.bf16.mxu1 %v4531_v2 }
  0x94   : > { %472 = vmatmul.mubr.bf16.gmra.mxu0 %v3334_v9  ;;  %521 = vmatmul.mubr.bf16.gmra.mxu1 %v3334_v9 }
  0x95   : > { %698 = vmatpush1.bf16.msra.mxu0 %v3325_v7  ;;  %749 = vmatpush1.bf16.msra.mxu1 %v3330_v8 }
  0x96   : > { %699 = vmatprep.subr.bf16.mxu0 %v3341_v10  ;;  %750 = vmatprep.subr.bf16.mxu1 %v4531_v2 }
  0x97   : > { %2619 = vmatprep.mubr.msk.bf16.mxu0 %vm422_vm1, %v3344_v12  ;;  %2621 = vmatprep.mubr.msk.bf16.mxu1 %vm422_vm1, %v3344_v12  ;;  %v3587_v12 = vld [vmem:[%s4527_s1 + $0x1e4] ss:$12 sps:$4 sm:$0xff]  }
  0x98   : > { %4598 = vst [vmem:[#allocation4_spill] sm:$0xff] %v3587_v12 }
  0x99   : > { %700 = vmatpush1.bf16.msra.mxu0 %v3353_v13  ;;  %751 = vmatpush1.bf16.msra.mxu1 %v3358_v14 }
  0x9a   : > { %701 = vmatprep.subr.bf16.mxu0 %v3365_v15  ;;  %752 = vmatprep.subr.bf16.mxu1 %v4531_v2 }
  0x9d   : > { %702 = vmatpush1.bf16.msra.mxu0 %v3376_v16  ;;  %753 = vmatpush1.bf16.msra.mxu1 %v3381_v17 }
  0x9e   : > { %703 = vmatprep.subr.bf16.mxu0 %v3388_v18  ;;  %754 = vmatprep.subr.bf16.mxu1 %v4531_v2 }
  0xa1   : > { %704 = vmatpush1.bf16.msra.mxu0 %v3395_v19  ;;  %755 = vmatpush1.bf16.msra.mxu1 %v3400_v20 }
  0xa2   : > { %705 = vmatprep.subr.bf16.mxu0 %v3407_v21  ;;  %756 = vmatprep.subr.bf16.mxu1 %v4531_v2 }
  0xa5   : > { %706 = vmatpush1.bf16.msra.mxu0 %v3414_v22  ;;  %757 = vmatpush1.bf16.msra.mxu1 %v3419_v23 }
  0xa6   : > { %707 = vmatprep.subr.bf16.mxu0 %v3426_v24  ;;  %758 = vmatprep.subr.bf16.mxu1 %v4531_v2 }
  0xa9   : > { %708 = vmatpush1.bf16.msra.mxu0 %v3433_v25  ;;  %759 = vmatpush1.bf16.msra.mxu1 %v3438_v26 }
  0xaa   : > { %723 = vmatprep.subr.bf16.mxu0 %v3445_v27  ;;  %774 = vmatprep.subr.bf16.mxu1 %v4531_v2 }
  0xad   : > { %724 = vmatpush2.bf16.msra.mxu0 %v3452_v28  ;;  %775 = vmatpush2.bf16.msra.mxu1 %v3457_v29 }
  0xae   : > { %1017 = vmatprep.subr.bf16.mxu0 %v3467_v31  ;;  %1068 = vmatprep.subr.bf16.mxu1 %v4531_v2 }
  0xb0   : > { %726 = vmatmul.mubr.bf16.vlgmr.msra.gmra.mxu0 %v3470_v32  ;;  %777 = vmatmul.mubr.bf16.vlgmr.msra.gmra.mxu1 %v3470_v32 }
  0xb1   : > { %1018 = vmatpush1.bf16.msra.mxu0 %v3483_v38  ;;  %1069 = vmatpush1.bf16.msra.mxu1 %v3488_v39 }
  0xb2   : > { %1019 = vmatprep.subr.bf16.mxu0 %v3495_v40  ;;  %1070 = vmatprep.subr.bf16.mxu1 %v4531_v2 }
  0xb3   : > { %2620 = vmatprep.mubr.msk.bf16.mxu0 %vm422_vm1, %v2591_v41  ;;  %2622 = vmatprep.mubr.msk.bf16.mxu1 %vm422_vm1, %v2591_v41  ;;  %v3606_v41 = vld [vmem:[%s4527_s1 + $0x1cc] ss:$12 sps:$4 sm:$0xff]  }
  0xb4   : > { %4601 = vst [vmem:[#allocation7_spill] sm:$0xff] %v3606_v41 }
  0xb5   : > { %1020 = vmatpush1.bf16.msra.mxu0 %v3506_v45  ;;  %1071 = vmatpush1.bf16.msra.mxu1 %v3511_v46 }
  0xb6   : > { %1021 = vmatprep.subr.bf16.mxu0 %v3518_v47  ;;  %1072 = vmatprep.subr.bf16.mxu1 %v4531_v2 }
  0xb8   : > { %736 = vmatmul.mubr.bf16.gmra.mxu0 %v2590_v48  ;;  %785 = vmatmul.mubr.bf16.gmra.mxu1 %v2590_v48  ;;  %v839_v48 = vshll.u32 %v3470_v32, 16 }
  0xb9   : > { %1022 = vmatpush1.bf16.msra.mxu0 %v3529_v51  ;;  %1073 = vmatpush1.bf16.msra.mxu1 %v3534_v52 }
  0xba   : > { %1023 = vmatprep.subr.bf16.mxu0 %v3541_v53  ;;  %1074 = vmatprep.subr.bf16.mxu1 %v4531_v2 }
  0xbb   : > { %2688 = vmatprep.mubr.msk.bf16.mxu0 %vm422_vm1, %v3545_v54  ;;  %2690 = vmatprep.mubr.msk.bf16.mxu1 %vm422_vm1, %v3545_v54 }
  0xbd   : > { %1024 = vmatpush1.bf16.msra.mxu0 %v3552_v55  ;;  %1075 = vmatpush1.bf16.msra.mxu1 %v3557_v56 }
  0xbe   : > { %1025 = vmatprep.subr.bf16.mxu0 %v3564_v57  ;;  %1076 = vmatprep.subr.bf16.mxu1 %v4531_v2 }
  0xc1   : > { %1026 = vmatpush1.bf16.msra.mxu0 %v3575_v58  ;;  %1077 = vmatpush1.bf16.msra.mxu1 %v3580_v5  ;;  %v3739_v58 = vld [vmem:[%s4527_s1 + $0x308] ss:$12 sps:$4 sm:$0xff]  }
  0xc2   : > { %1027 = vmatprep.subr.bf16.mxu0 %v3587_v12  ;;  %1078 = vmatprep.subr.bf16.mxu1 %v4531_v2  ;;  %v4607_v12 = vmov 0   ;;  %4619 = vst [vmem:[#allocation24_spill] sm:$0xff] %v3739_v58 }
  0xc5   : > { %1028 = vmatpush1.bf16.msra.mxu0 %v3594_v33  ;;  %1079 = vmatpush1.bf16.msra.mxu1 %v3599_v37  ;;  %v3635_v37 = vld [vmem:[%s4527_s1 + $0x1b0] ss:$12 sps:$4 sm:$0xff]   ;;  %v844_v33 = vshll.u32 %v3622_v44, 16 }
  0xc6   : > { %1029 = vmatprep.subr.bf16.mxu0 %v3606_v41  ;;  %1080 = vmatprep.subr.bf16.mxu1 %v4531_v2  ;;  %4605 = vst [vmem:[#allocation11_spill] sm:$0xff] %v3635_v37  ;;  %v837_v2 = vshrl.u32 %v3470_v32, 16  ;;  %v841_v41 = vrot.slane %v839_v48, 1  ;;  %v3658_v32 = vld [vmem:[%s4527_s1 + $0x270] ss:$12 sps:$4 sm:$0xff]  }
  0xc7   : > { %4609 = vst [vmem:[#allocation14_spill] sm:$0xff] %v3658_v32  ;;  %v3663_v48 = vld [vmem:[%s4527_s1 + $0x278] ss:$12 sps:$4 sm:$0xff]  }
  0xc8   : > { %4610 = vst [vmem:[#allocation15_spill] sm:$0xff] %v3663_v48 }
  0xc9   : > { %1030 = vmatpush1.bf16.msra.mxu0 %v3613_v42  ;;  %1081 = vmatpush1.bf16.msra.mxu1 %v3618_v43  ;;  %v3651_v42 = vld [vmem:[%s4527_s1 + $0x274] ss:$12 sps:$4 sm:$0xff]   ;;  %v846_v43 = vrot.slane %v844_v33, 1  ;;  %v3686_v33 = vld [vmem:[%s4527_s1 + $0x338] ss:$12 sps:$4 sm:$0xff]  }
  0xca   : > { %1031 = vmatprep.subr.bf16.mxu0 %v3630_v49  ;;  %1082 = vmatprep.subr.bf16.mxu1 %v4607_v12  ;;  %4608 = vst [vmem:[#allocation13_spill] sm:$0xff] %v3651_v42  ;;  %v842_v49 = vor.u32 %v841_v41, %v837_v2  ;;  %v3681_v2 = vld [vmem:[%s4527_s1 + $0x330] ss:$12 sps:$4 sm:$0xff]   ;;  %4613 = vst [vmem:[#allocation18_spill] sm:$0xff] %v3686_v33 }
  0xcb   : > { %4612 = vst [vmem:[#allocation17_spill] sm:$0xff] %v3681_v2  ;;  %v3693_v41 = vld [vmem:[%s4527_s1 + $0x31c] ss:$12 sps:$4 sm:$0xff]  }
  0xcc   : > { %v3676_v5 = vsel %vm835_vm0, %v842_v49, %v846_v43  ;;  %4614 = vst [vmem:[#allocation19_spill] sm:$0xff] %v3693_v41 }
  0xcd   : > { %1032 = vmatpush1.bf16.msra.mxu0 %v3635_v37  ;;  %1083 = vmatpush1.bf16.msra.mxu1 %v3642_v30  ;;  %v3670_v30 = vld [vmem:[%s4527_s1 + $0x334] ss:$12 sps:$4 sm:$0xff]   ;;  %v862_v37 = vshrl.u32 %v3475_v36, 16 }
  0xce   : > { %1047 = vmatprep.subr.bf16.mxu0 %v3651_v42  ;;  %1098 = vmatprep.subr.bf16.mxu1 %v4607_v12  ;;  %4611 = vst [vmem:[#allocation16_spill] sm:$0xff] %v3670_v30  ;;  %v3734_v42 = vld [vmem:[%s4527_s1 + $0x300] ss:$12 sps:$4 sm:$0xff]  }
  0xcf   : > { %v3696_v49 = vor.u32 %v862_v37, %v3522_v50  ;;  %v3711_v50 = vld [vmem:[%s4527_s1 + $0x320] ss:$12 sps:$4 sm:$0xff]   ;;  %v3718_v37 = vld [vmem:[%s4527_s1 + $0x304] ss:$12 sps:$4 sm:$0xff]   ;;  %4618 = vst [vmem:[#allocation23_spill] sm:$0xff] %v3734_v42 }
  0xd0   : > { %4616 = vst [vmem:[#allocation21_spill] sm:$0xff] %v3711_v50  ;;  %4617 = vst [vmem:[#allocation22_spill] sm:$0xff] %v3718_v37 }
  0xd1   : > { %1048 = vmatpush2.bf16.msra.mxu0 %v3658_v32  ;;  %1099 = vmatpush2.bf16.msra.mxu1 %v3663_v48  ;;  %v859_v48 = vshrl.u32 %v3622_v44, 16 }
  0xd2   : > { %1360 = vmatprep.subr.bf16.mxu0 %v3670_v30  ;;  %1411 = vmatprep.subr.bf16.mxu1 %v4607_v12  ;;  %v3706_v30 = vld [vmem:[%s4527_s1 + $0x318] ss:$12 sps:$4 sm:$0xff]  }
  0xd3   : > { %4615 = vst [vmem:[#allocation20_spill] sm:$0xff] %v3706_v30 }
  0xd4   : > { %1050 = vmatmul.mubr.bf16.vlgmr.msra.gmra.mxu0 %v3676_v5  ;;  %1101 = vmatmul.mubr.bf16.vlgmr.msra.gmra.mxu1 %v3676_v5 }
  0xd5   : > { %1361 = vmatpush1.bf16.msra.mxu0 %v3681_v2  ;;  %1412 = vmatpush1.bf16.msra.mxu1 %v3686_v33  ;;  %v2226_v33 = vld [vmem:[%s3168_s6 + $0x4] sm:$0xee]  ;;  %v3725_v2 = vor.u32 %v859_v48, %v846_v43  ;;  %v2236_v48 = vrot.slane %v3218_v34, 1  ;;  %v3764_v34 = vld [vmem:[%s4527_s1 + $0x2f0] ss:$12 sps:$4 sm:$0xff]  }
  0xd6   : > { %1362 = vmatprep.subr.bf16.mxu0 %v3693_v41  ;;  %1413 = vmatprep.subr.bf16.mxu1 %v4607_v12  ;;  %v2847_v32 = vcombine.high %v2226_v33, %v3175_v11  ;;  %v2846_v41 = vcombine.low %v2226_v33, %v3175_v11  ;;  %v3746_v11 = vld [vmem:[%s4527_s1 + $0x2ec] ss:$12 sps:$4 sm:$0xff]   ;;  %4622 = vst [vmem:[#allocation27_spill] sm:$0xff] %v3764_v34 }
  0xd7   : > { %2689 = vmatprep.mubr.msk.bf16.mxu0 %vm422_vm1, %v3696_v49  ;;  %2691 = vmatprep.mubr.msk.bf16.mxu1 %vm422_vm1, %v3696_v49  ;;  %4620 = vst [vmem:[#allocation25_spill] sm:$0xff] %v3746_v11 }
  0xd8   : > { %v2235_v43 = vrot.slane %v2847_v32, 1  ;;  %v2232_v33 = vrot.slane %v2846_v41, 1  ;;  %v3759_v32 = vld [vmem:[%s4527_s1 + $0x2e8] ss:$12 sps:$4 sm:$0xff]  }
  0xd9   : > { %1363 = vmatpush1.bf16.msra.mxu0 %v3706_v30  ;;  %1414 = vmatpush1.bf16.msra.mxu1 %v3711_v50  ;;  %v2233_v50 = vrot.slane %v3220_v35, 1  ;;  %v3752_v30 = vpop.permute.xlu1 %1200  ;;  %4621 = vst [vmem:[#allocation26_spill] sm:$0xff] %v3759_v32 }
  0xda   : > { %1364 = vmatprep.subr.bf16.mxu0 %v3718_v37  ;;  %1415 = vmatprep.subr.bf16.mxu1 %v4607_v12  ;;  %v2237_v35 = vsel %vm1511_vm3, %v2235_v43, %v2236_v48  ;;  %v3786_v43 = vld [vmem:[%s4527_s1 + $0x2d0] ss:$12 sps:$4 sm:$0xff]   ;;  %v3945_v37 = vld [vmem:[%s4527_s1 + $0x3d8] ss:$12 sps:$4 sm:$0xff]  }
  0xdb   : > { %v2234_v41 = vsel %vm1511_vm3, %v2232_v33, %v2233_v50  ;;  %2240 = vrot.lane.b32.xlu1 %v2237_v35, %s3106_s11  ;;  %4624 = vst [vmem:[#allocation29_spill] sm:$0xff] %v3786_v43  ;;  %v3791_v33 = vld [vmem:[%s4527_s1 + $0x2d8] ss:$12 sps:$4 sm:$0xff]   ;;  %v3798_v35 = vld [vmem:[%s4527_s1 + $0x2bc] ss:$12 sps:$4 sm:$0xff]   ;;  %4644 = vst [vmem:[#allocation49_spill] sm:$0xff] %v3945_v37 }
  0xdc   : > { %1060 = vmatmul.mubr.bf16.gmra.mxu0 %v3725_v2  ;;  %1109 = vmatmul.mubr.bf16.gmra.mxu1 %v3725_v2  ;;  %4625 = vst [vmem:[#allocation30_spill] sm:$0xff] %v3791_v33  ;;  %4626 = vst [vmem:[#allocation31_spill] sm:$0xff] %v3798_v35 }
  0xdd   : > { %1365 = vmatpush1.bf16.msra.mxu0 %v3734_v42  ;;  %1416 = vmatpush1.bf16.msra.mxu1 %v3739_v58  ;;  %v3773_v58 = vld [vmem:[%s4527_s1 + $0x2d4] ss:$12 sps:$4 sm:$0xff]   ;;  %v3934_v42 = vrot.slane %v3475_v36, 1  ;;  %v3957_v36 = vld [vmem:[%s4527_s1 + $0x3c4] ss:$12 sps:$4 sm:$0xff]  }
  0xde   : > { %1366 = vmatprep.subr.bf16.mxu0 %v3746_v11  ;;  %1417 = vmatprep.subr.bf16.mxu1 %v4607_v12  ;;  %4623 = vst [vmem:[#allocation28_spill] sm:$0xff] %v3773_v58  ;;  %4646 = vst [vmem:[#allocation51_spill] sm:$0xff] %v3957_v36 }
  0xdf   : > { %2757 = vmatprep.mubr.msk.bf16.mxu0 %vm422_vm1, %v3752_v30  ;;  %2759 = vmatprep.mubr.msk.bf16.mxu1 %vm422_vm1, %v3752_v30 }
  0xe0   : > { %2238 = vrot.lane.b32.xlu0 %v2234_v41, %s3106_s11  ;;  %2244 = vrot.lane.b32.xlu1 %v2236_v48, %s3106_s11  ;;  %v3807_v41 = vld [vmem:[%s4527_s1 + $0x2b8] ss:$12 sps:$4 sm:$0xff]   ;;  %v3826_v48 = vld [vmem:[%s4527_s1 + $0x2a0] ss:$12 sps:$4 sm:$0xff]  }
  0xe1   : > { %1367 = vmatpush1.bf16.msra.mxu0 %v3759_v32  ;;  %1418 = vmatpush1.bf16.msra.mxu1 %v3764_v34  ;;  %4627 = vst [vmem:[#allocation32_spill] sm:$0xff] %v3807_v41  ;;  %4630 = vst [vmem:[#allocation35_spill] sm:$0xff] %v3826_v48  ;;  %v3895_v34 = vld [vmem:[%s3168_s6] sm:$0xee] }
  0xe2   : > { %1368 = vmatprep.subr.bf16.mxu0 %v3773_v58  ;;  %1419 = vmatprep.subr.bf16.mxu1 %v4607_v12  ;;  %v3812_v58 = vld [vmem:[%s4527_s1 + $0x2c0] ss:$12 sps:$4 sm:$0xff]   ;;  %v3920_v32 = vld [vmem:[%s4527_s1 + $0x3f8] ss:$12 sps:$4 sm:$0xff]  }
  0xe3   : > { %4628 = vst [vmem:[#allocation33_spill] sm:$0xff] %v3812_v58  ;;  %4642 = vst [vmem:[#allocation47_spill] sm:$0xff] %v3920_v32 }
  0xe4   : > { %2242 = vrot.lane.b32.xlu0 %v2233_v50, %s3106_s11  ;;  %v3819_v50 = vld [vmem:[%s4527_s1 + $0x2a4] ss:$12 sps:$4 sm:$0xff]  }
  0xe5   : > { %1369 = vmatpush1.bf16.msra.mxu0 %v3786_v43  ;;  %1420 = vmatpush1.bf16.msra.mxu1 %v3791_v33  ;;  %4629 = vst [vmem:[#allocation34_spill] sm:$0xff] %v3819_v50  ;;  %v1199_v33 = vpop.permute.xlu0 %1198  ;;  %v3892_v43 = vld [vmem:[%s4527_s1 + $0x410] ss:$12 sps:$4 sm:$0xff]  }
  0xe6   : > { %1370 = vmatprep.subr.bf16.mxu0 %v3798_v35  ;;  %1421 = vmatprep.subr.bf16.mxu1 %v4607_v12  ;;  %v3831_v35 = vld [vmem:[%s4527_s1 + $0x2a8] ss:$12 sps:$4 sm:$0xff]   ;;  %4640 = vst [vmem:[#allocation45_spill] sm:$0xff] %v3892_v43 }
  0xe7   : > { %4631 = vst [vmem:[#allocation36_spill] sm:$0xff] %v3831_v35 }
  0xe9   : > { %1371 = vmatpush1.bf16.msra.mxu0 %v3807_v41  ;;  %1422 = vmatpush1.bf16.msra.mxu1 %v3812_v58  ;;  %v3838_v41 = vld [vmem:[%s4527_s1 + $0x28c] ss:$12 sps:$4 sm:$0xff]   ;;  %v3845_v58 = vld [vmem:[%s4527_s1 + $0x288] ss:$12 sps:$4 sm:$0xff]   ;;  %v1203_v11 = vpop.permute.xlu0 %1202 }
  0xea   : > { %1372 = vmatprep.subr.bf16.mxu0 %v3819_v50  ;;  %1423 = vmatprep.subr.bf16.mxu1 %v4607_v12  ;;  %4632 = vst [vmem:[#allocation37_spill] sm:$0xff] %v3838_v41  ;;  %4633 = vst [vmem:[#allocation38_spill] sm:$0xff] %v3845_v58  ;;  %v3850_v50 = vld [vmem:[%s4527_s1 + $0x290] ss:$12 sps:$4 sm:$0xff]  }
  0xeb   : > { %4634 = vst [vmem:[#allocation39_spill] sm:$0xff] %v3850_v50 }
  0xed   : > { %1373 = vmatpush1.bf16.msra.mxu0 %v3826_v48  ;;  %1424 = vmatpush1.bf16.msra.mxu1 %v3831_v35  ;;  %v3857_v48 = vld [vmem:[%s4527_s1 + $0x34c] ss:$12 sps:$4 sm:$0xff]   ;;  %v3864_v35 = vld [vmem:[%s4527_s1 + $0x348] ss:$12 sps:$4 sm:$0xff]  }
  0xee   : > { %1374 = vmatprep.subr.bf16.mxu0 %v3838_v41  ;;  %1425 = vmatprep.subr.bf16.mxu1 %v4607_v12  ;;  %4635 = vst [vmem:[#allocation40_spill] sm:$0xff] %v3857_v48  ;;  %4636 = vst [vmem:[#allocation41_spill] sm:$0xff] %v3864_v35  ;;  %v3869_v41 = vld [vmem:[%s4527_s1 + $0x350] ss:$12 sps:$4 sm:$0xff]  }
  0xef   : > { %4637 = vst [vmem:[#allocation42_spill] sm:$0xff] %v3869_v41 }
  0xf1   : > { %1375 = vmatpush1.bf16.msra.mxu0 %v3845_v58  ;;  %1426 = vmatpush1.bf16.msra.mxu1 %v3850_v50  ;;  %v3876_v58 = vld [vmem:[%s4527_s1 + $0x40c] ss:$12 sps:$4 sm:$0xff]   ;;  %v3882_v50 = vsel %vm273_vm2, %v1199_v33, %v3752_v30  ;;  %v3902_v33 = vld [vmem:[%s4527_s1 + $0x3f4] ss:$12 sps:$4 sm:$0xff]  }
  0xf2   : > { %1390 = vmatprep.subr.bf16.mxu0 %v3857_v48  ;;  %1441 = vmatprep.subr.bf16.mxu1 %v4607_v12  ;;  %4638 = vst [vmem:[#allocation43_spill] sm:$0xff] %v3876_v58  ;;  %v3887_v48 = vld [vmem:[%s4527_s1 + $0x408] ss:$12 sps:$4 sm:$0xff]   ;;  %4641 = vst [vmem:[#allocation46_spill] sm:$0xff] %v3902_v33 }
  0xf3   : > { %4639 = vst [vmem:[#allocation44_spill] sm:$0xff] %v3887_v48 }
  0xf5   : > { %1391 = vmatpush2.bf16.msra.mxu0 %v3864_v35  ;;  %1442 = vmatpush2.bf16.msra.mxu1 %v3869_v41  ;;  %v3906_v41 = vpop.permute.xlu1 %1204  ;;  %v2798_v35 = vcombine.high %v3895_v34, %v3318_v6 }
  0xf6   : > { %1670 = vmatprep.subr.bf16.mxu0 %v3876_v58  ;;  %1721 = vmatprep.subr.bf16.mxu1 %v4607_v12  ;;  %v3915_v58 = vld [vmem:[%s4527_s1 + $0x3f0] ss:$12 sps:$4 sm:$0xff]  }
  0xf8   : > { %1393 = vmatmul.mubr.bf16.vlgmr.msra.gmra.mxu0 %v3882_v50  ;;  %1444 = vmatmul.mubr.bf16.vlgmr.msra.gmra.mxu1 %v3882_v50 }
  0xf9   : > { %1671 = vmatpush1.bf16.msra.mxu0 %v3887_v48  ;;  %1722 = vmatpush1.bf16.msra.mxu1 %v3892_v43  ;;  %v3927_v48 = vld [vmem:[%s4527_s1 + $0x3dc] ss:$12 sps:$4 sm:$0xff]   ;;  %v1515_v43 = vrot.slane %v2798_v35, 1  ;;  %v3950_v35 = vld [vmem:[%s4527_s1 + $0x3e0] ss:$12 sps:$4 sm:$0xff]  }
  0xfa   : > { %1672 = vmatprep.subr.bf16.mxu0 %v3902_v33  ;;  %1723 = vmatprep.subr.bf16.mxu1 %v4607_v12  ;;  %4643 = vst [vmem:[#allocation48_spill] sm:$0xff] %v3927_v48  ;;  %v3940_v33 = vsel %vm273_vm2, %v1203_v11, %v3906_v41  ;;  %4645 = vst [vmem:[#allocation50_spill] sm:$0xff] %v3950_v35 }
  0xfb   : > { %2758 = vmatprep.mubr.msk.bf16.mxu0 %vm422_vm1, %v3906_v41  ;;  %2760 = vmatprep.mubr.msk.bf16.mxu1 %vm422_vm1, %v3906_v41  ;;  %v3963_v11 = vsel %vm1511_vm3, %v1515_v43, %v3934_v42  ;;  %v3982_v43 = vld [vmem:[%s4527_s1 + $0x3ac] ss:$12 sps:$4 sm:$0xff]  }
  0xfc   : > { %4649 = vst [vmem:[#allocation54_spill] sm:$0xff] %v3982_v43 }
  0xfd   : > { %1673 = vmatpush1.bf16.msra.mxu0 %v3915_v58  ;;  %1724 = vmatpush1.bf16.msra.mxu1 %v3920_v32  ;;  %v3975_v32 = vld [vmem:[%s4527_s1 + $0x3c8] ss:$12 sps:$4 sm:$0xff]  }
  0xfe   : > { %1674 = vmatprep.subr.bf16.mxu0 %v3927_v48  ;;  %1725 = vmatprep.subr.bf16.mxu1 %v4607_v12  ;;  %v3970_v48 = vld [vmem:[%s4527_s1 + $0x3c0] ss:$12 sps:$4 sm:$0xff]   ;;  %4648 = vst [vmem:[#allocation53_spill] sm:$0xff] %v3975_v32 }
  0xff   : > { %4647 = vst [vmem:[#allocation52_spill] sm:$0xff] %v3970_v48 }
 0x100   : > { %1403 = vmatmul.mubr.bf16.gmra.mxu0 %v3940_v33  ;;  %1452 = vmatmul.mubr.bf16.gmra.mxu1 %v3940_v33 }
 0x101   : > { %1675 = vmatpush1.bf16.msra.mxu0 %v3945_v37  ;;  %1726 = vmatpush1.bf16.msra.mxu1 %v3950_v35  ;;  %v3998_v35 = vld [vmem:[%s4527_s1 + $0x3b0] ss:$12 sps:$4 sm:$0xff]   ;;  %v2797_v37 = vcombine.low %v3895_v34, %v3318_v6  ;;  %v4076_v6 = vld [vmem:[%s4527_s1 + $0x428] ss:$12 sps:$4 sm:$0xff]  }
 0x102   : > { %1676 = vmatprep.subr.bf16.mxu0 %v3957_v36  ;;  %1727 = vmatprep.subr.bf16.mxu1 %v4607_v12  ;;  %v3993_v36 = vld [vmem:[%s4527_s1 + $0x3a8] ss:$12 sps:$4 sm:$0xff]   ;;  %4651 = vst [vmem:[#allocation56_spill] sm:$0xff] %v3998_v35 }
 0x103   : > { %2826 = vmatprep.mubr.msk.bf16.mxu0 %vm422_vm1, %v3963_v11  ;;  %2828 = vmatprep.mubr.msk.bf16.mxu1 %vm422_vm1, %v3963_v11  ;;  %4650 = vst [vmem:[#allocation55_spill] sm:$0xff] %v3993_v36  ;;  %v1512_v34 = vrot.slane %v2797_v37, 1  ;;  %v3071_v37 = vld [vmem:[%s4527_s1 + $0x188] ss:$12 sps:$4 sm:$0xff]  }
 0x105   : > { %1677 = vmatpush1.bf16.msra.mxu0 %v3970_v48  ;;  %1728 = vmatpush1.bf16.msra.mxu1 %v3975_v32  ;;  %v4005_v48 = vld [vmem:[%s4527_s1 + $0x394] ss:$12 sps:$4 sm:$0xff]   ;;  %v4012_v32 = vld [vmem:[%s4527_s1 + $0x390] ss:$12 sps:$4 sm:$0xff]  }
 0x106   : > { %1678 = vmatprep.subr.bf16.mxu0 %v3982_v43  ;;  %1729 = vmatprep.subr.bf16.mxu1 %v4607_v12  ;;  %4652 = vst [vmem:[#allocation57_spill] sm:$0xff] %v4005_v48  ;;  %4653 = vst [vmem:[#allocation58_spill] sm:$0xff] %v4012_v32  ;;  %v4017_v43 = vld [vmem:[%s4527_s1 + $0x398] ss:$12 sps:$4 sm:$0xff]  }
 0x107   : > { %4654 = vst [vmem:[#allocation59_spill] sm:$0xff] %v4017_v43 }
 0x109   : > { %1679 = vmatpush1.bf16.msra.mxu0 %v3993_v36  ;;  %1730 = vmatpush1.bf16.msra.mxu1 %v3998_v35  ;;  %v4024_v36 = vld [vmem:[%s4527_s1 + $0x37c] ss:$12 sps:$4 sm:$0xff]   ;;  %v4031_v35 = vld [vmem:[%s4527_s1 + $0x378] ss:$12 sps:$4 sm:$0xff]  }
 0x10a   : > { %1680 = vmatprep.subr.bf16.mxu0 %v4005_v48  ;;  %1731 = vmatprep.subr.bf16.mxu1 %v4607_v12  ;;  %4655 = vst [vmem:[#allocation60_spill] sm:$0xff] %v4024_v36  ;;  %4656 = vst [vmem:[#allocation61_spill] sm:$0xff] %v4031_v35  ;;  %v4036_v48 = vld [vmem:[%s4527_s1 + $0x380] ss:$12 sps:$4 sm:$0xff]  }
 0x10b   : > { %4657 = vst [vmem:[#allocation62_spill] sm:$0xff] %v4036_v48 }
 0x10d   : > { %1681 = vmatpush1.bf16.msra.mxu0 %v4012_v32  ;;  %1732 = vmatpush1.bf16.msra.mxu1 %v4017_v43  ;;  %v4043_v32 = vld [vmem:[%s4527_s1 + $0x364] ss:$12 sps:$4 sm:$0xff]   ;;  %v4050_v43 = vld [vmem:[%s4527_s1 + $0x360] ss:$12 sps:$4 sm:$0xff]  }
 0x10e   : > { %1682 = vmatprep.subr.bf16.mxu0 %v4024_v36  ;;  %1733 = vmatprep.subr.bf16.mxu1 %v4607_v12  ;;  %4658 = vst [vmem:[#allocation63_spill] sm:$0xff] %v4043_v32  ;;  %4659 = vst [vmem:[#allocation64_spill] sm:$0xff] %v4050_v43  ;;  %v4055_v36 = vld [vmem:[%s4527_s1 + $0x368] ss:$12 sps:$4 sm:$0xff]  }
 0x10f   : > { %4660 = vst [vmem:[#allocation65_spill] sm:$0xff] %v4055_v36 }
 0x111   : > { %1683 = vmatpush1.bf16.msra.mxu0 %v4031_v35  ;;  %1734 = vmatpush1.bf16.msra.mxu1 %v4036_v48  ;;  %v4064_v48 = vld [vmem:[%s4527_s1 + $0x424] ss:$12 sps:$4 sm:$0xff]   ;;  %v4071_v35 = vld [vmem:[%s4527_s1 + $0x420] ss:$12 sps:$4 sm:$0xff]  }
 0x112   : > { %1684 = vmatprep.subr.bf16.mxu0 %v4043_v32  ;;  %1735 = vmatprep.subr.bf16.mxu1 %v4607_v12  ;;  %v4079_v32 = vrot.slane %v3622_v44, 1  ;;  %v3070_v44 = vld [vmem:[%s4527_s1 + $0x180] ss:$12 sps:$4 sm:$0xff]  }
 0x115   : > { %1685 = vmatpush1.bf16.msra.mxu0 %v4050_v43  ;;  %1736 = vmatpush1.bf16.msra.mxu1 %v4055_v36  ;;  %v4087_v36 = vsel %vm1511_vm3, %v1512_v34, %v4079_v32  ;;  %v3069_v43 = vld [vmem:[%s4527_s1 + $0x184] ss:$12 sps:$4 sm:$0xff]   ;;  %v3073_v34 = vld [vmem:[%s4527_s1 + $0x168] ss:$12 sps:$4 sm:$0xff]  }
 0x116   : > { %1700 = vmatprep.subr.bf16.mxu0 %v4064_v48  ;;  %1751 = vmatprep.subr.bf16.mxu1 %v4607_v12 }
 0x119   : > { %1701 = vmatpush2.bf16.msra.mxu0 %v4071_v35  ;;  %1752 = vmatpush2.bf16.msra.mxu1 %v4076_v6 }
 0x11a   : > { %1812 = vmatprep.subr.bf16.mxu0 %v3069_v43  ;;  %1863 = vmatprep.subr.bf16.mxu1 %v4607_v12  ;;  %v3072_v43 = vld [vmem:[%s4527_s1 + $0x16c] ss:$12 sps:$4 sm:$0xff]  }
 0x11c   : > { %1703 = vmatmul.mubr.bf16.vlgmr.msra.gmra.mxu0 %v4087_v36  ;;  %1754 = vmatmul.mubr.bf16.vlgmr.msra.gmra.mxu1 %v4087_v36 }
 0x11d   : > { %1813 = vmatpush1.bf16.msra.mxu0 %v3070_v44  ;;  %1864 = vmatpush1.bf16.msra.mxu1 %v3071_v37  ;;  %v3074_v44 = vld [vmem:[%s4527_s1 + $0x170] ss:$12 sps:$4 sm:$0xff]   ;;  %v3075_v37 = vld [vmem:[%s4527_s1 + $0x154] ss:$12 sps:$4 sm:$0xff]  }
 0x11e   : > { %1814 = vmatprep.subr.bf16.mxu0 %v3072_v43  ;;  %1865 = vmatprep.subr.bf16.mxu1 %v4607_v12  ;;  %v3076_v43 = vld [vmem:[%s4527_s1 + $0x150] ss:$12 sps:$4 sm:$0xff]  }
 0x11f   : > { %2827 = vmatprep.mubr.msk.bf16.mxu0 %vm422_vm1, %v3934_v42  ;;  %2829 = vmatprep.mubr.msk.bf16.mxu1 %vm422_vm1, %v3934_v42 }
 0x121   : > { %1815 = vmatpush1.bf16.msra.mxu0 %v3073_v34  ;;  %1866 = vmatpush1.bf16.msra.mxu1 %v3074_v44  ;;  %v3077_v34 = vld [vmem:[%s4527_s1 + $0x158] ss:$12 sps:$4 sm:$0xff]   ;;  %v3078_v44 = vld [vmem:[%s4527_s1 + $0x13c] ss:$12 sps:$4 sm:$0xff]  }
 0x122   : > { %1816 = vmatprep.subr.bf16.mxu0 %v3075_v37  ;;  %1867 = vmatprep.subr.bf16.mxu1 %v4607_v12  ;;  %v3079_v37 = vld [vmem:[%s4527_s1 + $0x138] ss:$12 sps:$4 sm:$0xff]  }
 0x124   : > { %1713 = vmatmul.mubr.bf16.gmra.mxu0 %v4079_v32  ;;  %1762 = vmatmul.mubr.bf16.gmra.mxu1 %v4079_v32 }
 0x125   : > { %1817 = vmatpush1.bf16.msra.mxu0 %v3076_v43  ;;  %1868 = vmatpush1.bf16.msra.mxu1 %v3077_v34  ;;  %v3080_v43 = vld [vmem:[%s4527_s1 + $0x140] ss:$12 sps:$4 sm:$0xff]   ;;  %v3081_v34 = vld [vmem:[%s4527_s1 + $0x124] ss:$12 sps:$4 sm:$0xff]  }
 0x126   : > { %1818 = vmatprep.subr.bf16.mxu0 %v3078_v44  ;;  %1869 = vmatprep.subr.bf16.mxu1 %v4607_v12  ;;  %v3083_v44 = vld [vmem:[%s4527_s1 + $0x128] ss:$12 sps:$4 sm:$0xff]  }
 0x127   : > { %2830 = vmatprep.mubr.msk.bf16.mxu0 %vm422_vm1, %v3545_v54  ;;  %2832 = vmatprep.mubr.msk.bf16.mxu1 %vm422_vm1, %v3545_v54  ;;  %v3082_v54 = vld [vmem:[%s4527_s1 + $0x120] ss:$12 sps:$4 sm:$0xff]  }
 0x129   : > { %1819 = vmatpush1.bf16.msra.mxu0 %v3079_v37  ;;  %1870 = vmatpush1.bf16.msra.mxu1 %v3080_v43  ;;  %v3084_v37 = vld [vmem:[%s4527_s1 + $0x10c] ss:$12 sps:$4 sm:$0xff]   ;;  %v3085_v43 = vld [vmem:[%s4527_s1 + $0x108] ss:$12 sps:$4 sm:$0xff]  }
 0x12a   : > { %1820 = vmatprep.subr.bf16.mxu0 %v3081_v34  ;;  %1871 = vmatprep.subr.bf16.mxu1 %v4607_v12  ;;  %v3086_v34 = vld [vmem:[%s4527_s1 + $0x110] ss:$12 sps:$4 sm:$0xff]  }
 0x12d   : > { %1821 = vmatpush1.bf16.msra.mxu0 %v3082_v54  ;;  %1872 = vmatpush1.bf16.msra.mxu1 %v3083_v44  ;;  %v3087_v54 = vld [vmem:[%s4527_s1 + $0xf4] ss:$12 sps:$4 sm:$0xff]   ;;  %v3088_v44 = vld [vmem:[%s4527_s1 + $0xf0] ss:$12 sps:$4 sm:$0xff]  }
 0x12e   : > { %1822 = vmatprep.subr.bf16.mxu0 %v3084_v37  ;;  %1873 = vmatprep.subr.bf16.mxu1 %v4607_v12  ;;  %v3089_v37 = vld [vmem:[%s4527_s1 + $0xf8] ss:$12 sps:$4 sm:$0xff]  }
 0x131   : > { %1823 = vmatpush1.bf16.msra.mxu0 %v3085_v43  ;;  %1874 = vmatpush1.bf16.msra.mxu1 %v3086_v34  ;;  %v3090_v43 = vld [vmem:[%s4527_s1 + $0xdc] ss:$12 sps:$4 sm:$0xff]   ;;  %v3091_v34 = vld [vmem:[%s4527_s1 + $0xd8] ss:$12 sps:$4 sm:$0xff]  }
 0x132   : > { %1824 = vmatprep.subr.bf16.mxu0 %v3087_v54  ;;  %1875 = vmatprep.subr.bf16.mxu1 %v4607_v12  ;;  %v3092_v54 = vld [vmem:[%s4527_s1 + $0xe0] ss:$12 sps:$4 sm:$0xff]  }
 0x135   : > { %1825 = vmatpush1.bf16.msra.mxu0 %v3088_v44  ;;  %1876 = vmatpush1.bf16.msra.mxu1 %v3089_v37  ;;  %v3093_v44 = vld [vmem:[%s4527_s1 + $0x19c] ss:$12 sps:$4 sm:$0xff]   ;;  %v3094_v37 = vld [vmem:[%s4527_s1 + $0x198] ss:$12 sps:$4 sm:$0xff]  }
 0x136   : > { %1826 = vmatprep.subr.bf16.mxu0 %v3090_v43  ;;  %1877 = vmatprep.subr.bf16.mxu1 %v4607_v12  ;;  %v3095_v43 = vld [vmem:[%s4527_s1 + $0x1a0] ss:$12 sps:$4 sm:$0xff]  }
 0x139   : > { %1827 = vmatpush1.bf16.msra.mxu0 %v3091_v34  ;;  %1878 = vmatpush1.bf16.msra.mxu1 %v3092_v54  ;;  %v3096_v34 = vld [vmem:[%s4527_s1 + $0xac] ss:$12 sps:$4 sm:$0xff]  }
 0x13a   : > { %1842 = vmatprep.subr.bf16.mxu0 %v3093_v44  ;;  %1893 = vmatprep.subr.bf16.mxu1 %v4607_v12  ;;  %v4668_v44 = vld [vmem:[#allocation9_spill] sm:$0xff] }
 0x13d   : > { %1843 = vmatpush2.bf16.msra.mxu0 %v3094_v37  ;;  %1894 = vmatpush2.bf16.msra.mxu1 %v3095_v43  ;;  %v4669_v37 = vld [vmem:[#allocation10_spill] sm:$0xff]  ;;  %v4670_v43 = vld [vmem:[#allocation11_spill] sm:$0xff] }
 0x13e   : > { %1911 = vmatprep.subr.bf16.mxu0 %v3096_v34  ;;  %1962 = vmatprep.subr.bf16.mxu1 %v4607_v12  ;;  %v4671_v34 = vld [vmem:[#allocation12_spill] sm:$0xff] }
 0x140   : > { %1845 = vmatmul.mubr.bf16.vlgmr.msra.gmra.mxu0 %v3676_v5  ;;  %1896 = vmatmul.mubr.bf16.vlgmr.msra.gmra.mxu1 %v3676_v5 }
 0x141   : > { %1912 = vmatpush1.bf16.msra.mxu0 %v3267_v59  ;;  %1963 = vmatpush1.bf16.msra.mxu1 %v3272_v60 }
 0x142   : > { %1913 = vmatprep.subr.bf16.mxu0 %v3279_v62  ;;  %1964 = vmatprep.subr.bf16.mxu1 %v4607_v12 }
 0x143   : > { %2831 = vmatprep.mubr.msk.bf16.mxu0 %vm422_vm1, %v3696_v49  ;;  %2833 = vmatprep.mubr.msk.bf16.mxu1 %vm422_vm1, %v3696_v49 }
 0x145   : > { %1914 = vmatpush1.bf16.msra.mxu0 %v3298_v1  ;;  %1965 = vmatpush1.bf16.msra.mxu1 %v3303_v3 }
 0x146   : > { %1915 = vmatprep.subr.bf16.mxu0 %v3310_v4  ;;  %1966 = vmatprep.subr.bf16.mxu1 %v4607_v12 }
 0x148   : > { %1855 = vmatmul.mubr.bf16.gmra.mxu0 %v3725_v2  ;;  %1904 = vmatmul.mubr.bf16.gmra.mxu1 %v3725_v2  ;;  %v4667_v2 = vld [vmem:[#allocation8_spill] sm:$0xff] }
 0x149   : > { %1916 = vmatpush1.bf16.msra.mxu0 %v3325_v7  ;;  %2834 = vmatprep.mubr.msk.bf16.mxu0 %vm422_vm1, %v3274_v61 }
 0x14a   : > { %1967 = vmatpush1.bf16.msra.mxu1 %v3330_v8  ;;  %2836 = vmatprep.mubr.msk.bf16.mxu1 %vm422_vm1, %v3274_v61 }
 0x14b   : > { %1917 = vmatprep.subr.bf16.mxu0 %v3341_v10  ;;  %1968 = vmatprep.subr.bf16.mxu1 %v4607_v12 }
 0x14c   : > { %v463_v59 = vpop.f32.mrf.mxu0  ;;  %v514_v60 = vpop.f32.mrf.mxu1 }
 0x14d   : > { %1918 = vmatpush1.bf16.msra.mxu0 %v3353_v13 }
 0x14e   : > { %1969 = vmatpush1.bf16.msra.mxu1 %v3358_v14  ;;  %v4221_v62 = vpop.f32.mrf.mxu0  ;;  %v516_v1 = vpop.f32.mrf.mxu1  ;;  %1919 = vmatprep.subr.bf16.mxu0 %v3365_v15 }
 0x14f   : > { %1970 = vmatprep.subr.bf16.mxu1 %v4607_v12  ;;  %v4675_v1 = vld [vmem:[#allocation16_spill] sm:$0xff] }
 0x150   : > { %v4225_v3 = vpop.f32.mrf.mxu0  ;;  %v4227_v61 = vpop.f32.mrf.mxu1 }
 0x151   : > { %1920 = vmatpush1.bf16.msra.mxu0 %v3376_v16 }
 0x152   : > { %1971 = vmatpush1.bf16.msra.mxu1 %v3381_v17  ;;  %v4231_v4 = vpop.f32.mrf.mxu0  ;;  %v519_v7 = vpop.f32.mrf.mxu1  ;;  %1921 = vmatprep.subr.bf16.mxu0 %v3388_v18 }
 0x153   : > { %1972 = vmatprep.subr.bf16.mxu1 %v4607_v12  ;;  %v4679_v7 = vld [vmem:[#allocation20_spill] sm:$0xff] }
 0x154   : > { %v4235_v8 = vpop.f32.mrf.mxu0  ;;  %v4237_v10 = vpop.f32.mrf.mxu1 }
 0x155   : > { %1922 = vmatpush1.bf16.msra.mxu0 %v3395_v19 }
 0x156   : > { %1973 = vmatpush1.bf16.msra.mxu1 %v3400_v20  ;;  %1923 = vmatprep.subr.bf16.mxu0 %v3407_v21  ;;  %v4242_v13 = vpop.f32.mrf.mxu0  ;;  %v524_v14 = vpop.f32.mrf.mxu1 }
 0x157   : > { %1974 = vmatprep.subr.bf16.mxu1 %v4607_v12 }
 0x158   : > { %v477_v15 = vpop.f32.mrf.mxu0  ;;  %v525_v16 = vpop.f32.mrf.mxu1 }
 0x159   : > { %1924 = vmatpush1.bf16.msra.mxu0 %v3414_v22  ;;  %v4684_v15 = vld [vmem:[#allocation25_spill] sm:$0xff] }
 0x15a   : > { %1975 = vmatpush1.bf16.msra.mxu1 %v3419_v23  ;;  %1925 = vmatprep.subr.bf16.mxu0 %v3426_v24  ;;  %v478_v17 = vpop.f32.mrf.mxu0  ;;  %v526_v18 = vpop.f32.mrf.mxu1 }
 0x15b   : > { %1976 = vmatprep.subr.bf16.mxu1 %v4607_v12 }
 0x15d   : > { %1926 = vmatpush1.bf16.msra.mxu0 %v3433_v25 }
 0x15e   : > { %1977 = vmatpush1.bf16.msra.mxu1 %v3438_v26  ;;  %1941 = vmatprep.subr.bf16.mxu0 %v3445_v27  ;;  %v4661_v27 = vld [vmem:[#allocation2_spill] sm:$0xff] }
 0x15f   : > { %1992 = vmatprep.subr.bf16.mxu1 %v4607_v12 }
 0x161   : > { %1942 = vmatpush2.bf16.msra.mxu0 %v3452_v28 }
 0x162   : > { %1993 = vmatpush2.bf16.msra.mxu1 %v3457_v29  ;;  %2010 = vmatprep.subr.bf16.mxu0 %v3467_v31  ;;  %v4662_v31 = vld [vmem:[#allocation3_spill] sm:$0xff] }
 0x163   : > { %2061 = vmatprep.subr.bf16.mxu1 %v4607_v12 }
 0x164   : > { %1944 = vmatmul.mubr.bf16.vlgmr.msra.gmra.mxu0 %v3287_v63 }
 0x165   : > { %1995 = vmatmul.mubr.bf16.vlgmr.msra.gmra.mxu1 %v3287_v63  ;;  %2835 = vmatprep.mubr.msk.bf16.mxu0 %vm422_vm1, %v3291_v0 }
 0x166   : > { %2837 = vmatprep.mubr.msk.bf16.mxu1 %vm422_vm1, %v3291_v0  ;;  %2011 = vmatpush1.bf16.msra.mxu0 %v3483_v38 }
 0x167   : > { %2062 = vmatpush1.bf16.msra.mxu1 %v3488_v39  ;;  %2012 = vmatprep.subr.bf16.mxu0 %v3495_v40  ;;  %v4663_v39 = vld [vmem:[#allocation4_spill] sm:$0xff] }
 0x168   : > { %2063 = vmatprep.subr.bf16.mxu1 %v4607_v12 }
 0x16a   : > { %2013 = vmatpush1.bf16.msra.mxu0 %v3506_v45 }
 0x16b   : > { %2064 = vmatpush1.bf16.msra.mxu1 %v3511_v46  ;;  %2014 = vmatprep.subr.bf16.mxu0 %v3518_v47 }
 0x16c   : > { %1954 = vmatmul.mubr.bf16.gmra.mxu0 %v3334_v9  ;;  %2065 = vmatprep.subr.bf16.mxu1 %v4607_v12 }
 0x16d   : > { %2003 = vmatmul.mubr.bf16.gmra.mxu1 %v3334_v9  ;;  %2838 = vmatprep.mubr.msk.bf16.mxu0 %vm422_vm1, %v3752_v30 }
 0x16e   : > { %2015 = vmatpush1.bf16.msra.mxu0 %v3529_v51  ;;  %2840 = vmatprep.mubr.msk.bf16.mxu1 %vm422_vm1, %v3752_v30  ;;  %v4664_v51 = vld [vmem:[#allocation5_spill] sm:$0xff] }
 0x16f   : > { %2066 = vmatpush1.bf16.msra.mxu1 %v3534_v52  ;;  %2016 = vmatprep.subr.bf16.mxu0 %v3541_v53 }
 0x170   : > { %v727_v63 = vpop.f32.mrf.mxu0  ;;  %v778_v0 = vpop.f32.mrf.mxu1  ;;  %2067 = vmatprep.subr.bf16.mxu1 %v4607_v12 }
 0x171   : > { %v4281_v19 = vadd.f32 %v727_v63, %v463_v59  ;;  %v4283_v20 = vadd.f32 %v778_v0, %v514_v60  ;;  %v4672_v59 = vld [vmem:[#allocation13_spill] sm:$0xff]  ;;  %v4673_v60 = vld [vmem:[#allocation14_spill] sm:$0xff]  ;;  %v4686_v0 = vld [vmem:[#allocation27_spill] sm:$0xff] }
 0x172   : > { %2017 = vmatpush1.bf16.msra.mxu0 %v3552_v55  ;;  %v729_v9 = vpop.f32.mrf.mxu0  ;;  %v780_v21 = vpop.f32.mrf.mxu1  ;;  %v4665_v55 = vld [vmem:[#allocation6_spill] sm:$0xff] }
 0x173   : > { %2068 = vmatpush1.bf16.msra.mxu1 %v3557_v56  ;;  %v4288_v22 = vadd.f32 %v729_v9, %v4221_v62  ;;  %2018 = vmatprep.subr.bf16.mxu0 %v3564_v57  ;;  %v4666_v57 = vld [vmem:[#allocation7_spill] sm:$0xff]  ;;  %v4685_v63 = vld [vmem:[#allocation26_spill] sm:$0xff] }
 0x174   : > { %v731_v23 = vpop.f32.mrf.mxu0  ;;  %v781_v24 = vpop.f32.mrf.mxu1  ;;  %2069 = vmatprep.subr.bf16.mxu1 %v4607_v12  ;;  %v4674_v62 = vld [vmem:[#allocation15_spill] sm:$0xff] }
 0x175   : > { %v4293_v25 = vadd.f32 %v731_v23, %v4225_v3  ;;  %v4296_v26 = vadd.f32 %v781_v24, %v4227_v61  ;;  %v4676_v3 = vld [vmem:[#allocation17_spill] sm:$0xff]  ;;  %v4677_v61 = vld [vmem:[#allocation18_spill] sm:$0xff]  ;;  %v4687_v23 = vld [vmem:[#allocation28_spill] sm:$0xff] }
 0x176   : > { %2019 = vmatpush1.bf16.msra.mxu0 %v4661_v27  ;;  %v733_v28 = vpop.f32.mrf.mxu0  ;;  %v783_v29 = vpop.f32.mrf.mxu1 }
 0x177   : > { %2070 = vmatpush1.bf16.msra.mxu1 %v4662_v31  ;;  %v4301_v38 = vadd.f32 %v733_v28, %v4231_v4  ;;  %2020 = vmatprep.subr.bf16.mxu0 %v4663_v39  ;;  %v4678_v4 = vld [vmem:[#allocation19_spill] sm:$0xff]  ;;  %v4688_v28 = vld [vmem:[#allocation29_spill] sm:$0xff]  ;;  %v4689_v29 = vld [vmem:[#allocation30_spill] sm:$0xff] }
 0x178   : > { %v737_v40 = vpop.f32.mrf.mxu0  ;;  %v786_v45 = vpop.f32.mrf.mxu1  ;;  %2071 = vmatprep.subr.bf16.mxu1 %v4607_v12 }
 0x179   : > { %v4306_v46 = vadd.f32 %v737_v40, %v4235_v8  ;;  %v4309_v47 = vadd.f32 %v786_v45, %v4237_v10  ;;  %v4680_v8 = vld [vmem:[#allocation21_spill] sm:$0xff]  ;;  %v4681_v10 = vld [vmem:[#allocation22_spill] sm:$0xff]  ;;  %v4690_v40 = vld [vmem:[#allocation31_spill] sm:$0xff] }
 0x17a   : > { %2021 = vmatpush1.bf16.msra.mxu0 %v4664_v51  ;;  %v739_v52 = vpop.f32.mrf.mxu0  ;;  %v788_v53 = vpop.f32.mrf.mxu1 }
 0x17b   : > { %2072 = vmatpush1.bf16.msra.mxu1 %v4665_v55  ;;  %v4314_v56 = vadd.f32 %v739_v52, %v4242_v13  ;;  %2022 = vmatprep.subr.bf16.mxu0 %v4666_v57  ;;  %v4691_v52 = vld [vmem:[#allocation32_spill] sm:$0xff]  ;;  %v4692_v53 = vld [vmem:[#allocation33_spill] sm:$0xff]  ;;  %v4693_v55 = vld [vmem:[#allocation34_spill] sm:$0xff] }
 0x17c   : > { %2073 = vmatprep.subr.bf16.mxu1 %v4607_v12  ;;  %v741_v5 = vpop.f32.mrf.mxu0  ;;  %v789_v30 = vpop.f32.mrf.mxu1 }
 0x17d   : > { %v4694_v30 = vld [vmem:[#allocation35_spill] sm:$0xff] }
 0x17e   : > { %2023 = vmatpush1.bf16.msra.mxu0 %v4667_v2  ;;  %v742_v49 = vpop.f32.mrf.mxu0  ;;  %v790_v54 = vpop.f32.mrf.mxu1  ;;  %v4695_v2 = vld [vmem:[#allocation36_spill] sm:$0xff] }
 0x17f   : > { %2074 = vmatpush1.bf16.msra.mxu1 %v4668_v44  ;;  %2024 = vmatprep.subr.bf16.mxu0 %v4669_v37  ;;  %v4696_v49 = vld [vmem:[#allocation37_spill] sm:$0xff]  ;;  %v4698_v54 = vld [vmem:[#allocation39_spill] sm:$0xff]  ;;  %v4699_v44 = vld [vmem:[#allocation40_spill] sm:$0xff] }
 0x180   : > { %2075 = vmatprep.subr.bf16.mxu1 %v4607_v12  ;;  %v4700_v37 = vld [vmem:[#allocation41_spill] sm:$0xff] }
 0x182   : > { %2025 = vmatpush1.bf16.msra.mxu0 %v4670_v43  ;;  %v4701_v43 = vld [vmem:[#allocation42_spill] sm:$0xff] }
 0x183   : > { %2076 = vmatpush1.bf16.msra.mxu1 %v4671_v34  ;;  %2040 = vmatprep.subr.bf16.mxu0 %v4672_v59  ;;  %v4702_v34 = vld [vmem:[#allocation43_spill] sm:$0xff]  ;;  %v4703_v59 = vld [vmem:[#allocation44_spill] sm:$0xff] }
 0x184   : > { %2091 = vmatprep.subr.bf16.mxu1 %v4607_v12 }
 0x186   : > { %2041 = vmatpush2.bf16.msra.mxu0 %v4673_v60  ;;  %v4704_v60 = vld [vmem:[#allocation45_spill] sm:$0xff] }
 0x187   : > { %2092 = vmatpush2.bf16.msra.mxu1 %v4674_v62  ;;  %2118 = vmatprep.subr.bf16.mxu0 %v4675_v1  ;;  %v4705_v62 = vld [vmem:[#allocation46_spill] sm:$0xff]  ;;  %v4706_v1 = vld [vmem:[#allocation47_spill] sm:$0xff] }
 0x188   : > { %2169 = vmatprep.subr.bf16.mxu1 %v4607_v12 }
 0x189   : > { %2043 = vmatmul.mubr.bf16.vlgmr.msra.gmra.mxu0 %v3882_v50 }
 0x18a   : > { %2094 = vmatmul.mubr.bf16.vlgmr.msra.gmra.mxu1 %v3882_v50  ;;  %2839 = vmatprep.mubr.msk.bf16.mxu0 %vm422_vm1, %v3906_v41  ;;  %v4683_v50 = vld [vmem:[#allocation24_spill] sm:$0xff] }
 0x18b   : > { %2841 = vmatprep.mubr.msk.bf16.mxu1 %vm422_vm1, %v3906_v41  ;;  %2119 = vmatpush1.bf16.msra.mxu0 %v4676_v3  ;;  %v4682_v41 = vld [vmem:[#allocation23_spill] sm:$0xff]  ;;  %v4707_v3 = vld [vmem:[#allocation48_spill] sm:$0xff] }
 0x18c   : > { %2170 = vmatpush1.bf16.msra.mxu1 %v4677_v61  ;;  %2120 = vmatprep.subr.bf16.mxu0 %v4678_v4  ;;  %v4708_v61 = vld [vmem:[#allocation49_spill] sm:$0xff]  ;;  %v4709_v4 = vld [vmem:[#allocation50_spill] sm:$0xff] }
 0x18d   : > { %2171 = vmatprep.subr.bf16.mxu1 %v4607_v12 }
 0x18f   : > { %2121 = vmatpush1.bf16.msra.mxu0 %v4679_v7 }
 0x190   : > { %2172 = vmatpush1.bf16.msra.mxu1 %v4680_v8  ;;  %2122 = vmatprep.subr.bf16.mxu0 %v4681_v10 }
 0x191   : > { %2053 = vmatmul.mubr.bf16.gmra.mxu0 %v3940_v33  ;;  %2173 = vmatprep.subr.bf16.mxu1 %v4607_v12 }
 0x192   : > { %2102 = vmatmul.mubr.bf16.gmra.mxu1 %v3940_v33  ;;  %2842 = vmatprep.mubr.msk.bf16.mxu0 %vm422_vm1, %v3963_v11 }
 0x193   : > { %2123 = vmatpush1.bf16.msra.mxu0 %v4682_v41  ;;  %2844 = vmatprep.mubr.msk.bf16.mxu1 %vm422_vm1, %v3963_v11 }
 0x194   : > { %2174 = vmatpush1.bf16.msra.mxu1 %v4683_v50  ;;  %v1051_v13 = vpop.f32.mrf.mxu0  ;;  %v1102_v14 = vpop.f32.mrf.mxu1  ;;  %2124 = vmatprep.subr.bf16.mxu0 %v4684_v15  ;;  %v4711_v50 = vld [vmem:[#allocation52_spill] sm:$0xff]  ;;  %v4713_v15 = vld [vmem:[#allocation54_spill] sm:$0xff] }
 0x195   : > { %v4354_v16 = vadd.f32 %v1051_v13, %v4281_v19  ;;  %v4357_v17 = vadd.f32 %v1102_v14, %v4283_v20  ;;  %2175 = vmatprep.subr.bf16.mxu1 %v4607_v12 }
 0x196   : > { %v1053_v33 = vpop.f32.mrf.mxu0  ;;  %v1104_v18 = vpop.f32.mrf.mxu1 }
 0x197   : > { %2125 = vmatpush1.bf16.msra.mxu0 %v4685_v63  ;;  %v4362_v11 = vadd.f32 %v1053_v33, %v4288_v22  ;;  %v4714_v63 = vld [vmem:[#allocation55_spill] sm:$0xff] }
 0x198   : > { %2176 = vmatpush1.bf16.msra.mxu1 %v4686_v0  ;;  %v1055_v9 = vpop.f32.mrf.mxu0  ;;  %v1105_v21 = vpop.f32.mrf.mxu1  ;;  %2126 = vmatprep.subr.bf16.mxu0 %v4687_v23  ;;  %v4715_v0 = vld [vmem:[#allocation56_spill] sm:$0xff]  ;;  %v4716_v23 = vld [vmem:[#allocation57_spill] sm:$0xff] }
 0x199   : > { %v4367_v19 = vadd.f32 %v1055_v9, %v4293_v25  ;;  %v4370_v20 = vadd.f32 %v1105_v21, %v4296_v26  ;;  %2177 = vmatprep.subr.bf16.mxu1 %v4607_v12 }
 0x19a   : > { %v1057_v24 = vpop.f32.mrf.mxu0  ;;  %v1107_v27 = vpop.f32.mrf.mxu1 }
 0x19b   : > { %2127 = vmatpush1.bf16.msra.mxu0 %v4688_v28  ;;  %v4375_v22 = vadd.f32 %v1057_v24, %v4301_v38 }
 0x19c   : > { %2178 = vmatpush1.bf16.msra.mxu1 %v4689_v29  ;;  %v1061_v31 = vpop.f32.mrf.mxu0  ;;  %v1110_v39 = vpop.f32.mrf.mxu1  ;;  %2128 = vmatprep.subr.bf16.mxu0 %v4690_v40  ;;  %v4717_v29 = vld [vmem:[#allocation58_spill] sm:$0xff] }
 0x19d   : > { %v4380_v25 = vadd.f32 %v1061_v31, %v4306_v46  ;;  %v4383_v26 = vadd.f32 %v1110_v39, %v4309_v47  ;;  %2179 = vmatprep.subr.bf16.mxu1 %v4607_v12  ;;  %v4719_v31 = vld [vmem:[#allocation60_spill] sm:$0xff] }
 0x19e   : > { %v1063_v45 = vpop.f32.mrf.mxu0  ;;  %v1112_v51 = vpop.f32.mrf.mxu1 }
 0x19f   : > { %2129 = vmatpush1.bf16.msra.mxu0 %v4691_v52  ;;  %v4388_v38 = vadd.f32 %v1063_v45, %v4314_v56  ;;  %v4697_v56 = vld [vmem:[#allocation38_spill] sm:$0xff]  ;;  %v4720_v52 = vld [vmem:[#allocation61_spill] sm:$0xff] }
 0x1a0   : > { %2180 = vmatpush1.bf16.msra.mxu1 %v4692_v53  ;;  %2130 = vmatprep.subr.bf16.mxu0 %v4693_v55  ;;  %v1065_v57 = vpop.f32.mrf.mxu0  ;;  %v1113_v5 = vpop.f32.mrf.mxu1  ;;  %v4721_v53 = vld [vmem:[#allocation62_spill] sm:$0xff]  ;;  %v4723_v55 = vld [vmem:[#allocation64_spill] sm:$0xff] }
 0x1a1   : > { %2181 = vmatprep.subr.bf16.mxu1 %v4607_v12  ;;  %v4724_v57 = vld [vmem:[#allocation65_spill] sm:$0xff]  ;;  %v2239_v5 = vpop.permute.xlu0 %2238 }
 0x1a2   : > { %v1066_v46 = vpop.f32.mrf.mxu0  ;;  %v1114_v47 = vpop.f32.mrf.mxu1 }
 0x1a3   : > { %2131 = vmatpush1.bf16.msra.mxu0 %v4694_v30 }
 0x1a4   : > { %2182 = vmatpush1.bf16.msra.mxu1 %v4695_v2  ;;  %2132 = vmatprep.subr.bf16.mxu0 %v4696_v49 }
 0x1a5   : > { %2183 = vmatprep.subr.bf16.mxu1 %v4607_v12  ;;  %v2243_v30 = vpop.permute.xlu0 %2242 }
 0x1a7   : > { %2133 = vmatpush1.bf16.msra.mxu0 %v4697_v56 }
 0x1a8   : > { %2184 = vmatpush1.bf16.msra.mxu1 %v4698_v54  ;;  %2148 = vmatprep.subr.bf16.mxu0 %v4699_v44 }
 0x1a9   : > { %2199 = vmatprep.subr.bf16.mxu1 %v4607_v12 }
 0x1ab   : > { %2149 = vmatpush2.bf16.msra.mxu0 %v4700_v37 }
 0x1ac   : > { %2200 = vmatpush2.bf16.msra.mxu1 %v4701_v43  ;;  %2256 = vmatprep.subr.bf16.mxu0 %v4702_v34 }
 0x1ad   : > { %2307 = vmatprep.subr.bf16.mxu1 %v4607_v12 }
 0x1ae   : > { %2151 = vmatmul.mubr.bf16.vlgmr.msra.gmra.mxu0 %v4087_v36 }
 0x1af   : > { %2202 = vmatmul.mubr.bf16.vlgmr.msra.gmra.mxu1 %v4087_v36  ;;  %2257 = vmatpush1.bf16.msra.mxu0 %v4703_v59  ;;  %v2241_v36 = vpop.permute.xlu1 %2240 }
 0x1b0   : > { %2308 = vmatpush1.bf16.msra.mxu1 %v4704_v60  ;;  %2258 = vmatprep.subr.bf16.mxu0 %v4705_v62  ;;  %v2246_v46 = vsel %vm273_vm2, %v2239_v5, %v2241_v36 }
 0x1b1   : > { %2309 = vmatprep.subr.bf16.mxu1 %v4607_v12  ;;  %2843 = vmatprep.mubr.msk.bf16.mxu0 %vm422_vm1, %v3934_v42 }
 0x1b2   : > { %2845 = vmatprep.mubr.msk.bf16.mxu1 %vm422_vm1, %v3934_v42  ;;  %v4710_v42 = vld [vmem:[#allocation51_spill] sm:$0xff] }
 0x1b3   : > { %2259 = vmatpush1.bf16.msra.mxu0 %v3915_v58  ;;  %v2245_v47 = vpop.permute.xlu1 %2244 }
 0x1b4   : > { %2310 = vmatpush1.bf16.msra.mxu1 %v4706_v1  ;;  %2260 = vmatprep.subr.bf16.mxu0 %v4707_v3  ;;  %v2247_v2 = vsel %vm273_vm2, %v2243_v30, %v2245_v47 }
 0x1b5   : > { %2311 = vmatprep.subr.bf16.mxu1 %v4607_v12 }
 0x1b6   : > { %2161 = vmatmul.mubr.bf16.gmra.mxu0 %v4079_v32 }
 0x1b7   : > { %2210 = vmatmul.mubr.bf16.gmra.mxu1 %v4079_v32  ;;  %2261 = vmatpush1.bf16.msra.mxu0 %v4708_v61  ;;  %v4712_v32 = vld [vmem:[#allocation53_spill] sm:$0xff] }
 0x1b8   : > { %2312 = vmatpush1.bf16.msra.mxu1 %v4709_v4  ;;  %v1394_v7 = vpop.f32.mrf.mxu0  ;;  %v1445_v8 = vpop.f32.mrf.mxu1  ;;  %2262 = vmatprep.subr.bf16.mxu0 %v4710_v42 }
 0x1b9   : > { %v1459_v58 = vadd.f32 %v1394_v7, %v4354_v16  ;;  %2313 = vmatprep.subr.bf16.mxu1 %v4607_v12  ;;  %2848 = vmatprep.mubr.msk.bf16.mxu0 %vm422_vm1, %v2241_v36 }
 0x1ba   : > { %v1396_v10 = vpop.f32.mrf.mxu0  ;;  %v1447_v41 = vpop.f32.mrf.mxu1  ;;  %2850 = vmatprep.mubr.msk.bf16.mxu1 %vm422_vm1, %v2241_v36 }
 0x1bb   : > { %2263 = vmatpush1.bf16.msra.mxu0 %v4711_v50  ;;  %v1460_v49 = vadd.f32 %v1396_v10, %v4362_v11 }
 0x1bc   : > { %2314 = vmatpush1.bf16.msra.mxu1 %v4712_v32  ;;  %v1398_v13 = vpop.f32.mrf.mxu0  ;;  %v1448_v14 = vpop.f32.mrf.mxu1  ;;  %2264 = vmatprep.subr.bf16.mxu0 %v4713_v15 }
 0x1bd   : > { %v1462_v33 = vadd.f32 %v1398_v13, %v4367_v19  ;;  %2315 = vmatprep.subr.bf16.mxu1 %v4607_v12  ;;  %v4718_v19 = vld [vmem:[#allocation59_spill] sm:$0xff]  ;;  %v1464_v37 = vadd.f32 %v1448_v14, %v4370_v20 }
 0x1be   : > { %v1400_v16 = vpop.f32.mrf.mxu0  ;;  %v1450_v18 = vpop.f32.mrf.mxu1 }
 0x1bf   : > { %2265 = vmatpush1.bf16.msra.mxu0 %v4714_v63 }
 0x1c0   : > { %2316 = vmatpush1.bf16.msra.mxu1 %v4715_v0  ;;  %v1404_v9 = vpop.f32.mrf.mxu0  ;;  %v1453_v21 = vpop.f32.mrf.mxu1  ;;  %2266 = vmatprep.subr.bf16.mxu0 %v4716_v23 }
 0x1c1   : > { %v1465_v24 = vadd.f32 %v1404_v9, %v4380_v25  ;;  %2317 = vmatprep.subr.bf16.mxu1 %v4607_v12  ;;  %v4722_v25 = vld [vmem:[#allocation63_spill] sm:$0xff]  ;;  %v1467_v3 = vadd.f32 %v1453_v21, %v4383_v26 }
 0x1c2   : > { %v1406_v27 = vpop.f32.mrf.mxu0  ;;  %v1455_v28 = vpop.f32.mrf.mxu1 }
 0x1c3   : > { %2267 = vmatpush1.bf16.msra.mxu0 %v4717_v29  ;;  %v1466_v4 = vadd.f32 %v1406_v27, %v4388_v38 }
 0x1c4   : > { %2318 = vmatpush1.bf16.msra.mxu1 %v4718_v19  ;;  %2268 = vmatprep.subr.bf16.mxu0 %v4719_v31  ;;  %v1408_v39 = vpop.f32.mrf.mxu0  ;;  %v1456_v40 = vpop.f32.mrf.mxu1 }
 0x1c5   : > { %2319 = vmatprep.subr.bf16.mxu1 %v4607_v12 }
 0x1c6   : > { %v1409_v45 = vpop.f32.mrf.mxu0  ;;  %v1457_v51 = vpop.f32.mrf.mxu1 }
 0x1c7   : > { %2269 = vmatpush1.bf16.msra.mxu0 %v4720_v52 }
 0x1c8   : > { %2320 = vmatpush1.bf16.msra.mxu1 %v4721_v53  ;;  %2270 = vmatprep.subr.bf16.mxu0 %v4722_v25 }
 0x1c9   : > { %2321 = vmatprep.subr.bf16.mxu1 %v4607_v12 }
 0x1cb   : > { %2271 = vmatpush1.bf16.msra.mxu0 %v4723_v55 }
 0x1cc   : > { %2322 = vmatpush1.bf16.msra.mxu1 %v4724_v57  ;;  %2286 = vmatprep.subr.bf16.mxu0 %v4064_v48  ;;  %v1461_v48 = vadd.f32 %v1445_v8, %v4357_v17  ;;  %v1463_v17 = vadd.f32 %v1400_v16, %v4375_v22 }
 0x1cd   : > { %2337 = vmatprep.subr.bf16.mxu1 %v4607_v12 }
 0x1cf   : > { %2287 = vmatpush2.bf16.msra.mxu0 %v4071_v35 }
 0x1d0   : > { %2338 = vmatpush2.bf16.msra.mxu1 %v4076_v6 }
 0x1d2   : > { %2289 = vmatmul.mubr.bf16.vlgmr.msra.gmra.mxu0 %v2246_v46 }
 0x1d3   : > { %2340 = vmatmul.mubr.bf16.vlgmr.msra.gmra.mxu1 %v2246_v46  ;;  %2849 = vmatprep.mubr.msk.bf16.mxu0 %vm422_vm1, %v2245_v47 }
 0x1d4   : > { %2851 = vmatprep.mubr.msk.bf16.mxu1 %vm422_vm1, %v2245_v47 }
 0x1da   : > { %2299 = vmatmul.mubr.bf16.gmra.mxu0 %v2247_v2 }
 0x1db   : > { %2348 = vmatmul.mubr.bf16.gmra.mxu1 %v2247_v2 }
 0x1dc   : > { %v1704_v12 = vpop.f32.mrf.mxu0  ;;  %v1755_v35 = vpop.f32.mrf.mxu1 }
 0x1dd   : > { %v4458_v56 = vadd.f32 %v1704_v12, %v1459_v58  ;;  %v1771_v6 = vadd.f32 %v1755_v35, %v1461_v48 }
 0x1de   : > { %v1706_v54 = vpop.f32.mrf.mxu0  ;;  %v1757_v44 = vpop.f32.mrf.mxu1 }
 0x1df   : > { %v4461_v43 = vadd.f32 %v1706_v54, %v1460_v49  ;;  %1786 = vrot.lane.b32.xlu1 %v1771_v6, %s3107_s7 }
 0x1e0   : > { %v1708_v34 = vpop.f32.mrf.mxu0  ;;  %v1758_v59 = vpop.f32.mrf.mxu1 }
 0x1e1   : > { %v4465_v60 = vadd.f32 %v1708_v34, %v1462_v33  ;;  %v1774_v62 = vadd.f32 %v1758_v59, %v1464_v37  ;;  %1784 = vrot.lane.b32.xlu0 %v4461_v43, %s3107_s7 }
 0x1e2   : > { %v1710_v11 = vpop.f32.mrf.mxu0  ;;  %v1760_v1 = vpop.f32.mrf.mxu1 }
 0x1e3   : > { %v4470_v20 = vadd.f32 %v1710_v11, %v1463_v17  ;;  %1790 = vrot.lane.b32.xlu1 %v1774_v62, %s3107_s7 }
 0x1e4   : > { %v1714_v36 = vpop.f32.mrf.mxu0  ;;  %v1763_v61 = vpop.f32.mrf.mxu1 }
 0x1e5   : > { %v4474_v7 = vadd.f32 %v1714_v36, %v1465_v24  ;;  %v1777_v22 = vadd.f32 %v1763_v61, %v1467_v3  ;;  %1788 = vrot.lane.b32.xlu0 %v4470_v20, %s3107_s7 }
 0x1e6   : > { %v1716_v8 = vpop.f32.mrf.mxu0  ;;  %v1765_v42 = vpop.f32.mrf.mxu1 }
 0x1e7   : > { %v4478_v58 = vadd.f32 %v1716_v8, %v1466_v4  ;;  %1794 = vrot.lane.b32.xlu1 %v1777_v22, %s3107_s7 }
 0x1e8   : > { %v1718_v26 = vpop.f32.mrf.mxu0  ;;  %v1766_v10 = vpop.f32.mrf.mxu1 }
 0x1e9   : > { %1792 = vrot.lane.b32.xlu0 %v4478_v58, %s3107_s7 }
 0x1ea   : > { %v1719_v41 = vpop.f32.mrf.mxu0  ;;  %v1767_v50 = vpop.f32.mrf.mxu1 }
 0x200   : > { %v1846_v38 = vpop.f32.mrf.mxu0  ;;  %v1897_v32 = vpop.f32.mrf.mxu1 }
 0x202   : > { %v1848_v13 = vpop.f32.mrf.mxu0  ;;  %v1899_v14 = vpop.f32.mrf.mxu1 }
 0x204   : > { %v1850_v15 = vpop.f32.mrf.mxu0  ;;  %v1900_v33 = vpop.f32.mrf.mxu1 }
 0x206   : > { %v1852_v16 = vpop.f32.mrf.mxu0  ;;  %v1902_v18 = vpop.f32.mrf.mxu1 }
 0x208   : > { %v1856_v63 = vpop.f32.mrf.mxu0  ;;  %v1905_v0 = vpop.f32.mrf.mxu1 }
 0x20a   : > { %v1858_v9 = vpop.f32.mrf.mxu0  ;;  %v1907_v21 = vpop.f32.mrf.mxu1 }
 0x20c   : > { %v1860_v23 = vpop.f32.mrf.mxu0  ;;  %v1908_v24 = vpop.f32.mrf.mxu1 }
 0x20e   : > { %v1861_v27 = vpop.f32.mrf.mxu0  ;;  %v1909_v28 = vpop.f32.mrf.mxu1 }
 0x224   : > { %v1945_v29 = vpop.f32.mrf.mxu0 }
 0x225   : > { %v1946_v19 = vadd.f32 %v1945_v29, %v1846_v38  ;;  %v1996_v31 = vpop.f32.mrf.mxu1 }
 0x226   : > { %v1997_v39 = vadd.f32 %v1996_v31, %v1897_v32  ;;  %v1947_v40 = vpop.f32.mrf.mxu0 }
 0x227   : > { %v1948_v45 = vadd.f32 %v1947_v40, %v1848_v13  ;;  %v1998_v51 = vpop.f32.mrf.mxu1 }
 0x228   : > { %v1949_v52 = vpop.f32.mrf.mxu0 }
 0x229   : > { %v1950_v53 = vadd.f32 %v1949_v52, %v1850_v15  ;;  %v1999_v25 = vpop.f32.mrf.mxu1 }
 0x22a   : > { %v2000_v55 = vadd.f32 %v1999_v25, %v1900_v33  ;;  %v1951_v57 = vpop.f32.mrf.mxu0 }
 0x22b   : > { %v1952_v5 = vadd.f32 %v1951_v57, %v1852_v16  ;;  %v2001_v46 = vpop.f32.mrf.mxu1 }
 0x22c   : > { %v1955_v47 = vpop.f32.mrf.mxu0 }
 0x22d   : > { %v1956_v30 = vadd.f32 %v1955_v47, %v1856_v63  ;;  %v2004_v2 = vpop.f32.mrf.mxu1 }
 0x22e   : > { %v2005_v48 = vadd.f32 %v2004_v2, %v1905_v0  ;;  %v1957_v12 = vpop.f32.mrf.mxu0 }
 0x22f   : > { %v1958_v35 = vadd.f32 %v1957_v12, %v1858_v9  ;;  %v2006_v49 = vpop.f32.mrf.mxu1 }
 0x230   : > { %v1959_v6 = vpop.f32.mrf.mxu0 }
 0x231   : > { %v2007_v54 = vpop.f32.mrf.mxu1 }
 0x232   : > { %v1960_v44 = vpop.f32.mrf.mxu0 }
 0x233   : > { %v2008_v37 = vpop.f32.mrf.mxu1 }
 0x249   : > { %v2044_v34 = vpop.f32.mrf.mxu0 }
 0x24a   : > { %v2109_v59 = vadd.f32 %v2044_v34, %v1946_v19  ;;  %v2095_v17 = vpop.f32.mrf.mxu1 }
 0x24b   : > { %v2111_v62 = vadd.f32 %v2095_v17, %v1997_v39  ;;  %v2046_v11 = vpop.f32.mrf.mxu0 }
 0x24c   : > { %v2110_v1 = vadd.f32 %v2046_v11, %v1948_v45  ;;  %v2097_v3 = vpop.f32.mrf.mxu1 }
 0x24d   : > { %v2048_v36 = vpop.f32.mrf.mxu0 }
 0x24e   : > { %v2112_v61 = vadd.f32 %v2048_v36, %v1950_v53  ;;  %v2098_v4 = vpop.f32.mrf.mxu1 }
 0x24f   : > { %v2114_v22 = vadd.f32 %v2098_v4, %v2000_v55  ;;  %v2050_v8 = vpop.f32.mrf.mxu0 }
 0x250   : > { %v2113_v42 = vadd.f32 %v2050_v8, %v1952_v5  ;;  %v2100_v26 = vpop.f32.mrf.mxu1 }
 0x251   : > { %v2054_v10 = vpop.f32.mrf.mxu0 }
 0x252   : > { %v2115_v41 = vadd.f32 %v2054_v10, %v1956_v30  ;;  %v2103_v50 = vpop.f32.mrf.mxu1 }
 0x253   : > { %v2117_v38 = vadd.f32 %v2103_v50, %v2005_v48  ;;  %v2056_v32 = vpop.f32.mrf.mxu0 }
 0x254   : > { %v2116_v13 = vadd.f32 %v2056_v32, %v1958_v35  ;;  %v2105_v14 = vpop.f32.mrf.mxu1  ;;  %v1785_v32 = vpop.permute.xlu0 %1784 }
 0x255   : > { %v2058_v15 = vpop.f32.mrf.mxu0 }
 0x256   : > { %v2106_v33 = vpop.f32.mrf.mxu1 }
 0x257   : > { %v2059_v16 = vpop.f32.mrf.mxu0 }
 0x258   : > { %v2107_v18 = vpop.f32.mrf.mxu1  ;;  %v1789_v15 = vpop.permute.xlu0 %1788 }
 0x25c   : > { %v1793_v18 = vpop.permute.xlu0 %1792 }
 0x26e   : > { %v2152_v63 = vpop.f32.mrf.mxu0 }
 0x26f   : > { %v2217_v0 = vadd.f32 %v2152_v63, %v2109_v59  ;;  %v2203_v9 = vpop.f32.mrf.mxu1 }
 0x270   : > { %v2154_v21 = vpop.f32.mrf.mxu0  ;;  %v2219_v57 = vadd.f32 %v2203_v9, %v2111_v62 }
 0x271   : > { %v2205_v23 = vpop.f32.mrf.mxu1  ;;  %v2218_v46 = vadd.f32 %v2154_v21, %v2110_v1 }
 0x272   : > { %v2156_v24 = vpop.f32.mrf.mxu0 }
 0x273   : > { %v2220_v27 = vadd.f32 %v2156_v24, %v2112_v61  ;;  %v2206_v28 = vpop.f32.mrf.mxu1 }
 0x274   : > { %v2158_v29 = vpop.f32.mrf.mxu0  ;;  %v2222_v49 = vadd.f32 %v2206_v28, %v2114_v22 }
 0x275   : > { %v2208_v19 = vpop.f32.mrf.mxu1  ;;  %v2221_v54 = vadd.f32 %v2158_v29, %v2113_v42 }
 0x276   : > { %v2162_v31 = vpop.f32.mrf.mxu0 }
 0x277   : > { %v2223_v39 = vadd.f32 %v2162_v31, %v2115_v41  ;;  %v2211_v40 = vpop.f32.mrf.mxu1 }
 0x278   : > { %v2164_v45 = vpop.f32.mrf.mxu0  ;;  %v2225_v11 = vadd.f32 %v2211_v40, %v2117_v38  ;;  %v1787_v38 = vpop.permute.xlu1 %1786 }
 0x279   : > { %v2213_v51 = vpop.f32.mrf.mxu1  ;;  %v2224_v3 = vadd.f32 %v2164_v45, %v2116_v13  ;;  %v2404_v13 = vlaneseq  ;;  %v1797_v9 = vsel %vm1796_vm4, %v1785_v32, %v1787_v38  ;;  %v1807_v24 = vmax.f32 %v4461_v43, %v1787_v38 }
 0x27a   : > { %v2166_v52 = vpop.f32.mrf.mxu0  ;;  %v1806_v19 = vmax.f32 %v4458_v56, %v1797_v9 }
 0x27b   : > { %v2214_v53 = vpop.f32.mrf.mxu1  ;;  %v2405_v33 = vshrl.u32 %v2404_v13, 7 }
 0x27c   : > { %v2167_v25 = vpop.f32.mrf.mxu0  ;;  %v1791_v14 = vpop.permute.xlu1 %1790 }
 0x27d   : > { %v2215_v55 = vpop.f32.mrf.mxu1  ;;  %v2410_v63 = vsub.s32 1, %v2405_v33  ;;  %v2406_v21 = vsub.s32 0, %v2405_v33  ;;  %v1809_v53 = vmax.f32 %v4470_v20, %v1791_v14 }
 0x280   : > { %v1795_v16 = vpop.permute.xlu1 %1794 }
 0x292   : > { %v2290_v5 = vpop.f32.mrf.mxu0 }
 0x293   : > { %v2355_v47 = vadd.f32 %v2290_v5, %v2217_v0  ;;  %v2341_v30 = vpop.f32.mrf.mxu1  ;;  %v172_v0 = vld [vmem:[%s4528_s2] sm:$0x3] }
 0x294   : > { %v2357_v2 = vadd.f32 %v2341_v30, %v2219_v57  ;;  %v2292_v48 = vpop.f32.mrf.mxu0  ;;  %v2407_v45 = vrot.slane %v172_v0, %v2406_v21 }
 0x295   : > { %v2356_v12 = vadd.f32 %v2292_v48, %v2218_v46  ;;  %v2343_v35 = vpop.f32.mrf.mxu1  ;;  %v1799_v48 = vsel %vm1796_vm4, %v1793_v18, %v1795_v16 }
 0x296   : > { %2372 = vrot.lane.b32.xlu1 %v2357_v2, %s3107_s7  ;;  %v2294_v6 = vpop.f32.mrf.mxu0 }
 0x297   : > { %v4484_v44 = vadd.f32 %v2294_v6, %v2220_v27  ;;  %v2344_v37 = vpop.f32.mrf.mxu1  ;;  %2370 = vrot.lane.b32.xlu0 %v2356_v12, %s3107_s7  ;;  %v2411_v27 = vrot.slane %v172_v0, %v2410_v63 }
 0x298   : > { %v2360_v34 = vadd.f32 %v2344_v37, %v2222_v49  ;;  %v2296_v59 = vpop.f32.mrf.mxu0 }
 0x299   : > { %v2359_v17 = vadd.f32 %v2296_v59, %v2221_v54  ;;  %v2346_v62 = vpop.f32.mrf.mxu1 }
 0x29a   : > { %2376 = vrot.lane.b32.xlu1 %v2360_v34, %s3107_s7  ;;  %v2300_v1 = vpop.f32.mrf.mxu0 }
 0x29b   : > { %v4488_v36 = vadd.f32 %v2300_v1, %v2223_v39  ;;  %v2349_v61 = vpop.f32.mrf.mxu1  ;;  %2374 = vrot.lane.b32.xlu0 %v2359_v17, %s3107_s7  ;;  %v1798_v39 = vsel %vm1796_vm4, %v1789_v15, %v1791_v14 }
 0x29c   : > { %v2363_v4 = vadd.f32 %v2349_v61, %v2225_v11  ;;  %v2302_v22 = vpop.f32.mrf.mxu0  ;;  %v1808_v5 = vmax.f32 %v4465_v60, %v1798_v39 }
 0x29d   : > { %v2362_v8 = vadd.f32 %v2302_v22, %v2224_v3  ;;  %v2351_v42 = vpop.f32.mrf.mxu1 }
 0x29e   : > { %2380 = vrot.lane.b32.xlu1 %v2363_v4, %s3107_s7  ;;  %v2304_v26 = vpop.f32.mrf.mxu0 }
 0x29f   : > { %v2352_v10 = vpop.f32.mrf.mxu1  ;;  %2378 = vrot.lane.b32.xlu0 %v2362_v8, %s3107_s7 }
 0x2a0   : > { %v2305_v41 = vpop.f32.mrf.mxu0 }
 0x2a1   : > { %v2353_v50 = vpop.f32.mrf.mxu1 }
 0x308   : > { %v2373_v23 = vpop.permute.xlu1 %2372 }
 0x309   : > { %v2392_v28 = vmax.f32 %v2356_v12, %v2373_v23  ;;  %v2371_v29 = vpop.permute.xlu0 %2370 }
 0x30a   : > { %v2382_v31 = vsel %vm1796_vm4, %v2371_v29, %v2373_v23 }
 0x30b   : > { %v2398_v40 = vmax.f32 %v1807_v24, %v2392_v28  ;;  %v2391_v51 = vmax.f32 %v2355_v47, %v2382_v31  ;;  %v1811_v47 = vmax.f32 %v4478_v58, %v1795_v16 }
 0x30c   : > { %v2377_v52 = vpop.permute.xlu1 %2376 }
 0x30d   : > { %v2415_v25 = vadd.f32 %v2411_v27, %v2398_v40  ;;  %v2397_v55 = vmax.f32 %v1806_v19, %v2391_v51  ;;  %v2394_v57 = vmax.f32 %v2359_v17, %v2377_v52  ;;  %v2375_v43 = vpop.permute.xlu0 %2374  ;;  %v1810_v17 = vmax.f32 %v4474_v7, %v1799_v48 }
 0x30e   : > { %v2383_v56 = vsel %vm1796_vm4, %v2375_v43, %v2377_v52 }
 0x30f   : > { %v2414_v46 = vadd.f32 %v2407_v45, %v2397_v55  ;;  %v2400_v30 = vmax.f32 %v1809_v53, %v2394_v57  ;;  %v2393_v2 = vmax.f32 %v4484_v44, %v2383_v56  ;;  %v2421_v20 = vmax.f32 %v2415_v25, 0.0 }
 0x310   : > { %v2381_v12 = vpop.permute.xlu1 %2380 }
 0x311   : > { %v2420_v35 = vmax.f32 %v2414_v46, 0.0  ;;  %v2417_v49 = vadd.f32 %v2411_v27, %v2400_v30  ;;  %v2399_v6 = vmax.f32 %v1808_v5, %v2393_v2  ;;  %v2396_v54 = vmax.f32 %v2362_v8, %v2381_v12  ;;  %v2379_v60 = vpop.permute.xlu0 %2378 }
 0x312   : > { %v2384_v58 = vsel %vm1796_vm4, %v2379_v60, %v2381_v12 }
 0x313   : > { %v2857_v44 = vpack.c.bf16 %v2421_v20, %v2420_v35  ;;  %v2416_v34 = vadd.f32 %v2407_v45, %v2399_v6  ;;  %v2402_v59 = vmax.f32 %v1811_v47, %v2396_v54  ;;  %v2395_v62 = vmax.f32 %v4488_v36, %v2384_v58 }
 0x314   : > { %v2423_v11 = vmax.f32 %v2417_v49, 0.0 }
 0x315   : > { %2449 = vst.msk [vmem:[%s170_s15] sm:$0xff] %vm4512_vm7, %v2857_v44  ;;  %v2422_v1 = vmax.f32 %v2416_v34, 0.0  ;;  %v2419_v3 = vadd.f32 %v2411_v27, %v2402_v59  ;;  %v2401_v61 = vmax.f32 %v1810_v17, %v2395_v62 }
 0x317   : > { %v2858_v4 = vpack.c.bf16 %v2423_v11, %v2422_v1  ;;  %v2418_v22 = vadd.f32 %v2407_v45, %v2401_v61  ;;  %v2425_v8 = vmax.f32 %v2419_v3, 0.0 }
 0x319   : > { %2450 = vst.msk [vmem:[%s170_s15 + $0x8] sm:$0xff] %vm4512_vm7, %v2858_v4  ;;  %v2424_v42 = vmax.f32 %v2418_v22, 0.0 }
 0x31b   : > { %v2859_v7 = vpack.c.bf16 %v2425_v8, %v2424_v42 }
 0x31d   : > { %2454 = vst.msk [vmem:[%s170_s15 + $0x10] sm:$0x77] %vm2453_vm10, %v2859_v7 }
 0x31e PF: > { %s13_s12 = sadd.s32 1, %s3103_s12  }
 0x31f   : > { %p10_p4 = scmp.ge.s32.totalorder %s13_s12, 4  }
 0x321   :  { %12 = sbr.rel (!%p10_p4) target bundleno = 1 (0x1), region = 66 }

// kernel: convnet_forward.3
= control target key start
LH: loop header
LB: loop body
LE: loop exit
PB: predicated region body
PF: predicated region fallthrough
CT: control target
= control target key end

     0   :  { %14 = vsyncpa [#allocation4], 0  ;;  %s6547_s0 = inlined_call_operand.vmem [shape: bf16[2,11,264], index: 0, kind: input, shape index: {}]   ;;  %s6548_s1 = inlined_call_operand.vmem [shape: bf16[5,132,288], index: 1, kind: input, shape index: {}]   ;;  %s6549_s2 = inlined_call_operand.vmem [shape: f32[1,144], index: 2, kind: input, shape index: {}]   ;;  %s6550_s3 = inlined_call_operand.vmem [shape: bf16[9,144,128], index: 3, kind: input, shape index: {}]   ;;  %s6551_s4 = inlined_call_operand.vmem [shape: f32[1,128], index: 4, kind: input, shape index: {}]   ;;  %s6552_s5 = inlined_call_operand.vmem [shape: bf16[128,128], index: 5, kind: input, shape index: {}]   ;;  %s6553_s6 = inlined_call_operand.vmem [shape: f32[1,128], index: 6, kind: input, shape index: {}]   ;;  %s6554_s7 = inlined_call_operand.vmem [shape: bf16[128,128], index: 7, kind: input, shape index: {}]   ;;  %s6555_s8 = inlined_call_operand.vmem [shape: f32[1,128], index: 8, kind: input, shape index: {}]   ;;  %s6556_s9 = inlined_call_operand.hbm [shape: f32[2,1,128], index: 9, kind: output, shape index: {}]  }
   0x1   :  { %16 = vsyncpa [#allocation4 + $0x1], 0  ;;  %s4845_s30 = smov 0   ;;  %s4847_s10 = smov 0  }
   0x2   :  { %s4849_s11 = smov 0   ;;  %s4851_s12 = smov 0  }
   0x3 LB: > { %s4866_s13 = sadd.s32 4294967295, %s4787_s12   ;;  %s3724_s14 = sadd.s32 4294967294, %s4787_s12   ;;  %s4787_s12 = sphi %s4851_s12, %s6742_s12   ;;  %s4783_s11 = sphi %s4849_s11, %s6741_s11   ;;  %s4779_s10 = sphi %s4847_s10, %s6740_s10   ;;  %s4775_s30 = sphi %s4845_s30, %s6739_s30  }
   0x4   : > { %s4870_s15 = sadd.s32 1, %s4787_s12   ;;  %s223_s16 = sadd.s32 1, %s4783_s11 }
   0x5   : > { %s220_s17 = ssub.s32 %s4787_s12, %s4870_s15  ;;  %p233_p0 = scmp.ne.s32.totalorder %s4783_s11, %s4779_s10 }
   0x6   : > { %p221_p1 = scmp.eq.s32.totalorder %s220_s17, 0  ;;  %p234_p2 = scmp.eq.s32.totalorder %s4866_s13, 1 }
   0x7   : > { %p239_p3 = scmp.ne.s32.totalorder %s4779_s10, %s4775_s30  ;;  %p240_p4 = scmp.eq.s32.totalorder %s3724_s14, 1 }
   0x8   : > { %s4881_s18 = scalar_select %p221_p1, %s4783_s11, %s223_s16  }
   0x9   : > { %p4883_p5 = por %p234_p2, %p233_p0  ;;  %p4887_p6 = por %p240_p4, %p239_p3 }
   0xa   : > { %p3727_p7 = scmp.ge.s32.totalorder %s4787_s12, 1  ;;  %p290_p8 = scmp.lt.s32.totalorder %s4787_s12, 3 }
   0xc   : > { %p291_p9 = pnand %p3727_p7, %p290_p8 }
   0xe   : > { %294 = sbr.rel (%p291_p9) target bundleno = 1560 (0x618), region = 56 }
  0x13   : > { %p325_p10 = scmp.lt.s32.totalorder %s4866_s13, 1  ;;  %v4411_v0 = vld [vmem:[%s6548_s1 + $0x178] ss:$12 sps:$4 sm:$0xff]   ;;  %v4413_v1 = vld [vmem:[%s6548_s1 + $0x174] ss:$12 sps:$4 sm:$0xff]   ;;  %v6560_v2 = vmov 0  }
  0x14   : > { %570 = vmatprep.subr.bf16.mxu0 %v4411_v0  ;;  %613 = vmatprep.subr.bf16.mxu1 %v6560_v2  ;;  %v4414_v3 = vld [vmem:[%s6548_s1 + $0x17c] ss:$12 sps:$4 sm:$0xff]   ;;  %v4415_v4 = vld [vmem:[%s6548_s1 + $0x160] ss:$12 sps:$4 sm:$0xff]   ;;  %v4418_v6 = vld [vmem:[%s6548_s1 + $0x164] ss:$12 sps:$4 sm:$0xff]  }
  0x15   : > { %s326_s25 = scalar_select %p325_p10, %s4866_s13, 1  ;;  %571 = vmatpush1.bf16.msra.mxu0 %v4413_v1  ;;  %v4417_v5 = vld [vmem:[%s6548_s1 + $0x15c] ss:$12 sps:$4 sm:$0xff]   ;;  %614 = vmatpush1.bf16.msra.mxu1 %v4414_v3  ;;  %v4421_v8 = vld [vmem:[%s6548_s1 + $0x144] ss:$12 sps:$4 sm:$0xff]   ;;  %vm560_vm0 = vcmask 1041408  }
  0x16   : > { %572 = vmatprep.subr.bf16.mxu0 %v4415_v4  ;;  %615 = vmatprep.subr.bf16.mxu1 %v6560_v2  ;;  %v4419_v7 = vld [vmem:[%s6548_s1 + $0x148] ss:$12 sps:$4 sm:$0xff]   ;;  %v4422_v9 = vld [vmem:[%s6548_s1 + $0x14c] ss:$12 sps:$4 sm:$0xff]   ;;  %s4790_s21 = smov 124   ;;  %vm556_vm1 = vcmask 31744  }
  0x17   : > { %s4363_s17 = smul.u32 24, %s326_s25  ;;  %v4423_v12 = vld [vmem:[%s6548_s1 + $0x130] ss:$12 sps:$4 sm:$0xff]   ;;  %v4425_v13 = vld [vmem:[%s6548_s1 + $0x12c] ss:$12 sps:$4 sm:$0xff]   ;;  %vm417_vm2 = vcmask 1014784  }
  0x18   : > { %v4426_v14 = vld [vmem:[%s6548_s1 + $0x134] ss:$12 sps:$4 sm:$0xff]   ;;  %v4427_v17 = vld [vmem:[%s6548_s1 + $0x118] ss:$12 sps:$4 sm:$0xff]   ;;  %v4430_v23 = vld [vmem:[%s6548_s1 + $0x11c] ss:$12 sps:$4 sm:$0xff]  }
  0x19   : > { %s4924_s25 = scalar_lea.vmem %s6547_s0, %s4363_s17  ;;  %573 = vmatpush1.bf16.msra.mxu0 %v4417_v5  ;;  %616 = vmatpush1.bf16.msra.mxu1 %v4418_v6  ;;  %v4429_v19 = vld [vmem:[%s6548_s1 + $0x114] ss:$12 sps:$4 sm:$0xff]   ;;  %v4433_v26 = vld [vmem:[%s6548_s1 + $0xfc] ss:$12 sps:$4 sm:$0xff]   ;;  %v4434_v27 = vld [vmem:[%s6548_s1 + $0x104] ss:$12 sps:$4 sm:$0xff]  }
  0x1a   : > { %v4408_v10 = vld [vmem:[%s4924_s25 + $0x4] ss:$12 sps:$4 sm:$0x1f]   ;;  %v4410_v11 = vld [vmem:[%s4924_s25 + $0x8] ss:$12 sps:$4 sm:$0x1f]   ;;  %574 = vmatprep.subr.bf16.mxu0 %v4419_v7  ;;  %617 = vmatprep.subr.bf16.mxu1 %v6560_v2 }
  0x1b   : > { %413 = vrot.lane.b32.xlu0 %v4408_v10, %s4790_s21  ;;  %v1218_v15 = vshrl.u32 %v4408_v10, 16  ;;  %v1220_v16 = vshll.u32 %v4408_v10, 16  ;;  %v1225_v21 = vshrl.u32 %v4410_v11, 16  ;;  %v1227_v22 = vshll.u32 %v4410_v11, 16  ;;  %v4431_v24 = vld [vmem:[%s6548_s1 + $0x100] ss:$12 sps:$4 sm:$0xff]  }
  0x1c   : > { %v4435_v29 = vld [vmem:[%s6548_s1 + $0xe8] ss:$12 sps:$4 sm:$0xff]   ;;  %v4437_v30 = vld [vmem:[%s6548_s1 + $0xe4] ss:$12 sps:$4 sm:$0xff]   ;;  %v4438_v31 = vld [vmem:[%s6548_s1 + $0xec] ss:$12 sps:$4 sm:$0xff]  }
  0x1d   : > { %575 = vmatpush1.bf16.msra.mxu0 %v4421_v8  ;;  %618 = vmatpush1.bf16.msra.mxu1 %v4422_v9  ;;  %v1222_v18 = vrot.slane %v1220_v16, 1  ;;  %v1229_v25 = vrot.slane %v1227_v22, 1  ;;  %v4439_v32 = vld [vmem:[%s6548_s1 + $0xd0] ss:$12 sps:$4 sm:$0xff]   ;;  %v4441_v34 = vld [vmem:[%s6548_s1 + $0xcc] ss:$12 sps:$4 sm:$0xff]  }
  0x1e   : > { %576 = vmatprep.subr.bf16.mxu0 %v4423_v12  ;;  %619 = vmatprep.subr.bf16.mxu1 %v6560_v2  ;;  %v3761_v33 = vld [vmem:[%s6548_s1 + $0x18c] sm:$0x33]  ;;  %v4442_v35 = vld [vmem:[%s6548_s1 + $0xd4] ss:$12 sps:$4 sm:$0xff]   ;;  %v5049_v50 = vld [vmem:[%s6548_s1 + $0x98] ss:$12 sps:$4 sm:$0xff]  }
  0x1f   : > { %415 = vrot.lane.b32.xlu0 %v4410_v11, %s4790_s21  ;;  %v1223_v20 = vor.u32 %v1222_v18, %v1218_v15  ;;  %v1230_v28 = vor.u32 %v1229_v25, %v1225_v21  ;;  %v4988_v36 = vcombine.high %v3761_v33, %v3761_v33  ;;  %v3789_v37 = vcombine.low %v3761_v33, %v3761_v33  ;;  %v4445_v38 = vld [vmem:[%s6548_s1 + $0x194] ss:$0 sps:$4 sm:$0x33]   ;;  %v4448_v40 = vld [vmem:[%s6548_s1 + $0xac] ss:$12 sps:$4 sm:$0xff]   ;;  %s4791_s28 = smov 112  }
  0x20   : > { %v5004_v41 = vsel %vm560_vm0, %v4445_v38, 0  ;;  %v5012_v43 = vld [vmem:[%s6548_s1 + $0xa8] ss:$12 sps:$4 sm:$0xff]   ;;  %v5017_v44 = vld [vmem:[%s6548_s1 + $0xb0] ss:$12 sps:$4 sm:$0xff]   ;;  %vm1773_vm3 = vcmask 916480  }
  0x21   : > { %577 = vmatpush1.bf16.msra.mxu0 %v4425_v13  ;;  %620 = vmatpush1.bf16.msra.mxu1 %v4426_v14  ;;  %v4997_v39 = vsel %vm560_vm0, %v3789_v37, 0  ;;  %v5022_v45 = vld [vmem:[%s6548_s1 + $0x94] ss:$12 sps:$4 sm:$0xff]   ;;  %v5025_v46 = vld [vmem:[%s4924_s25 + $0x4] ss:$12 sps:$4 sm:$0x1f]  }
  0x22   : > { %578 = vmatprep.subr.bf16.mxu0 %v4427_v17  ;;  %621 = vmatprep.subr.bf16.mxu1 %v6560_v2  ;;  %v5040_v49 = vld [vmem:[%s6548_s1 + $0x90] ss:$12 sps:$4 sm:$0xff]   ;;  %v5061_v52 = vld [vmem:[%s6548_s1 + $0x78] ss:$12 sps:$4 sm:$0xff]   ;;  %v5066_v53 = vld [vmem:[%s6548_s1 + $0x80] ss:$12 sps:$4 sm:$0xff]  }
  0x23   : > { %1231 = vrot.lane.b32.xlu1 %v1223_v20, %s4790_s21  ;;  %v5054_v51 = vld [vmem:[%s6548_s1 + $0x7c] ss:$12 sps:$4 sm:$0xff]   ;;  %v5077_v54 = vld [vmem:[%s6548_s1 + $0x64] ss:$12 sps:$4 sm:$0xff]   ;;  %v5087_v56 = vld [vmem:[%s6548_s1 + $0x60] ss:$12 sps:$4 sm:$0xff]  }
  0x24   : > { %v366_v55 = vld [vmem:[%s6548_s1 + $0xc0] sm:$0x33]  ;;  %v4480_v57 = vld [vmem:[%s6548_s1 + $0xc8] ss:$0 sps:$4 sm:$0x33]   ;;  %v939_v61 = vshll.u32 %v5025_v46, 16 }
  0x25   : > { %579 = vmatpush1.bf16.msra.mxu0 %v4429_v19  ;;  %622 = vmatpush1.bf16.msra.mxu1 %v4430_v23  ;;  %v5097_v58 = vld [vmem:[%s6548_s1 + $0x68] ss:$12 sps:$4 sm:$0xff]   ;;  %v3821_v59 = vcombine.low %v366_v55, %v366_v55  ;;  %v5104_v60 = vld [vmem:[%s6548_s1 + $0x4c] ss:$12 sps:$4 sm:$0xff]   ;;  %v5115_v63 = vld [vmem:[%s6548_s1 + $0x50] ss:$12 sps:$4 sm:$0xff]   ;;  %v5185_v14 = vcombine.high %v366_v55, %v366_v55 }
  0x26   : > { %580 = vmatprep.subr.bf16.mxu0 %v4431_v24  ;;  %623 = vmatprep.subr.bf16.mxu1 %v6560_v2  ;;  %v5110_v62 = vld [vmem:[%s6548_s1 + $0x48] ss:$12 sps:$4 sm:$0xff]   ;;  %v5128_v3 = vsel %vm560_vm0, %v4480_v57, 0  ;;  %v937_v4 = vshrl.u32 %v5025_v46, 16  ;;  %v941_v5 = vrot.slane %v939_v61, 1  ;;  %vm2300_vm4 = vcmask 1043456  }
  0x27   : > { %1233 = vrot.lane.b32.xlu1 %v1230_v28, %s4790_s21  ;;  %v5120_v0 = vld [vmem:[%s6548_s1 + $0x34] ss:$12 sps:$4 sm:$0xff]   ;;  %v5125_v1 = vsel %vm560_vm0, %v3821_v59, 0  ;;  %v5136_v6 = vld [vmem:[%s6548_s1 + $0x30] ss:$12 sps:$4 sm:$0xff]   ;;  %vm2301_vm5 = vcmask 130052  }
  0x28   : > { %v5141_v7 = vld [vmem:[%s6548_s1 + $0x38] ss:$12 sps:$4 sm:$0xff]   ;;  %v5146_v8 = vld [vmem:[%s6548_s1 + $0x1c] ss:$12 sps:$4 sm:$0xff]   ;;  %v5160_v10 = vld [vmem:[%s6548_s1 + $0x20] ss:$12 sps:$4 sm:$0xff]   ;;  %v5229_v22 = vor.u32 %v941_v5, %v937_v4 }
  0x29   : > { %581 = vmatpush1.bf16.msra.mxu0 %v4433_v26  ;;  %624 = vmatpush1.bf16.msra.mxu1 %v4434_v27  ;;  %v5155_v9 = vld [vmem:[%s6548_s1 + $0x18] ss:$12 sps:$4 sm:$0xff]   ;;  %v5174_v12 = vld [vmem:[%s6548_s1] ss:$12 sps:$4 sm:$0xff]   ;;  %v5179_v13 = vld [vmem:[%s6548_s1 + $0x8] ss:$12 sps:$4 sm:$0xff]  }
  0x2a   : > { %582 = vmatprep.subr.bf16.mxu0 %v4435_v29  ;;  %625 = vmatprep.subr.bf16.mxu1 %v6560_v2  ;;  %v5165_v11 = vld [vmem:[%s6548_s1 + $0x4] ss:$12 sps:$4 sm:$0xff]   ;;  %v5198_v16 = vld [vmem:[%s4924_s25] ss:$12 sps:$4 sm:$0x1f]   ;;  %vm2302_vm6 = vmor %vm2301_vm5, %vm2300_vm4  ;;  %vm2304_vm7 = vcmask 1040384  }
  0x2b   : > { %v5190_v15 = vld [vmem:[%s6548_s1 + $0x244] ss:$12 sps:$4 sm:$0xff]   ;;  %v5203_v17 = vld [vmem:[%s6548_s1 + $0x240] ss:$12 sps:$4 sm:$0xff]   ;;  %v5208_v18 = vld [vmem:[%s6548_s1 + $0x248] ss:$12 sps:$4 sm:$0xff]  }
  0x2c   : > { %v5213_v19 = vld [vmem:[%s6548_s1 + $0x22c] ss:$12 sps:$4 sm:$0xff]   ;;  %v5222_v20 = vld [vmem:[%s6548_s1 + $0x228] ss:$12 sps:$4 sm:$0xff]   ;;  %v5227_v21 = vld [vmem:[%s6548_s1 + $0x230] ss:$12 sps:$4 sm:$0xff]  }
  0x2d   : > { %583 = vmatpush1.bf16.msra.mxu0 %v4437_v30  ;;  %626 = vmatpush1.bf16.msra.mxu1 %v4438_v31  ;;  %v5236_v23 = vld [vmem:[%s6548_s1 + $0x214] ss:$12 sps:$4 sm:$0xff]   ;;  %v5245_v24 = vld [vmem:[%s6548_s1 + $0x210] ss:$12 sps:$4 sm:$0xff]   ;;  %v5250_v25 = vld [vmem:[%s6548_s1 + $0x218] ss:$12 sps:$4 sm:$0xff]  }
  0x2e   : > { %584 = vmatprep.subr.bf16.mxu0 %v4439_v32  ;;  %627 = vmatprep.subr.bf16.mxu1 %v6560_v2  ;;  %v5263_v26 = vld [vmem:[%s6548_s1 + $0x1fc] ss:$12 sps:$4 sm:$0xff]   ;;  %v5270_v27 = vld [vmem:[%s6548_s1 + $0x1f8] ss:$12 sps:$4 sm:$0xff]   ;;  %v5275_v28 = vld [vmem:[%s6548_s1 + $0x200] ss:$12 sps:$4 sm:$0xff]  }
  0x2f   : > { %v5282_v29 = vld [vmem:[%s6548_s1 + $0x1e4] ss:$12 sps:$4 sm:$0xff]   ;;  %v5289_v30 = vld [vmem:[%s6548_s1 + $0x1e0] ss:$12 sps:$4 sm:$0xff]   ;;  %v5294_v31 = vld [vmem:[%s6548_s1 + $0x1e8] ss:$12 sps:$4 sm:$0xff]  }
  0x30   : > { %v5301_v32 = vld [vmem:[%s6548_s1 + $0x1cc] ss:$12 sps:$4 sm:$0xff]   ;;  %v5308_v33 = vld [vmem:[%s6548_s1 + $0x1c8] ss:$12 sps:$4 sm:$0xff]   ;;  %v5327_v37 = vld [vmem:[%s6548_s1 + $0x1b0] ss:$12 sps:$4 sm:$0xff]  }
  0x31   : > { %585 = vmatpush1.bf16.msra.mxu0 %v4441_v34  ;;  %628 = vmatpush1.bf16.msra.mxu1 %v4442_v35  ;;  %v5313_v34 = vld [vmem:[%s6548_s1 + $0x1d0] ss:$12 sps:$4 sm:$0xff]   ;;  %v5320_v35 = vld [vmem:[%s6548_s1 + $0x1b4] ss:$12 sps:$4 sm:$0xff]   ;;  %6621 = vst [vmem:[#allocation7_spill] sm:$0xff] %v5327_v37  ;;  %v931_v5 = vshrl.u32 %v5198_v16, 16 }
  0x32   : > { %3792 = vmatprep.subr.msk.bf16.mxu0 %vm560_vm0, %v4988_v36  ;;  %643 = vmatprep.subr.bf16.mxu1 %v6560_v2  ;;  %6620 = vst [vmem:[#allocation6_spill] sm:$0xff] %v5320_v35  ;;  %v5332_v38 = vld [vmem:[%s6548_s1 + $0x1b8] ss:$12 sps:$4 sm:$0xff]   ;;  %v5355_v57 = vld [vmem:[%s6548_s1 + $0x1a0] ss:$12 sps:$4 sm:$0xff]   ;;  %vm2307_vm9 = vcmask 126980  }
  0x33   : > { %6622 = vst [vmem:[#allocation8_spill] sm:$0xff] %v5332_v38  ;;  %v5350_v55 = vld [vmem:[%s6548_s1 + $0x198] ss:$12 sps:$4 sm:$0xff]   ;;  %6625 = vst [vmem:[#allocation11_spill] sm:$0xff] %v5355_v57  ;;  %vm2305_vm8 = vsmask.f32 256 }
  0x34   : > { %6624 = vst [vmem:[#allocation10_spill] sm:$0xff] %v5350_v55  ;;  %v4518_v4 = vld [vmem:[%s6548_s1 + $0x260] ss:$0 sps:$4 sm:$0x33]   ;;  %vm2308_vm10 = vsmask.f32 4352  ;;  %vm2306_vm11 = vmand %vm2304_vm7, %vm2305_vm8 }
  0x35   : > { %601 = vmatpush2.bf16.msra.mxu0 %v4997_v39  ;;  %644 = vmatpush2.bf16.msra.mxu1 %v5004_v41  ;;  %vm2309_vm12 = vmand %vm2307_vm9, %vm2308_vm10  ;;  %vm2418_vm14 = vcmask 130048   ;;  %vm4793_vm15 = vmmov 0   ;;  %s323_s27 = sand.u32 1, %s4779_s10  }
  0x36   : > { %811 = vmatprep.subr.bf16.mxu0 %v4448_v40  ;;  %854 = vmatprep.subr.bf16.mxu1 %v6560_v2  ;;  %v5339_v40 = vld [vmem:[%s6548_s1 + $0x19c] ss:$12 sps:$4 sm:$0xff]   ;;  %vm2310_vm13 = vmor %vm2309_vm12, %vm2306_vm11  ;;  %s324_s16 = scalar_lea.vmem [#allocation3], %s323_s27  ;;  %s3657_s24 = scalar_lea.sflag [#allocation4], %s323_s27 }
  0x37   : > { %6623 = vst [vmem:[#allocation9_spill] sm:$0xff] %v5339_v40  ;;  %s3669_s22 = sshll.u32 %s324_s16, 4  ;;  %s6508_s22 = int_to_ptr.vmem [resolvable:$true] %s3669_s22 }
  0x38   : > { %s4727_s26 = scalar_lea.vmem %s6508_s22, 16 }
  0x39   : > { %p4728_p11 = scmp.ne.s32.totalorder %s6508_s22, %s4727_s26 }
  0x3b   : > { %p4729_p12 = pnand %p4728_p11, %p4883_p5 }
  0x3d   : > { %p4730_p13 = pneg %p4729_p12 }
  0x8d   : > { %v414_v42 = vpop.permute.xlu0 %413 }
  0x91   : > { %v5027_v47 = vpop.permute.xlu0 %415 }
  0x92   : > { %3793 = vmatprep.mubr.msk.bf16.mxu0 %vm556_vm1, %v5027_v47  ;;  %3794 = vmatprep.mubr.msk.bf16.mxu1 %vm556_vm1, %v5027_v47  ;;  %v5035_v48 = vsel %vm417_vm2, %v414_v42, %v5027_v47  ;;  %v3859_v42 = vld [vmem:[%s6548_s1 + $0x258] sm:$0x33] }
  0x93   : > { %603 = vmatmul.mubr.bf16.vlgmr.msra.gmra.mxu0 %v5035_v48  ;;  %646 = vmatmul.mubr.bf16.vlgmr.msra.gmra.mxu1 %v5035_v48  ;;  %v5359_v59 = vcombine.high %v3859_v42, %v3859_v42  ;;  %v3885_v61 = vcombine.low %v3859_v42, %v3859_v42  ;;  %v5374_v42 = vsel %vm560_vm0, %v4518_v4, 0  ;;  %v5395_v4 = vld [vmem:[%s6548_s1 + $0x314] ss:$12 sps:$4 sm:$0xff]  }
  0x94   : > { %812 = vmatpush1.bf16.msra.mxu0 %v5012_v43  ;;  %855 = vmatpush1.bf16.msra.mxu1 %v5017_v44  ;;  %6628 = vst [vmem:[#allocation14_spill] sm:$0xff] %v5374_v42  ;;  %6631 = vst [vmem:[#allocation17_spill] sm:$0xff] %v5395_v4 }
  0x95   : > { %813 = vmatprep.subr.bf16.mxu0 %v5022_v45  ;;  %856 = vmatprep.subr.bf16.mxu1 %v6560_v2  ;;  %6626 = vst [vmem:[#allocation12_spill] sm:$0xff] %v5359_v59 }
  0x96   : > { %3825 = vmatprep.mubr.msk.bf16.mxu0 %vm556_vm1, %v5025_v46  ;;  %3826 = vmatprep.mubr.msk.bf16.mxu1 %vm556_vm1, %v5025_v46  ;;  %v933_v46 = vshll.u32 %v5198_v16, 16 }
  0x98   : > { %814 = vmatpush1.bf16.msra.mxu0 %v5040_v49  ;;  %857 = vmatpush1.bf16.msra.mxu1 %v5049_v50 }
  0x99   : > { %815 = vmatprep.subr.bf16.mxu0 %v5054_v51  ;;  %858 = vmatprep.subr.bf16.mxu1 %v6560_v2 }
  0x9c   : > { %816 = vmatpush1.bf16.msra.mxu0 %v5061_v52  ;;  %859 = vmatpush1.bf16.msra.mxu1 %v5066_v53 }
  0x9d   : > { %817 = vmatprep.subr.bf16.mxu0 %v5077_v54  ;;  %860 = vmatprep.subr.bf16.mxu1 %v6560_v2 }
  0xa0   : > { %818 = vmatpush1.bf16.msra.mxu0 %v5087_v56  ;;  %861 = vmatpush1.bf16.msra.mxu1 %v5097_v58 }
  0xa1   : > { %819 = vmatprep.subr.bf16.mxu0 %v5104_v60  ;;  %862 = vmatprep.subr.bf16.mxu1 %v6560_v2 }
  0xa4   : > { %820 = vmatpush1.bf16.msra.mxu0 %v5110_v62  ;;  %863 = vmatpush1.bf16.msra.mxu1 %v5115_v63 }
  0xa5   : > { %821 = vmatprep.subr.bf16.mxu0 %v5120_v0  ;;  %864 = vmatprep.subr.bf16.mxu1 %v6560_v2 }
  0xa8   : > { %822 = vmatpush1.bf16.msra.mxu0 %v5136_v6  ;;  %865 = vmatpush1.bf16.msra.mxu1 %v5141_v7 }
  0xa9   : > { %823 = vmatprep.subr.bf16.mxu0 %v5146_v8  ;;  %866 = vmatprep.subr.bf16.mxu1 %v6560_v2 }
  0xac   : > { %824 = vmatpush1.bf16.msra.mxu0 %v5155_v9  ;;  %867 = vmatpush1.bf16.msra.mxu1 %v5160_v10 }
  0xad   : > { %825 = vmatprep.subr.bf16.mxu0 %v5165_v11  ;;  %868 = vmatprep.subr.bf16.mxu1 %v6560_v2 }
  0xb0   : > { %826 = vmatpush1.bf16.msra.mxu0 %v5174_v12  ;;  %869 = vmatpush1.bf16.msra.mxu1 %v5179_v13 }
  0xb1   : > { %3824 = vmatprep.subr.msk.bf16.mxu0 %vm560_vm0, %v5185_v14  ;;  %884 = vmatprep.subr.bf16.mxu1 %v6560_v2 }
  0xb4   : > { %842 = vmatpush2.bf16.msra.mxu0 %v5125_v1  ;;  %885 = vmatpush2.bf16.msra.mxu1 %v5128_v3 }
  0xb5   : > { %1092 = vmatprep.subr.bf16.mxu0 %v5190_v15  ;;  %1135 = vmatprep.subr.bf16.mxu1 %v6560_v2 }
  0xb7   : > { %844 = vmatmul.mubr.bf16.vlgmr.msra.gmra.mxu0 %v5198_v16  ;;  %887 = vmatmul.mubr.bf16.vlgmr.msra.gmra.mxu1 %v5198_v16  ;;  %v5379_v16 = vld [vmem:[%s6548_s1 + $0x310] ss:$12 sps:$4 sm:$0xff]  }
  0xb8   : > { %1093 = vmatpush1.bf16.msra.mxu0 %v5203_v17  ;;  %1136 = vmatpush1.bf16.msra.mxu1 %v5208_v18  ;;  %6629 = vst [vmem:[#allocation15_spill] sm:$0xff] %v5379_v16 }
  0xb9   : > { %1094 = vmatprep.subr.bf16.mxu0 %v5213_v19  ;;  %1137 = vmatprep.subr.bf16.mxu1 %v6560_v2 }
  0xba   : > { %3889 = vmatprep.mubr.msk.bf16.mxu0 %vm556_vm1, %v5229_v22  ;;  %3890 = vmatprep.mubr.msk.bf16.mxu1 %vm556_vm1, %v5229_v22 }
  0xbc   : > { %1095 = vmatpush1.bf16.msra.mxu0 %v5222_v20  ;;  %1138 = vmatpush1.bf16.msra.mxu1 %v5227_v21 }
  0xbd   : > { %1096 = vmatprep.subr.bf16.mxu0 %v5236_v23  ;;  %1139 = vmatprep.subr.bf16.mxu1 %v6560_v2 }
  0xc0   : > { %1097 = vmatpush1.bf16.msra.mxu0 %v5245_v24  ;;  %1140 = vmatpush1.bf16.msra.mxu1 %v5250_v25 }
  0xc1   : > { %1098 = vmatprep.subr.bf16.mxu0 %v5263_v26  ;;  %1141 = vmatprep.subr.bf16.mxu1 %v6560_v2 }
  0xc4   : > { %1099 = vmatpush1.bf16.msra.mxu0 %v5270_v27  ;;  %1142 = vmatpush1.bf16.msra.mxu1 %v5275_v28 }
  0xc5   : > { %1100 = vmatprep.subr.bf16.mxu0 %v5282_v29  ;;  %1143 = vmatprep.subr.bf16.mxu1 %v6560_v2 }
  0xc8   : > { %1101 = vmatpush1.bf16.msra.mxu0 %v5289_v30  ;;  %1144 = vmatpush1.bf16.msra.mxu1 %v5294_v31 }
  0xc9   : > { %1102 = vmatprep.subr.bf16.mxu0 %v5301_v32  ;;  %1145 = vmatprep.subr.bf16.mxu1 %v6560_v2 }
  0xcc   : > { %1103 = vmatpush1.bf16.msra.mxu0 %v5308_v33  ;;  %1146 = vmatpush1.bf16.msra.mxu1 %v5313_v34 }
  0xcd   : > { %1104 = vmatprep.subr.bf16.mxu0 %v5320_v35  ;;  %1147 = vmatprep.subr.bf16.mxu1 %v6560_v2 }
  0xd0   : > { %1105 = vmatpush1.bf16.msra.mxu0 %v5327_v37  ;;  %1148 = vmatpush1.bf16.msra.mxu1 %v5332_v38  ;;  %v935_v38 = vrot.slane %v933_v46, 1 }
  0xd1   : > { %1106 = vmatprep.subr.bf16.mxu0 %v5339_v40  ;;  %1149 = vmatprep.subr.bf16.mxu1 %v6560_v2  ;;  %v5371_v40 = vsel %vm560_vm0, %v3885_v61, 0  ;;  %v5390_v61 = vld [vmem:[%s6548_s1 + $0x30c] ss:$12 sps:$4 sm:$0xff]  }
  0xd2   : > { %6627 = vst [vmem:[#allocation13_spill] sm:$0xff] %v5371_v40  ;;  %v5381_v46 = vor.u32 %v935_v38, %v931_v5  ;;  %6630 = vst [vmem:[#allocation16_spill] sm:$0xff] %v5390_v61  ;;  %v5402_v38 = vld [vmem:[%s6548_s1 + $0x2f8] ss:$12 sps:$4 sm:$0xff]   ;;  %v5411_v5 = vld [vmem:[%s6548_s1 + $0x2f4] ss:$12 sps:$4 sm:$0xff]  }
  0xd3   : > { %6632 = vst [vmem:[#allocation18_spill] sm:$0xff] %v5402_v38  ;;  %6633 = vst [vmem:[#allocation19_spill] sm:$0xff] %v5411_v5 }
  0xd4   : > { %1107 = vmatpush1.bf16.msra.mxu0 %v5350_v55  ;;  %1150 = vmatpush1.bf16.msra.mxu1 %v5355_v57  ;;  %v5383_v55 = vpop.permute.xlu1 %1231  ;;  %v5450_v57 = vld [vmem:[%s6548_s1 + $0x2c8] ss:$12 sps:$4 sm:$0xff]  }
  0xd5   : > { %3888 = vmatprep.subr.msk.bf16.mxu0 %vm560_vm0, %v5359_v59  ;;  %1165 = vmatprep.subr.bf16.mxu1 %v6560_v2  ;;  %v4594_v59 = vld [vmem:[%s4924_s25 + $0x8] ss:$12 sps:$4 sm:$0x3e]   ;;  %6639 = vst [vmem:[#allocation24_spill] sm:$0xff] %v5450_v57 }
  0xd6   : > { %v2143_v35 = vrot.slane %v4594_v59, 1  ;;  %v5478_v59 = vld [vmem:[%s6548_s1 + $0x2ac] ss:$12 sps:$4 sm:$0xff]  }
  0xd7   : > { %6643 = vst [vmem:[#allocation28_spill] sm:$0xff] %v5478_v59 }
  0xd8   : > { %1123 = vmatpush2.bf16.msra.mxu0 %v5371_v40  ;;  %1166 = vmatpush2.bf16.msra.mxu1 %v5374_v42  ;;  %v5434_v42 = vld [vmem:[%s6548_s1 + $0x2dc] ss:$12 sps:$4 sm:$0xff]   ;;  %v4592_v40 = vld [vmem:[%s4924_s25 + $0x4] ss:$12 sps:$4 sm:$0x3e]  }
  0xd9   : > { %1385 = vmatprep.subr.bf16.mxu0 %v5379_v16  ;;  %1428 = vmatprep.subr.bf16.mxu1 %v6560_v2  ;;  %v5416_v2 = vld [vmem:[%s6548_s1 + $0x2fc] ss:$12 sps:$4 sm:$0xff]   ;;  %v6635_v16 = vmov 0   ;;  %6637 = vst [vmem:[#allocation22_spill] sm:$0xff] %v5434_v42  ;;  %v2142_v37 = vrot.slane %v4592_v40, 1 }
  0xda   : > { %6634 = vst [vmem:[#allocation20_spill] sm:$0xff] %v5416_v2  ;;  %v5469_v40 = vld [vmem:[%s6548_s1 + $0x2b0] ss:$12 sps:$4 sm:$0xff]   ;;  %2146 = vrot.lane.b32.xlu1 %v2143_v35, %s4790_s21  ;;  %v5490_v35 = vld [vmem:[%s6548_s1 + $0x298] ss:$12 sps:$4 sm:$0xff]  }
  0xdb   : > { %1125 = vmatmul.mubr.bf16.vlgmr.msra.gmra.mxu0 %v5381_v46  ;;  %1168 = vmatmul.mubr.bf16.vlgmr.msra.gmra.mxu1 %v5381_v46  ;;  %6642 = vst [vmem:[#allocation27_spill] sm:$0xff] %v5469_v40  ;;  %6645 = vst [vmem:[#allocation30_spill] sm:$0xff] %v5490_v35 }
  0xdc   : > { %1386 = vmatpush1.bf16.msra.mxu0 %v5390_v61  ;;  %1429 = vmatpush1.bf16.msra.mxu1 %v5395_v4  ;;  %v5423_v61 = vld [vmem:[%s6548_s1 + $0x2e0] ss:$12 sps:$4 sm:$0xff]   ;;  %v5425_v4 = vpop.permute.xlu1 %1233 }
  0xdd   : > { %1387 = vmatprep.subr.bf16.mxu0 %v5402_v38  ;;  %1430 = vmatprep.subr.bf16.mxu1 %v6635_v16  ;;  %6636 = vst [vmem:[#allocation21_spill] sm:$0xff] %v5423_v61  ;;  %v5439_v38 = vld [vmem:[%s6548_s1 + $0x2e4] ss:$12 sps:$4 sm:$0xff]  }
  0xde   : > { %3953 = vmatprep.mubr.msk.bf16.mxu0 %vm556_vm1, %v5425_v4  ;;  %3954 = vmatprep.mubr.msk.bf16.mxu1 %vm556_vm1, %v5425_v4  ;;  %6638 = vst [vmem:[#allocation23_spill] sm:$0xff] %v5439_v38 }
  0xdf   : > { %2144 = vrot.lane.b32.xlu0 %v2142_v37, %s4790_s21  ;;  %v5497_v37 = vld [vmem:[%s6548_s1 + $0x294] ss:$12 sps:$4 sm:$0xff]   ;;  %s4300_s21 = sshll.u32 %s4866_s13, 4  ;;  %s4794_s13 = smov [#allocation3]  }
  0xe0   : > { %1388 = vmatpush1.bf16.msra.mxu0 %v5411_v5  ;;  %1431 = vmatpush1.bf16.msra.mxu1 %v5416_v2  ;;  %v5457_v2 = vld [vmem:[%s6548_s1 + $0x2c4] ss:$12 sps:$4 sm:$0xff]   ;;  %6646 = vst [vmem:[#allocation31_spill] sm:$0xff] %v5497_v37  ;;  %s6506_s17 = scalar_lea.hbm %s6556_s9, %s4300_s21 }
  0xe1   : > { %1389 = vmatprep.subr.bf16.mxu0 %v5423_v61  ;;  %1432 = vmatprep.subr.bf16.mxu1 %v6635_v16  ;;  %6640 = vst [vmem:[#allocation25_spill] sm:$0xff] %v5457_v2  ;;  %v5462_v61 = vld [vmem:[%s6548_s1 + $0x2cc] ss:$12 sps:$4 sm:$0xff]  }
  0xe2   : > { %6641 = vst [vmem:[#allocation26_spill] sm:$0xff] %v5462_v61 }
  0xe4   : > { %1390 = vmatpush1.bf16.msra.mxu0 %v5434_v42  ;;  %1433 = vmatpush1.bf16.msra.mxu1 %v5439_v38  ;;  %v4589_v42 = vld [vmem:[%s4924_s25 + $0x4] ss:$12 sps:$4 sm:$0x3e]  }
  0xe5   : > { %1391 = vmatprep.subr.bf16.mxu0 %v5450_v57  ;;  %1434 = vmatprep.subr.bf16.mxu1 %v6635_v16  ;;  %v5483_v57 = vld [vmem:[%s6548_s1 + $0x2b4] ss:$12 sps:$4 sm:$0xff]  }
  0xe6   : > { %6644 = vst [vmem:[#allocation29_spill] sm:$0xff] %v5483_v57 }
  0xe8   : > { %1392 = vmatpush1.bf16.msra.mxu0 %v5457_v2  ;;  %1435 = vmatpush1.bf16.msra.mxu1 %v5462_v61  ;;  %v5543_v61 = vld [vmem:[%s6548_s1 + $0x26c] ss:$12 sps:$4 sm:$0xff]  }
  0xe9   : > { %1393 = vmatprep.subr.bf16.mxu0 %v5469_v40  ;;  %1436 = vmatprep.subr.bf16.mxu1 %v6635_v16  ;;  %v5502_v40 = vld [vmem:[%s6548_s1 + $0x29c] ss:$12 sps:$4 sm:$0xff]   ;;  %6653 = vst [vmem:[#allocation38_spill] sm:$0xff] %v5543_v61 }
  0xea   : > { %6647 = vst [vmem:[#allocation32_spill] sm:$0xff] %v5502_v40 }
  0xec   : > { %1394 = vmatpush1.bf16.msra.mxu0 %v5478_v59  ;;  %1437 = vmatpush1.bf16.msra.mxu1 %v5483_v57  ;;  %v5509_v59 = vld [vmem:[%s6548_s1 + $0x280] ss:$12 sps:$4 sm:$0xff]   ;;  %v5516_v57 = vld [vmem:[%s6548_s1 + $0x27c] ss:$12 sps:$4 sm:$0xff]  }
  0xed   : > { %1395 = vmatprep.subr.bf16.mxu0 %v5490_v35  ;;  %1438 = vmatprep.subr.bf16.mxu1 %v6635_v16  ;;  %6648 = vst [vmem:[#allocation33_spill] sm:$0xff] %v5509_v59  ;;  %6649 = vst [vmem:[#allocation34_spill] sm:$0xff] %v5516_v57  ;;  %v5521_v35 = vld [vmem:[%s6548_s1 + $0x284] ss:$12 sps:$4 sm:$0xff]  }
  0xee   : > { %6650 = vst [vmem:[#allocation35_spill] sm:$0xff] %v5521_v35 }
  0xf0   : > { %1396 = vmatpush1.bf16.msra.mxu0 %v5497_v37  ;;  %1439 = vmatpush1.bf16.msra.mxu1 %v5502_v40  ;;  %v5528_v37 = vld [vmem:[%s6548_s1 + $0x268] ss:$12 sps:$4 sm:$0xff]  }
  0xf1   : > { %1397 = vmatprep.subr.bf16.mxu0 %v5509_v59  ;;  %1440 = vmatprep.subr.bf16.mxu1 %v6635_v16  ;;  %6651 = vst [vmem:[#allocation36_spill] sm:$0xff] %v5528_v37  ;;  %v3923_v40 = vld [vmem:[%s6548_s1 + $0x324] sm:$0x33] }
  0xf2   : > { %v5538_v59 = vld [vmem:[%s6548_s1 + $0x264] ss:$12 sps:$4 sm:$0xff]   ;;  %v5547_v2 = vcombine.high %v3923_v40, %v3923_v40 }
  0xf3   : > { %6652 = vst [vmem:[#allocation37_spill] sm:$0xff] %v5538_v59 }
  0xf4   : > { %1398 = vmatpush1.bf16.msra.mxu0 %v5516_v57  ;;  %1441 = vmatpush1.bf16.msra.mxu1 %v5521_v35  ;;  %6654 = vst [vmem:[#allocation39_spill] sm:$0xff] %v5547_v2  ;;  %v3949_v57 = vcombine.low %v3923_v40, %v3923_v40  ;;  %v4553_v35 = vld [vmem:[%s6548_s1 + $0x32c] ss:$0 sps:$4 sm:$0x33]   ;;  %v5566_v40 = vld [vmem:[%s6548_s1 + $0x3dc] ss:$12 sps:$4 sm:$0xff]  }
  0xf5   : > { %1399 = vmatprep.subr.bf16.mxu0 %v5528_v37  ;;  %1442 = vmatprep.subr.bf16.mxu1 %v6635_v16  ;;  %v5561_v38 = vsel %vm560_vm0, %v4553_v35, 0  ;;  %6657 = vst [vmem:[#allocation42_spill] sm:$0xff] %v5566_v40  ;;  %v5586_v35 = vld [vmem:[%s6548_s1 + $0x3c4] ss:$12 sps:$4 sm:$0xff]  }
  0xf6   : > { %v5558_v37 = vsel %vm560_vm0, %v3949_v57, 0  ;;  %6656 = vst [vmem:[#allocation41_spill] sm:$0xff] %v5561_v38  ;;  %v5579_v57 = vld [vmem:[%s6548_s1 + $0x3e0] ss:$12 sps:$4 sm:$0xff]   ;;  %6660 = vst [vmem:[#allocation45_spill] sm:$0xff] %v5586_v35 }
  0xf7   : > { %6655 = vst [vmem:[#allocation40_spill] sm:$0xff] %v5558_v37  ;;  %6659 = vst [vmem:[#allocation44_spill] sm:$0xff] %v5579_v57 }
  0xf8   : > { %1400 = vmatpush1.bf16.msra.mxu0 %v5538_v59  ;;  %1443 = vmatpush1.bf16.msra.mxu1 %v5543_v61 }
  0xf9   : > { %3952 = vmatprep.subr.msk.bf16.mxu0 %vm560_vm0, %v5547_v2  ;;  %1458 = vmatprep.subr.bf16.mxu1 %v6635_v16  ;;  %v5574_v2 = vld [vmem:[%s6548_s1 + $0x3d8] ss:$12 sps:$4 sm:$0xff]  }
  0xfa   : > { %6658 = vst [vmem:[#allocation43_spill] sm:$0xff] %v5574_v2 }
  0xfc   : > { %1416 = vmatpush2.bf16.msra.mxu0 %v5558_v37  ;;  %1459 = vmatpush2.bf16.msra.mxu1 %v5561_v38  ;;  %v5591_v38 = vsel %vm417_vm2, %v5383_v55, %v5425_v4  ;;  %v5593_v37 = vrot.slane %v4589_v42, 1  ;;  %v5607_v55 = vld [vmem:[%s6548_s1 + $0x3c8] ss:$12 sps:$4 sm:$0xff]   ;;  %v5614_v42 = vld [vmem:[%s6548_s1 + $0x3ac] ss:$12 sps:$4 sm:$0xff]  }
  0xfd   : > { %1671 = vmatprep.subr.bf16.mxu0 %v5566_v40  ;;  %1714 = vmatprep.subr.bf16.mxu1 %v6635_v16  ;;  %v5602_v40 = vld [vmem:[%s6548_s1 + $0x3c0] ss:$12 sps:$4 sm:$0xff]   ;;  %6662 = vst [vmem:[#allocation47_spill] sm:$0xff] %v5607_v55  ;;  %6663 = vst [vmem:[#allocation48_spill] sm:$0xff] %v5614_v42 }
  0xfe   : > { %6661 = vst [vmem:[#allocation46_spill] sm:$0xff] %v5602_v40 }
  0xff   : > { %1418 = vmatmul.mubr.bf16.vlgmr.msra.gmra.mxu0 %v5591_v38  ;;  %1461 = vmatmul.mubr.bf16.vlgmr.msra.gmra.mxu1 %v5591_v38 }
 0x100   : > { %1672 = vmatpush1.bf16.msra.mxu0 %v5574_v2  ;;  %1715 = vmatpush1.bf16.msra.mxu1 %v5579_v57  ;;  %v5630_v57 = vld [vmem:[%s6548_s1 + $0x3b0] ss:$12 sps:$4 sm:$0xff]  }
 0x101   : > { %1673 = vmatprep.subr.bf16.mxu0 %v5586_v35  ;;  %1716 = vmatprep.subr.bf16.mxu1 %v6635_v16  ;;  %v5625_v35 = vld [vmem:[%s6548_s1 + $0x3a8] ss:$12 sps:$4 sm:$0xff]   ;;  %6665 = vst [vmem:[#allocation50_spill] sm:$0xff] %v5630_v57  ;;  %v5723_v2 = vld [vmem:[%s6548_s1 + $0x330] ss:$12 sps:$4 sm:$0xff]  }
 0x102   : > { %4019 = vmatprep.mubr.msk.bf16.mxu0 %vm556_vm1, %v5593_v37  ;;  %4020 = vmatprep.mubr.msk.bf16.mxu1 %vm556_vm1, %v5593_v37  ;;  %6664 = vst [vmem:[#allocation49_spill] sm:$0xff] %v5625_v35 }
 0x104   : > { %1674 = vmatpush1.bf16.msra.mxu0 %v5602_v40  ;;  %1717 = vmatpush1.bf16.msra.mxu1 %v5607_v55  ;;  %v5637_v40 = vld [vmem:[%s6548_s1 + $0x394] ss:$12 sps:$4 sm:$0xff]   ;;  %v5644_v55 = vld [vmem:[%s6548_s1 + $0x390] ss:$12 sps:$4 sm:$0xff]  }
 0x105   : > { %1675 = vmatprep.subr.bf16.mxu0 %v5614_v42  ;;  %1718 = vmatprep.subr.bf16.mxu1 %v6635_v16  ;;  %6666 = vst [vmem:[#allocation51_spill] sm:$0xff] %v5637_v40  ;;  %6667 = vst [vmem:[#allocation52_spill] sm:$0xff] %v5644_v55  ;;  %v5649_v42 = vld [vmem:[%s6548_s1 + $0x398] ss:$12 sps:$4 sm:$0xff]  }
 0x106   : > { %6668 = vst [vmem:[#allocation53_spill] sm:$0xff] %v5649_v42 }
 0x108   : > { %1676 = vmatpush1.bf16.msra.mxu0 %v5625_v35  ;;  %1719 = vmatpush1.bf16.msra.mxu1 %v5630_v57  ;;  %v5656_v35 = vld [vmem:[%s6548_s1 + $0x37c] ss:$12 sps:$4 sm:$0xff]   ;;  %v5663_v57 = vld [vmem:[%s6548_s1 + $0x378] ss:$12 sps:$4 sm:$0xff]  }
 0x109   : > { %1677 = vmatprep.subr.bf16.mxu0 %v5637_v40  ;;  %1720 = vmatprep.subr.bf16.mxu1 %v6635_v16  ;;  %6669 = vst [vmem:[#allocation54_spill] sm:$0xff] %v5656_v35  ;;  %6670 = vst [vmem:[#allocation55_spill] sm:$0xff] %v5663_v57  ;;  %v5668_v40 = vld [vmem:[%s6548_s1 + $0x380] ss:$12 sps:$4 sm:$0xff]  }
 0x10a   : > { %6671 = vst [vmem:[#allocation56_spill] sm:$0xff] %v5668_v40 }
 0x10c   : > { %1678 = vmatpush1.bf16.msra.mxu0 %v5644_v55  ;;  %1721 = vmatpush1.bf16.msra.mxu1 %v5649_v42  ;;  %v5675_v55 = vld [vmem:[%s6548_s1 + $0x364] ss:$12 sps:$4 sm:$0xff]   ;;  %v5682_v42 = vld [vmem:[%s6548_s1 + $0x360] ss:$12 sps:$4 sm:$0xff]  }
 0x10d   : > { %1679 = vmatprep.subr.bf16.mxu0 %v5656_v35  ;;  %1722 = vmatprep.subr.bf16.mxu1 %v6635_v16  ;;  %6672 = vst [vmem:[#allocation57_spill] sm:$0xff] %v5675_v55  ;;  %6673 = vst [vmem:[#allocation58_spill] sm:$0xff] %v5682_v42  ;;  %v5687_v35 = vld [vmem:[%s6548_s1 + $0x368] ss:$12 sps:$4 sm:$0xff]  }
 0x10e   : > { %6674 = vst [vmem:[#allocation59_spill] sm:$0xff] %v5687_v35 }
 0x110   : > { %1680 = vmatpush1.bf16.msra.mxu0 %v5663_v57  ;;  %1723 = vmatpush1.bf16.msra.mxu1 %v5668_v40  ;;  %v5694_v57 = vld [vmem:[%s6548_s1 + $0x34c] ss:$12 sps:$4 sm:$0xff]   ;;  %v5701_v40 = vld [vmem:[%s6548_s1 + $0x348] ss:$12 sps:$4 sm:$0xff]  }
 0x111   : > { %1681 = vmatprep.subr.bf16.mxu0 %v5675_v55  ;;  %1724 = vmatprep.subr.bf16.mxu1 %v6635_v16  ;;  %6675 = vst [vmem:[#allocation60_spill] sm:$0xff] %v5694_v57  ;;  %6676 = vst [vmem:[#allocation61_spill] sm:$0xff] %v5701_v40  ;;  %v5706_v55 = vld [vmem:[%s6548_s1 + $0x350] ss:$12 sps:$4 sm:$0xff]  }
 0x112   : > { %6677 = vst [vmem:[#allocation62_spill] sm:$0xff] %v5706_v55 }
 0x114   : > { %1682 = vmatpush1.bf16.msra.mxu0 %v5682_v42  ;;  %1725 = vmatpush1.bf16.msra.mxu1 %v5687_v35  ;;  %v5713_v42 = vld [vmem:[%s6548_s1 + $0x334] ss:$12 sps:$4 sm:$0xff]  }
 0x115   : > { %1683 = vmatprep.subr.bf16.mxu0 %v5694_v57  ;;  %1726 = vmatprep.subr.bf16.mxu1 %v6635_v16  ;;  %6678 = vst [vmem:[#allocation63_spill] sm:$0xff] %v5713_v42  ;;  %v3987_v35 = vld [vmem:[%s6548_s1 + $0x3f0] sm:$0x33]  ;;  %v5728_v57 = vld [vmem:[%s6548_s1 + $0x338] ss:$12 sps:$4 sm:$0xff]  }
 0x116   : > { %6679 = vst [vmem:[#allocation64_spill] sm:$0xff] %v5728_v57  ;;  %v5732_v61 = vcombine.high %v3987_v35, %v3987_v35  ;;  %v4015_v59 = vcombine.low %v3987_v35, %v3987_v35 }
 0x118   : > { %1684 = vmatpush1.bf16.msra.mxu0 %v5701_v40  ;;  %1727 = vmatpush1.bf16.msra.mxu1 %v5706_v55  ;;  %v4588_v55 = vld [vmem:[%s6548_s1 + $0x3f8] ss:$0 sps:$4 sm:$0x33]   ;;  %v4591_v40 = vld [vmem:[%s4924_s25] ss:$12 sps:$4 sm:$0x3e]  }
 0x119   : > { %1685 = vmatprep.subr.bf16.mxu0 %v5713_v42  ;;  %1728 = vmatprep.subr.bf16.mxu1 %v6635_v16  ;;  %v5744_v42 = vsel %vm560_vm0, %v4015_v59, 0  ;;  %v5747_v5 = vsel %vm560_vm0, %v4588_v55, 0  ;;  %v5749_v35 = vrot.slane %v4591_v40, 1  ;;  %v4703_v59 = vld [vmem:[%s6548_s1 + $0x174] ss:$12 sps:$4 sm:$0xff]   ;;  %s4731_s25 = sshll.u32 %s4794_s13, 4  ;;  %s4732_s25 = int_to_ptr.vmem [resolvable:$false] %s4731_s25 }
 0x11a   : > { %v4704_v40 = vld [vmem:[%s6548_s1 + $0x17c] ss:$12 sps:$4 sm:$0xff]   ;;  %s4733_s29 = scalar_lea.vmem %s4732_s25, 32  ;;  %p4734_p0 = scmp.lt.s32.totalorder %s6508_s22, %s4732_s25 }
 0x11b   : > { %v4706_v55 = vld [vmem:[%s6548_s1 + $0x15c] ss:$12 sps:$4 sm:$0xff]   ;;  %p4735_p1 = scmp.lt.s32.totalorder %s4733_s29, %s4727_s26 }
 0x11c   : > { %1686 = vmatpush1.bf16.msra.mxu0 %v5723_v2  ;;  %1729 = vmatpush1.bf16.msra.mxu1 %v5728_v57  ;;  %v4702_v57 = vld [vmem:[%s6548_s1 + $0x178] ss:$12 sps:$4 sm:$0xff]  }
 0x11d   : > { %4018 = vmatprep.subr.msk.bf16.mxu0 %vm560_vm0, %v5732_v61  ;;  %1744 = vmatprep.subr.bf16.mxu1 %v6635_v16  ;;  %p4736_p2 = por %p4735_p1, %p4734_p0 }
 0x11f   : > { %p4737_p3 = pnand %p4736_p2, %p4730_p13 }
 0x120   : > { %1702 = vmatpush2.bf16.msra.mxu0 %v5744_v42  ;;  %1745 = vmatpush2.bf16.msra.mxu1 %v5747_v5 }
 0x121   : > { %1784 = vmatprep.subr.bf16.mxu0 %v4702_v57  ;;  %1827 = vmatprep.subr.bf16.mxu1 %v6635_v16  ;;  %v4705_v57 = vld [vmem:[%s6548_s1 + $0x160] ss:$12 sps:$4 sm:$0xff]  }
 0x123   : > { %1704 = vmatmul.mubr.bf16.vlgmr.msra.gmra.mxu0 %v5749_v35  ;;  %1747 = vmatmul.mubr.bf16.vlgmr.msra.gmra.mxu1 %v5749_v35 }
 0x124   : > { %1785 = vmatpush1.bf16.msra.mxu0 %v4703_v59  ;;  %1828 = vmatpush1.bf16.msra.mxu1 %v4704_v40  ;;  %v4707_v59 = vld [vmem:[%s6548_s1 + $0x164] ss:$12 sps:$4 sm:$0xff]   ;;  %v4708_v40 = vld [vmem:[%s6548_s1 + $0x148] ss:$12 sps:$4 sm:$0xff]  }
 0x125   : > { %1786 = vmatprep.subr.bf16.mxu0 %v4705_v57  ;;  %1829 = vmatprep.subr.bf16.mxu1 %v6635_v16  ;;  %v4710_v57 = vld [vmem:[%s6548_s1 + $0x14c] ss:$12 sps:$4 sm:$0xff]  }
 0x126   : > { %4022 = vmatprep.mubr.msk.bf16.mxu0 %vm556_vm1, %v5229_v22  ;;  %4023 = vmatprep.mubr.msk.bf16.mxu1 %vm556_vm1, %v5229_v22  ;;  %v4709_v22 = vld [vmem:[%s6548_s1 + $0x144] ss:$12 sps:$4 sm:$0xff]  }
 0x128   : > { %1787 = vmatpush1.bf16.msra.mxu0 %v4706_v55  ;;  %1830 = vmatpush1.bf16.msra.mxu1 %v4707_v59  ;;  %v4711_v55 = vld [vmem:[%s6548_s1 + $0x130] ss:$12 sps:$4 sm:$0xff]   ;;  %v4712_v59 = vld [vmem:[%s6548_s1 + $0x12c] ss:$12 sps:$4 sm:$0xff]  }
 0x129   : > { %1788 = vmatprep.subr.bf16.mxu0 %v4708_v40  ;;  %1831 = vmatprep.subr.bf16.mxu1 %v6635_v16  ;;  %v4713_v40 = vld [vmem:[%s6548_s1 + $0x134] ss:$12 sps:$4 sm:$0xff]  }
 0x12c   : > { %1789 = vmatpush1.bf16.msra.mxu0 %v4709_v22  ;;  %1832 = vmatpush1.bf16.msra.mxu1 %v4710_v57  ;;  %v4714_v22 = vld [vmem:[%s6548_s1 + $0x118] ss:$12 sps:$4 sm:$0xff]   ;;  %v4715_v57 = vld [vmem:[%s6548_s1 + $0x114] ss:$12 sps:$4 sm:$0xff]  }
 0x12d   : > { %1790 = vmatprep.subr.bf16.mxu0 %v4711_v55  ;;  %1833 = vmatprep.subr.bf16.mxu1 %v6635_v16  ;;  %v4716_v55 = vld [vmem:[%s6548_s1 + $0x11c] ss:$12 sps:$4 sm:$0xff]  }
 0x130   : > { %1791 = vmatpush1.bf16.msra.mxu0 %v4712_v59  ;;  %1834 = vmatpush1.bf16.msra.mxu1 %v4713_v40  ;;  %v4717_v59 = vld [vmem:[%s6548_s1 + $0x100] ss:$12 sps:$4 sm:$0xff]   ;;  %v4718_v40 = vld [vmem:[%s6548_s1 + $0xfc] ss:$12 sps:$4 sm:$0xff]  }
 0x131   : > { %1792 = vmatprep.subr.bf16.mxu0 %v4714_v22  ;;  %1835 = vmatprep.subr.bf16.mxu1 %v6635_v16  ;;  %v4719_v22 = vld [vmem:[%s6548_s1 + $0x104] ss:$12 sps:$4 sm:$0xff]  }
 0x134   : > { %1793 = vmatpush1.bf16.msra.mxu0 %v4715_v57  ;;  %1836 = vmatpush1.bf16.msra.mxu1 %v4716_v55  ;;  %v4720_v57 = vld [vmem:[%s6548_s1 + $0xe8] ss:$12 sps:$4 sm:$0xff]   ;;  %v4721_v55 = vld [vmem:[%s6548_s1 + $0xe4] ss:$12 sps:$4 sm:$0xff]  }
 0x135   : > { %1794 = vmatprep.subr.bf16.mxu0 %v4717_v59  ;;  %1837 = vmatprep.subr.bf16.mxu1 %v6635_v16  ;;  %v4722_v59 = vld [vmem:[%s6548_s1 + $0xec] ss:$12 sps:$4 sm:$0xff]  }
 0x138   : > { %1795 = vmatpush1.bf16.msra.mxu0 %v4718_v40  ;;  %1838 = vmatpush1.bf16.msra.mxu1 %v4719_v22  ;;  %v4723_v40 = vld [vmem:[%s6548_s1 + $0xd0] ss:$12 sps:$4 sm:$0xff]   ;;  %v4724_v22 = vld [vmem:[%s6548_s1 + $0xcc] ss:$12 sps:$4 sm:$0xff]  }
 0x139   : > { %1796 = vmatprep.subr.bf16.mxu0 %v4720_v57  ;;  %1839 = vmatprep.subr.bf16.mxu1 %v6635_v16  ;;  %v4725_v57 = vld [vmem:[%s6548_s1 + $0xd4] ss:$12 sps:$4 sm:$0xff]  }
 0x13c   : > { %1797 = vmatpush1.bf16.msra.mxu0 %v4721_v55  ;;  %1840 = vmatpush1.bf16.msra.mxu1 %v4722_v59  ;;  %v4726_v55 = vld [vmem:[%s6548_s1 + $0xac] ss:$12 sps:$4 sm:$0xff]   ;;  %v6702_v59 = vld [vmem:[#allocation28_spill] sm:$0xff] }
 0x13d   : > { %1798 = vmatprep.subr.bf16.mxu0 %v4723_v40  ;;  %1841 = vmatprep.subr.bf16.mxu1 %v6635_v16  ;;  %v6703_v40 = vld [vmem:[#allocation29_spill] sm:$0xff] }
 0x140   : > { %1799 = vmatpush1.bf16.msra.mxu0 %v4724_v22  ;;  %1842 = vmatpush1.bf16.msra.mxu1 %v4725_v57 }
 0x141   : > { %4021 = vmatprep.subr.msk.bf16.mxu0 %vm560_vm0, %v4988_v36  ;;  %1857 = vmatprep.subr.bf16.mxu1 %v6635_v16 }
 0x144   : > { %1815 = vmatpush2.bf16.msra.mxu0 %v4997_v39  ;;  %1858 = vmatpush2.bf16.msra.mxu1 %v5004_v41 }
 0x145   : > { %1868 = vmatprep.subr.bf16.mxu0 %v4726_v55  ;;  %1911 = vmatprep.subr.bf16.mxu1 %v6635_v16  ;;  %v6704_v55 = vld [vmem:[#allocation30_spill] sm:$0xff] }
 0x147   : > { %1817 = vmatmul.mubr.bf16.vlgmr.msra.gmra.mxu0 %v5381_v46  ;;  %1860 = vmatmul.mubr.bf16.vlgmr.msra.gmra.mxu1 %v5381_v46 }
 0x148   : > { %1869 = vmatpush1.bf16.msra.mxu0 %v5012_v43  ;;  %4025 = vmatprep.mubr.msk.bf16.mxu0 %vm556_vm1, %v5027_v47 }
 0x149   : > { %1912 = vmatpush1.bf16.msra.mxu1 %v5017_v44  ;;  %4026 = vmatprep.mubr.msk.bf16.mxu1 %vm556_vm1, %v5027_v47 }
 0x14a   : > { %1870 = vmatprep.subr.bf16.mxu0 %v5022_v45  ;;  %1913 = vmatprep.subr.bf16.mxu1 %v6635_v16 }
 0x14c   : > { %1871 = vmatpush1.bf16.msra.mxu0 %v5040_v49 }
 0x14d   : > { %1914 = vmatpush1.bf16.msra.mxu1 %v5049_v50  ;;  %1872 = vmatprep.subr.bf16.mxu0 %v5054_v51 }
 0x14e   : > { %1915 = vmatprep.subr.bf16.mxu1 %v6635_v16 }
 0x150   : > { %1873 = vmatpush1.bf16.msra.mxu0 %v5061_v52 }
 0x151   : > { %1916 = vmatpush1.bf16.msra.mxu1 %v5066_v53  ;;  %1874 = vmatprep.subr.bf16.mxu0 %v5077_v54 }
 0x152   : > { %1917 = vmatprep.subr.bf16.mxu1 %v6635_v16 }
 0x153   : > { %v647_v36 = vpop.f32.mrf.mxu1  ;;  %v604_v44 = vpop.f32.mrf.mxu0 }
 0x154   : > { %1875 = vmatpush1.bf16.msra.mxu0 %v5087_v56 }
 0x155   : > { %1918 = vmatpush1.bf16.msra.mxu1 %v5097_v58  ;;  %v649_v39 = vpop.f32.mrf.mxu1  ;;  %1876 = vmatprep.subr.bf16.mxu0 %v5104_v60  ;;  %v5894_v45 = vpop.f32.mrf.mxu0 }
 0x156   : > { %1919 = vmatprep.subr.bf16.mxu1 %v6635_v16  ;;  %v6705_v39 = vld [vmem:[#allocation31_spill] sm:$0xff] }
 0x157   : > { %v650_v41 = vpop.f32.mrf.mxu1  ;;  %v608_v47 = vpop.f32.mrf.mxu0 }
 0x158   : > { %1877 = vmatpush1.bf16.msra.mxu0 %v5110_v62 }
 0x159   : > { %1920 = vmatpush1.bf16.msra.mxu1 %v5115_v63  ;;  %v652_v43 = vpop.f32.mrf.mxu1  ;;  %1878 = vmatprep.subr.bf16.mxu0 %v5120_v0 }
 0x15a   : > { %1921 = vmatprep.subr.bf16.mxu1 %v6635_v16  ;;  %v6707_v43 = vld [vmem:[#allocation33_spill] sm:$0xff] }
 0x15c   : > { %1879 = vmatpush1.bf16.msra.mxu0 %v5136_v6  ;;  %v6681_v6 = vld [vmem:[#allocation7_spill] sm:$0xff] }
 0x15d   : > { %1922 = vmatpush1.bf16.msra.mxu1 %v5141_v7  ;;  %1880 = vmatprep.subr.bf16.mxu0 %v5146_v8  ;;  %v6682_v7 = vld [vmem:[#allocation8_spill] sm:$0xff]  ;;  %v6683_v8 = vld [vmem:[#allocation9_spill] sm:$0xff] }
 0x15e   : > { %1923 = vmatprep.subr.bf16.mxu1 %v6635_v16 }
 0x160   : > { %1881 = vmatpush1.bf16.msra.mxu0 %v5155_v9  ;;  %v6684_v9 = vld [vmem:[#allocation10_spill] sm:$0xff] }
 0x161   : > { %1924 = vmatpush1.bf16.msra.mxu1 %v5160_v10  ;;  %1882 = vmatprep.subr.bf16.mxu0 %v5165_v11  ;;  %v6685_v10 = vld [vmem:[#allocation11_spill] sm:$0xff]  ;;  %v6686_v11 = vld [vmem:[#allocation12_spill] sm:$0xff] }
 0x162   : > { %1925 = vmatprep.subr.bf16.mxu1 %v6635_v16 }
 0x164   : > { %1883 = vmatpush1.bf16.msra.mxu0 %v5174_v12  ;;  %v6687_v12 = vld [vmem:[#allocation13_spill] sm:$0xff] }
 0x165   : > { %1926 = vmatpush1.bf16.msra.mxu1 %v5179_v13  ;;  %4024 = vmatprep.subr.msk.bf16.mxu0 %vm560_vm0, %v5185_v14  ;;  %v6688_v13 = vld [vmem:[#allocation14_spill] sm:$0xff]  ;;  %v6689_v14 = vld [vmem:[#allocation15_spill] sm:$0xff] }
 0x166   : > { %1941 = vmatprep.subr.bf16.mxu1 %v6635_v16 }
 0x168   : > { %1899 = vmatpush2.bf16.msra.mxu0 %v5125_v1 }
 0x169   : > { %1942 = vmatpush2.bf16.msra.mxu1 %v5128_v3  ;;  %1952 = vmatprep.subr.bf16.mxu0 %v5190_v15  ;;  %v6680_v3 = vld [vmem:[#allocation6_spill] sm:$0xff]  ;;  %v6690_v15 = vld [vmem:[#allocation16_spill] sm:$0xff] }
 0x16a   : > { %1995 = vmatprep.subr.bf16.mxu1 %v6635_v16 }
 0x16b   : > { %1901 = vmatmul.mubr.bf16.vlgmr.msra.gmra.mxu0 %v5035_v48 }
 0x16c   : > { %1944 = vmatmul.mubr.bf16.vlgmr.msra.gmra.mxu1 %v5035_v48  ;;  %1953 = vmatpush1.bf16.msra.mxu0 %v5203_v17  ;;  %v610_v48 = vpop.f32.mrf.mxu0  ;;  %v6691_v17 = vld [vmem:[#allocation17_spill] sm:$0xff] }
 0x16d   : > { %4028 = vmatprep.mubr.msk.bf16.mxu0 %vm556_vm1, %v5425_v4  ;;  %1996 = vmatpush1.bf16.msra.mxu1 %v5208_v18  ;;  %v6692_v18 = vld [vmem:[#allocation18_spill] sm:$0xff] }
 0x16e   : > { %4029 = vmatprep.mubr.msk.bf16.mxu1 %vm556_vm1, %v5425_v4  ;;  %1954 = vmatprep.subr.bf16.mxu0 %v5213_v19  ;;  %v6693_v19 = vld [vmem:[#allocation19_spill] sm:$0xff] }
 0x16f   : > { %1997 = vmatprep.subr.bf16.mxu1 %v6635_v16 }
 0x170   : > { %1955 = vmatpush1.bf16.msra.mxu0 %v5222_v20  ;;  %v6694_v20 = vld [vmem:[#allocation20_spill] sm:$0xff] }
 0x171   : > { %1998 = vmatpush1.bf16.msra.mxu1 %v5227_v21  ;;  %1956 = vmatprep.subr.bf16.mxu0 %v5236_v23  ;;  %v6695_v21 = vld [vmem:[#allocation21_spill] sm:$0xff]  ;;  %v6696_v23 = vld [vmem:[#allocation22_spill] sm:$0xff] }
 0x172   : > { %1999 = vmatprep.subr.bf16.mxu1 %v6635_v16 }
 0x174   : > { %1957 = vmatpush1.bf16.msra.mxu0 %v5245_v24  ;;  %v6697_v24 = vld [vmem:[#allocation23_spill] sm:$0xff] }
 0x175   : > { %2000 = vmatpush1.bf16.msra.mxu1 %v5250_v25  ;;  %1958 = vmatprep.subr.bf16.mxu0 %v5263_v26  ;;  %v6698_v25 = vld [vmem:[#allocation24_spill] sm:$0xff] }
 0x176   : > { %2001 = vmatprep.subr.bf16.mxu1 %v6635_v16 }
 0x177   : > { %v845_v49 = vpop.f32.mrf.mxu0  ;;  %v888_v50 = vpop.f32.mrf.mxu1 }
 0x178   : > { %v846_v51 = vadd.f32 %v845_v49, %v604_v44  ;;  %v889_v52 = vadd.f32 %v888_v50, %v647_v36  ;;  %1959 = vmatpush1.bf16.msra.mxu0 %v5270_v27  ;;  %v6708_v44 = vld [vmem:[#allocation34_spill] sm:$0xff]  ;;  %v6711_v49 = vld [vmem:[#allocation37_spill] sm:$0xff] }
 0x179   : > { %2002 = vmatpush1.bf16.msra.mxu1 %v5275_v28  ;;  %v5913_v53 = vpop.f32.mrf.mxu0  ;;  %v890_v54 = vpop.f32.mrf.mxu1  ;;  %1960 = vmatprep.subr.bf16.mxu0 %v5282_v29  ;;  %v6712_v50 = vld [vmem:[#allocation38_spill] sm:$0xff] }
 0x17a   : > { %2003 = vmatprep.subr.bf16.mxu1 %v6635_v16  ;;  %v6715_v54 = vld [vmem:[#allocation41_spill] sm:$0xff] }
 0x17b   : > { %v849_v56 = vpop.f32.mrf.mxu0  ;;  %v891_v58 = vpop.f32.mrf.mxu1 }
 0x17c   : > { %v850_v60 = vadd.f32 %v849_v56, %v608_v47  ;;  %v892_v62 = vadd.f32 %v891_v58, %v650_v41  ;;  %1961 = vmatpush1.bf16.msra.mxu0 %v5289_v30  ;;  %v6699_v30 = vld [vmem:[#allocation25_spill] sm:$0xff]  ;;  %v6706_v41 = vld [vmem:[#allocation32_spill] sm:$0xff]  ;;  %v6709_v47 = vld [vmem:[#allocation35_spill] sm:$0xff]  ;;  %v2147_v58 = vpop.permute.xlu1 %2146 }
 0x17d   : > { %2004 = vmatpush1.bf16.msra.mxu1 %v5294_v31  ;;  %v851_v63 = vpop.f32.mrf.mxu0  ;;  %v893_v0 = vpop.f32.mrf.mxu1  ;;  %1962 = vmatprep.subr.bf16.mxu0 %v5301_v32  ;;  %v6700_v31 = vld [vmem:[#allocation26_spill] sm:$0xff] }
 0x17e   : > { %v852_v1 = vadd.f32 %v851_v63, %v610_v48  ;;  %2005 = vmatprep.subr.bf16.mxu1 %v6635_v16  ;;  %v6710_v48 = vld [vmem:[#allocation36_spill] sm:$0xff]  ;;  %v6716_v56 = vld [vmem:[#allocation42_spill] sm:$0xff]  ;;  %v6719_v63 = vld [vmem:[#allocation45_spill] sm:$0xff] }
 0x17f   : > { %v6720_v0 = vld [vmem:[#allocation46_spill] sm:$0xff] }
 0x180   : > { %1963 = vmatpush1.bf16.msra.mxu0 %v5308_v33 }
 0x181   : > { %2006 = vmatpush1.bf16.msra.mxu1 %v5313_v34  ;;  %1964 = vmatprep.subr.bf16.mxu0 %v6680_v3  ;;  %v6701_v34 = vld [vmem:[#allocation27_spill] sm:$0xff]  ;;  %v6722_v3 = vld [vmem:[#allocation48_spill] sm:$0xff] }
 0x182   : > { %2007 = vmatprep.subr.bf16.mxu1 %v6635_v16 }
 0x184   : > { %1965 = vmatpush1.bf16.msra.mxu0 %v6681_v6  ;;  %v6724_v6 = vld [vmem:[#allocation50_spill] sm:$0xff] }
 0x185   : > { %2008 = vmatpush1.bf16.msra.mxu1 %v6682_v7  ;;  %1966 = vmatprep.subr.bf16.mxu0 %v6683_v8  ;;  %v6725_v7 = vld [vmem:[#allocation51_spill] sm:$0xff] }
 0x186   : > { %2009 = vmatprep.subr.bf16.mxu1 %v6635_v16 }
 0x188   : > { %1967 = vmatpush1.bf16.msra.mxu0 %v6684_v9 }
 0x189   : > { %2010 = vmatpush1.bf16.msra.mxu1 %v6685_v10  ;;  %4027 = vmatprep.subr.msk.bf16.mxu0 %vm560_vm0, %v6686_v11  ;;  %v6726_v11 = vld [vmem:[#allocation52_spill] sm:$0xff] }
 0x18a   : > { %2025 = vmatprep.subr.bf16.mxu1 %v6635_v16 }
 0x18c   : > { %1983 = vmatpush2.bf16.msra.mxu0 %v6687_v12  ;;  %v6727_v12 = vld [vmem:[#allocation53_spill] sm:$0xff] }
 0x18d   : > { %2026 = vmatpush2.bf16.msra.mxu1 %v6688_v13  ;;  %2042 = vmatprep.subr.bf16.mxu0 %v6689_v14 }
 0x18e   : > { %2085 = vmatprep.subr.bf16.mxu1 %v6635_v16 }
 0x18f   : > { %1985 = vmatmul.mubr.bf16.vlgmr.msra.gmra.mxu0 %v5591_v38 }
 0x190   : > { %2028 = vmatmul.mubr.bf16.vlgmr.msra.gmra.mxu1 %v5591_v38  ;;  %2043 = vmatpush1.bf16.msra.mxu0 %v6690_v15  ;;  %v6728_v15 = vld [vmem:[#allocation54_spill] sm:$0xff] }
 0x191   : > { %2086 = vmatpush1.bf16.msra.mxu1 %v6691_v17  ;;  %2044 = vmatprep.subr.bf16.mxu0 %v6692_v18 }
 0x192   : > { %2087 = vmatprep.subr.bf16.mxu1 %v6635_v16  ;;  %4031 = vmatprep.mubr.msk.bf16.mxu0 %vm556_vm1, %v5593_v37 }
 0x193   : > { %4032 = vmatprep.mubr.msk.bf16.mxu1 %vm556_vm1, %v5593_v37 }
 0x194   : > { %2045 = vmatpush1.bf16.msra.mxu0 %v6693_v19 }
 0x195   : > { %2088 = vmatpush1.bf16.msra.mxu1 %v6694_v20  ;;  %2046 = vmatprep.subr.bf16.mxu0 %v6695_v21  ;;  %v6729_v21 = vld [vmem:[#allocation55_spill] sm:$0xff] }
 0x196   : > { %2089 = vmatprep.subr.bf16.mxu1 %v6635_v16 }
 0x198   : > { %2047 = vmatpush1.bf16.msra.mxu0 %v6696_v23  ;;  %v6730_v23 = vld [vmem:[#allocation56_spill] sm:$0xff] }
 0x199   : > { %2090 = vmatpush1.bf16.msra.mxu1 %v6697_v24  ;;  %2048 = vmatprep.subr.bf16.mxu0 %v6698_v25 }
 0x19a   : > { %2091 = vmatprep.subr.bf16.mxu1 %v6635_v16 }
 0x19b   : > { %v1126_v26 = vpop.f32.mrf.mxu0  ;;  %v1169_v27 = vpop.f32.mrf.mxu1 }
 0x19c   : > { %v1176_v28 = vadd.f32 %v1126_v26, %v846_v51  ;;  %v5956_v29 = vadd.f32 %v1169_v27, %v889_v52  ;;  %2049 = vmatpush1.bf16.msra.mxu0 %v6699_v30  ;;  %v6713_v51 = vld [vmem:[#allocation39_spill] sm:$0xff]  ;;  %v6714_v52 = vld [vmem:[#allocation40_spill] sm:$0xff]  ;;  %v6731_v26 = vld [vmem:[#allocation57_spill] sm:$0xff] }
 0x19d   : > { %2092 = vmatpush1.bf16.msra.mxu1 %v6700_v31  ;;  %v5960_v32 = vpop.f32.mrf.mxu0  ;;  %v1171_v33 = vpop.f32.mrf.mxu1  ;;  %2050 = vmatprep.subr.bf16.mxu0 %v6701_v34  ;;  %v6733_v30 = vld [vmem:[#allocation59_spill] sm:$0xff]  ;;  %v6734_v31 = vld [vmem:[#allocation60_spill] sm:$0xff]  ;;  %v6736_v34 = vld [vmem:[#allocation62_spill] sm:$0xff] }
 0x19e   : > { %2093 = vmatprep.subr.bf16.mxu1 %v6635_v16  ;;  %v6735_v33 = vld [vmem:[#allocation61_spill] sm:$0xff] }
 0x19f   : > { %v1130_v46 = vpop.f32.mrf.mxu0  ;;  %v1172_v4 = vpop.f32.mrf.mxu1 }
 0x1a0   : > { %v1179_v38 = vadd.f32 %v1130_v46, %v850_v60  ;;  %v1181_v37 = vadd.f32 %v1172_v4, %v892_v62  ;;  %2051 = vmatpush1.bf16.msra.mxu0 %v6702_v59  ;;  %v6717_v60 = vld [vmem:[#allocation43_spill] sm:$0xff]  ;;  %v6718_v62 = vld [vmem:[#allocation44_spill] sm:$0xff] }
 0x1a1   : > { %2094 = vmatpush1.bf16.msra.mxu1 %v6703_v40  ;;  %v1132_v22 = vpop.f32.mrf.mxu0  ;;  %v1174_v57 = vpop.f32.mrf.mxu1  ;;  %2052 = vmatprep.subr.bf16.mxu0 %v6704_v55  ;;  %v6737_v46 = vld [vmem:[#allocation63_spill] sm:$0xff]  ;;  %v6738_v4 = vld [vmem:[#allocation64_spill] sm:$0xff] }
 0x1a2   : > { %v1180_v36 = vadd.f32 %v1132_v22, %v852_v1  ;;  %2095 = vmatprep.subr.bf16.mxu1 %v6635_v16  ;;  %v6721_v1 = vld [vmem:[#allocation47_spill] sm:$0xff] }
 0x1a4   : > { %2053 = vmatpush1.bf16.msra.mxu0 %v6705_v39 }
 0x1a5   : > { %2096 = vmatpush1.bf16.msra.mxu1 %v6706_v41  ;;  %2054 = vmatprep.subr.bf16.mxu0 %v6707_v43 }
 0x1a6   : > { %2097 = vmatprep.subr.bf16.mxu1 %v6635_v16 }
 0x1a8   : > { %2055 = vmatpush1.bf16.msra.mxu0 %v6708_v44 }
 0x1a9   : > { %2098 = vmatpush1.bf16.msra.mxu1 %v6709_v47  ;;  %2056 = vmatprep.subr.bf16.mxu0 %v6710_v48 }
 0x1aa   : > { %2099 = vmatprep.subr.bf16.mxu1 %v6635_v16 }
 0x1ac   : > { %2057 = vmatpush1.bf16.msra.mxu0 %v6711_v49 }
 0x1ad   : > { %2100 = vmatpush1.bf16.msra.mxu1 %v6712_v50  ;;  %4030 = vmatprep.subr.msk.bf16.mxu0 %vm560_vm0, %v6713_v51 }
 0x1ae   : > { %2115 = vmatprep.subr.bf16.mxu1 %v6635_v16 }
 0x1b0   : > { %2073 = vmatpush2.bf16.msra.mxu0 %v6714_v52  ;;  %v4595_v52 = vld [vmem:[%s6550_s3 + $0x38] sm:$0xff]  }
 0x1b1   : > { %2116 = vmatpush2.bf16.msra.mxu1 %v6715_v54  ;;  %2153 = vmatprep.subr.bf16.mxu0 %v6716_v56  ;;  %v4596_v54 = vld [vmem:[%s6550_s3 + $0x80] sm:$0xff]  }
 0x1b2   : > { %2196 = vmatprep.subr.bf16.mxu1 %v6635_v16 }
 0x1b3   : > { %2075 = vmatmul.mubr.bf16.vlgmr.msra.gmra.mxu0 %v5749_v35 }
 0x1b4   : > { %2118 = vmatmul.mubr.bf16.vlgmr.msra.gmra.mxu1 %v5749_v35  ;;  %2154 = vmatpush1.bf16.msra.mxu0 %v6717_v60  ;;  %v6723_v35 = vld [vmem:[#allocation49_spill] sm:$0xff]  ;;  %v4598_v60 = vld [vmem:[%s6550_s3 + $0x78] sm:$0xff]  }
 0x1b5   : > { %2197 = vmatpush1.bf16.msra.mxu1 %v6718_v62  ;;  %2155 = vmatprep.subr.bf16.mxu0 %v6719_v63  ;;  %v4599_v63 = vld [vmem:[%s6550_s3 + $0x28] sm:$0xff]  }
 0x1b6   : > { %2198 = vmatprep.subr.bf16.mxu1 %v6635_v16  ;;  %4036 = vmatprep.mubr.msk.bf16.mxu0 %vm556_vm1, %v2147_v58 }
 0x1b7   : > { %4037 = vmatprep.mubr.msk.bf16.mxu1 %vm556_vm1, %v2147_v58 }
 0x1b8   : > { %2156 = vmatpush1.bf16.msra.mxu0 %v6720_v0  ;;  %v4600_v0 = vld [vmem:[%s6550_s3 + $0x70] sm:$0xff]  }
 0x1b9   : > { %2199 = vmatpush1.bf16.msra.mxu1 %v6721_v1  ;;  %2157 = vmatprep.subr.bf16.mxu0 %v6722_v3 }
 0x1ba   : > { %2200 = vmatprep.subr.bf16.mxu1 %v6635_v16 }
 0x1bc   : > { %2158 = vmatpush1.bf16.msra.mxu0 %v6723_v35 }
 0x1bd   : > { %2201 = vmatpush1.bf16.msra.mxu1 %v6724_v6  ;;  %2159 = vmatprep.subr.bf16.mxu0 %v6725_v7 }
 0x1be   : > { %2202 = vmatprep.subr.bf16.mxu1 %v6635_v16 }
 0x1bf   : > { %v1419_v8 = vpop.f32.mrf.mxu0  ;;  %v1462_v9 = vpop.f32.mrf.mxu1 }
 0x1c0   : > { %v1469_v10 = vadd.f32 %v1419_v8, %v1176_v28  ;;  %2160 = vmatpush1.bf16.msra.mxu0 %v6726_v11  ;;  %v6732_v28 = vld [vmem:[#allocation58_spill] sm:$0xff]  ;;  %v1471_v59 = vadd.f32 %v1462_v9, %v5956_v29 }
 0x1c1   : > { %2203 = vmatpush1.bf16.msra.mxu1 %v6727_v12  ;;  %v1421_v13 = vpop.f32.mrf.mxu0  ;;  %v1464_v14 = vpop.f32.mrf.mxu1  ;;  %2161 = vmatprep.subr.bf16.mxu0 %v6728_v15 }
 0x1c2   : > { %2204 = vmatprep.subr.bf16.mxu1 %v6635_v16 }
 0x1c3   : > { %v1423_v17 = vpop.f32.mrf.mxu0  ;;  %v1465_v18 = vpop.f32.mrf.mxu1 }
 0x1c4   : > { %v1472_v19 = vadd.f32 %v1423_v17, %v1179_v38  ;;  %v1474_v20 = vadd.f32 %v1465_v18, %v1181_v37  ;;  %2162 = vmatpush1.bf16.msra.mxu0 %v6729_v21  ;;  %v2145_v38 = vpop.permute.xlu0 %2144 }
 0x1c5   : > { %2205 = vmatpush1.bf16.msra.mxu1 %v6730_v23  ;;  %v1425_v24 = vpop.f32.mrf.mxu0  ;;  %v1467_v25 = vpop.f32.mrf.mxu1  ;;  %2163 = vmatprep.subr.bf16.mxu0 %v6731_v26  ;;  %v2148_v37 = vsel %vm417_vm2, %v2145_v38, %v2147_v58  ;;  %v4597_v58 = vld [vmem:[%s6550_s3 + $0x30] sm:$0xff]  }
 0x1c6   : > { %v6008_v27 = vadd.f32 %v1425_v24, %v1180_v36  ;;  %2206 = vmatprep.subr.bf16.mxu1 %v6635_v16 }
 0x1c8   : > { %2164 = vmatpush1.bf16.msra.mxu0 %v6732_v28 }
 0x1c9   : > { %2207 = vmatpush1.bf16.msra.mxu1 %v6733_v30  ;;  %2165 = vmatprep.subr.bf16.mxu0 %v6734_v31 }
 0x1ca   : > { %2208 = vmatprep.subr.bf16.mxu1 %v6635_v16 }
 0x1cc   : > { %2166 = vmatpush1.bf16.msra.mxu0 %v6735_v33 }
 0x1cd   : > { %2209 = vmatpush1.bf16.msra.mxu1 %v6736_v34  ;;  %2167 = vmatprep.subr.bf16.mxu0 %v6737_v46 }
 0x1ce   : > { %2210 = vmatprep.subr.bf16.mxu1 %v6635_v16 }
 0x1d0   : > { %2168 = vmatpush1.bf16.msra.mxu0 %v5723_v2  ;;  %v848_v2 = vadd.f32 %v5913_v53, %v5894_v45 }
 0x1d1   : > { %2211 = vmatpush1.bf16.msra.mxu1 %v6738_v4  ;;  %4035 = vmatprep.subr.msk.bf16.mxu0 %vm560_vm0, %v5732_v61 }
 0x1d2   : > { %2226 = vmatprep.subr.bf16.mxu1 %v6635_v16  ;;  %v1177_v61 = vadd.f32 %v5960_v32, %v848_v2 }
 0x1d4   : > { %2184 = vmatpush2.bf16.msra.mxu0 %v5744_v42  ;;  %v1470_v42 = vadd.f32 %v1421_v13, %v1177_v61 }
 0x1d5   : > { %2227 = vmatpush2.bf16.msra.mxu1 %v5747_v5  ;;  %2422 = vmatprep.subr.bf16.mxu0 %v6635_v16 }
 0x1d6   : > { %2519 = vmatprep.subr.bf16.mxu1 %v6635_v16 }
 0x1d7   : > { %2186 = vmatmul.mubr.bf16.vlgmr.msra.gmra.mxu0 %v2148_v37 }
 0x1d8   : > { %2229 = vmatmul.mubr.bf16.vlgmr.msra.gmra.mxu1 %v2148_v37  ;;  %2423 = vmatpush1.bf16.msra.mxu0 %v4596_v54 }
 0x1d9   : > { %2520 = vmatpush1.bf16.msra.mxu1 %v4595_v52  ;;  %2424 = vmatprep.subr.bf16.mxu0 %v6635_v16  ;;  %v4607_v52 = vld [vmem:[%s6550_s3 + $0x8] sm:$0xff]  }
 0x1da   : > { %2521 = vmatprep.subr.bf16.mxu1 %v6635_v16 }
 0x1dc   : > { %2425 = vmatpush1.bf16.msra.mxu0 %v4598_v60  ;;  %v4608_v60 = vld [vmem:[%s6550_s3 + $0x50] sm:$0xff]  }
 0x1dd   : > { %2522 = vmatpush1.bf16.msra.mxu1 %v4597_v58  ;;  %2426 = vmatprep.subr.bf16.mxu0 %v6635_v16 }
 0x1de   : > { %2523 = vmatprep.subr.bf16.mxu1 %v6635_v16 }
 0x1e0   : > { %2427 = vmatpush1.bf16.msra.mxu0 %v4600_v0 }
 0x1e1   : > { %2524 = vmatpush1.bf16.msra.mxu1 %v4599_v63  ;;  %2428 = vmatprep.subr.bf16.mxu0 %v6635_v16 }
 0x1e2   : > { %2525 = vmatprep.subr.bf16.mxu1 %v6635_v16 }
 0x1e3   : > { %v1705_v40 = vpop.f32.mrf.mxu0  ;;  %v1748_v22 = vpop.f32.mrf.mxu1 }
 0x1e4   : > { %v6033_v57 = vadd.f32 %v1705_v40, %v1469_v10  ;;  %v1757_v55 = vadd.f32 %v1748_v22, %v1471_v59  ;;  %v4601_v59 = vld [vmem:[%s6550_s3 + $0x20] sm:$0xff]   ;;  %v4602_v40 = vld [vmem:[%s6550_s3 + $0x68] sm:$0xff]   ;;  %v4603_v22 = vld [vmem:[%s6550_s3 + $0x18] sm:$0xff]  }
 0x1e5   : > { %v1707_v5 = vpop.f32.mrf.mxu0  ;;  %v1750_v36 = vpop.f32.mrf.mxu1  ;;  %2526 = vmatpush1.bf16.msra.mxu1 %v4601_v59  ;;  %2429 = vmatpush1.bf16.msra.mxu0 %v4602_v40 }
 0x1e6   : > { %v6035_v39 = vadd.f32 %v1707_v5, %v1470_v42  ;;  %1767 = vrot.lane.b32.xlu1 %v1757_v55, %s4791_s28  ;;  %2527 = vmatprep.subr.bf16.mxu1 %v6635_v16  ;;  %v4604_v42 = vld [vmem:[%s6550_s3 + $0x60] sm:$0xff]   ;;  %v4605_v36 = vld [vmem:[%s6550_s3 + $0x10] sm:$0xff]  }
 0x1e7   : > { %v1709_v41 = vpop.f32.mrf.mxu0  ;;  %v1751_v43 = vpop.f32.mrf.mxu1  ;;  %2430 = vmatprep.subr.bf16.mxu0 %v6635_v16 }
 0x1e8   : > { %v6038_v45 = vadd.f32 %v1709_v41, %v1472_v19  ;;  %v6040_v53 = vadd.f32 %v1751_v43, %v1474_v20  ;;  %1765 = vrot.lane.b32.xlu0 %v6035_v39, %s4791_s28 }
 0x1e9   : > { %v1753_v29 = vpop.f32.mrf.mxu1  ;;  %v6044_v49 = vpop.f32.mrf.mxu0  ;;  %2528 = vmatpush1.bf16.msra.mxu1 %v4603_v22  ;;  %2431 = vmatpush1.bf16.msra.mxu0 %v4604_v42 }
 0x1ea   : > { %2529 = vmatprep.subr.bf16.mxu1 %v6635_v16  ;;  %2432 = vmatprep.subr.bf16.mxu0 %v6635_v16 }
 0x1ed   : > { %2530 = vmatpush1.bf16.msra.mxu1 %v4605_v36 }
 0x1ee   : > { %2531 = vmatprep.subr.bf16.mxu1 %v6635_v16 }
 0x1f1   : > { %2532 = vmatpush1.bf16.msra.mxu1 %v4607_v52 }
 0x1f2   : > { %2533 = vmatprep.subr.bf16.mxu1 %v6635_v16 }
 0x207   : > { %v1861_v32 = vpop.f32.mrf.mxu1  ;;  %v1818_v50 = vpop.f32.mrf.mxu0 }
 0x209   : > { %v1863_v44 = vpop.f32.mrf.mxu1  ;;  %v6046_v51 = vpop.f32.mrf.mxu0 }
 0x20b   : > { %v1864_v47 = vpop.f32.mrf.mxu1  ;;  %v1822_v56 = vpop.f32.mrf.mxu0 }
 0x20d   : > { %v1866_v48 = vpop.f32.mrf.mxu1  ;;  %v6062_v62 = vpop.f32.mrf.mxu0 }
 0x22b   : > { %v1902_v1 = vpop.f32.mrf.mxu0 }
 0x22c   : > { %v1903_v3 = vadd.f32 %v1902_v1, %v1818_v50  ;;  %v1945_v35 = vpop.f32.mrf.mxu1 }
 0x22d   : > { %v1946_v6 = vadd.f32 %v1945_v35, %v1861_v32  ;;  %v1904_v7 = vpop.f32.mrf.mxu0  ;;  %v4606_v32 = vld [vmem:[%s6550_s3 + $0x58] sm:$0xff]   ;;  %v6118_v35 = vadd.f32 %v6044_v49, %v6008_v27  ;;  %v4611_v49 = vld [vmem:[%s6550_s3 + $0x40] sm:$0xff]  }
 0x22e   : > { %v1947_v8 = vpop.f32.mrf.mxu1  ;;  %v1905_v55 = vadd.f32 %v1904_v7, %v6046_v51  ;;  %2433 = vmatpush1.bf16.msra.mxu0 %v4606_v32 }
 0x22f   : > { %v1906_v9 = vpop.f32.mrf.mxu0  ;;  %2434 = vmatprep.subr.bf16.mxu0 %v6635_v16 }
 0x230   : > { %v1907_v10 = vadd.f32 %v1906_v9, %v1822_v56  ;;  %v1948_v11 = vpop.f32.mrf.mxu1  ;;  %v4610_v9 = vld [vmem:[%s6550_s3 + $0x48] sm:$0xff]  }
 0x231   : > { %v1949_v12 = vadd.f32 %v1948_v11, %v1864_v47  ;;  %v1908_v14 = vpop.f32.mrf.mxu0 }
 0x232   : > { %v1950_v13 = vpop.f32.mrf.mxu1  ;;  %v1909_v63 = vadd.f32 %v1908_v14, %v6062_v62  ;;  %2435 = vmatpush1.bf16.msra.mxu0 %v4608_v60  ;;  %v4615_v60 = vld [vmem:[%s6550_s3 + $0x110] sm:$0xff]  }
 0x233   : > { %2436 = vmatprep.subr.bf16.mxu0 %v6635_v16 }
 0x236   : > { %2437 = vmatpush1.bf16.msra.mxu0 %v4610_v9  ;;  %v4620_v9 = vld [vmem:[%s6550_s3 + $0x100] sm:$0xff]  }
 0x237   : > { %2452 = vmatprep.subr.bf16.mxu0 %v6635_v16 }
 0x24f   : > { %v1986_v15 = vpop.f32.mrf.mxu0 }
 0x250   : > { %v2036_v17 = vadd.f32 %v1986_v15, %v1903_v3  ;;  %v2029_v18 = vpop.f32.mrf.mxu1  ;;  %v4609_v3 = vld [vmem:[%s6550_s3] sm:$0xff]  }
 0x251   : > { %v2038_v19 = vadd.f32 %v2029_v18, %v1946_v6  ;;  %v1988_v20 = vpop.f32.mrf.mxu0  ;;  %2534 = vmatpush1.bf16.msra.mxu1 %v4609_v3  ;;  %v331_v18 = vld [vmem:[%s6549_s2] sm:$0x3]  ;;  %v4616_v3 = vld [vmem:[%s6550_s3 + $0xc8] sm:$0xff]  }
 0x252   : > { %v2031_v21 = vpop.f32.mrf.mxu1  ;;  %v2037_v41 = vadd.f32 %v1988_v20, %v1905_v55  ;;  %2549 = vmatprep.subr.bf16.mxu1 %v6635_v16 }
 0x253   : > { %v1990_v23 = vpop.f32.mrf.mxu0 }
 0x254   : > { %v2039_v24 = vadd.f32 %v1990_v23, %v1907_v10  ;;  %v2032_v25 = vpop.f32.mrf.mxu1 }
 0x255   : > { %v2041_v26 = vadd.f32 %v2032_v25, %v1949_v12  ;;  %v1992_v30 = vpop.f32.mrf.mxu0  ;;  %2550 = vmatpush2.bf16.msra.mxu1 %v4611_v49  ;;  %v2270_v12 = vlaneseq  ;;  %v4623_v49 = vld [vmem:[%s6550_s3 + $0xb0] sm:$0xff]  }
 0x256   : > { %v2034_v28 = vpop.f32.mrf.mxu1  ;;  %v2040_v6 = vadd.f32 %v1992_v30, %v1909_v63  ;;  %2770 = vmatprep.subr.bf16.mxu1 %v6635_v16 }
 0x257   : > { %v2271_v13 = vshrl.u32 %v2270_v12, 7  ;;  %v4626_v12 = vld [vmem:[%s6550_s3 + $0xe8] sm:$0xff]  }
 0x258   : > { %v1768_v14 = vpop.permute.xlu1 %1767 }
 0x259   : > { %v1781_v23 = vmax.f32 %v6035_v39, %v1768_v14 }
 0x25a   : > { %v1766_v15 = vpop.permute.xlu0 %1765 }
 0x25b   : > { %v1774_v20 = vsel %vm1773_vm3, %v1766_v15, %v1768_v14  ;;  %v4628_v14 = vld [vmem:[%s6550_s3 + $0xe0] sm:$0xff]   ;;  %v4629_v15 = vld [vmem:[%s6550_s3 + $0x98] sm:$0xff]  }
 0x25c   : > { %v1780_v30 = vmax.f32 %v6033_v57, %v1774_v20  ;;  %v4631_v20 = vld [vmem:[%s6550_s3 + $0x90] sm:$0xff]  }
 0x273   : > { %v2076_v31 = vpop.f32.mrf.mxu0 }
 0x274   : > { %v2126_v33 = vadd.f32 %v2076_v31, %v2036_v17  ;;  %v2119_v34 = vpop.f32.mrf.mxu1  ;;  %v2276_v17 = vsub.s32 1, %v2271_v13 }
 0x275   : > { %v2078_v46 = vpop.f32.mrf.mxu0  ;;  %v2128_v43 = vadd.f32 %v2119_v34, %v2038_v19  ;;  %v2272_v19 = vsub.s32 0, %v2271_v13  ;;  %v4627_v13 = vld [vmem:[%s6550_s3 + $0xa0] sm:$0xff]  }
 0x276   : > { %v2121_v4 = vpop.f32.mrf.mxu1  ;;  %v2127_v44 = vadd.f32 %v2078_v46, %v2037_v41 }
 0x277   : > { %v2080_v38 = vpop.f32.mrf.mxu0 }
 0x278   : > { %v2129_v37 = vadd.f32 %v2080_v38, %v2039_v24  ;;  %v2122_v2 = vpop.f32.mrf.mxu1  ;;  %v2277_v24 = vrot.slane %v331_v18, %v2276_v17 }
 0x279   : > { %v2082_v5 = vpop.f32.mrf.mxu0  ;;  %v2131_v62 = vadd.f32 %v2122_v2, %v2041_v26 }
 0x27a   : > { %v2124_v61 = vpop.f32.mrf.mxu1  ;;  %v2130_v10 = vadd.f32 %v2082_v5, %v2040_v6 }
 0x297   : > { %v2187_v29 = vpop.f32.mrf.mxu0 }
 0x298   : > { %v6097_v47 = vadd.f32 %v2187_v29, %v2126_v33  ;;  %v2230_v48 = vpop.f32.mrf.mxu1  ;;  %v2273_v33 = vrot.slane %v331_v18, %v2272_v19  ;;  %v4630_v18 = vld [vmem:[%s6550_s3 + $0xd8] sm:$0xff]  }
 0x299   : > { %v2239_v50 = vadd.f32 %v2230_v48, %v2128_v43  ;;  %v2189_v51 = vpop.f32.mrf.mxu0 }
 0x29a   : > { %v2238_v54 = vadd.f32 %v2189_v51, %v2127_v44  ;;  %v2232_v56 = vpop.f32.mrf.mxu1 }
 0x29b   : > { %2249 = vrot.lane.b32.xlu1 %v2239_v50, %s4791_s28  ;;  %v2191_v58 = vpop.f32.mrf.mxu0  ;;  %v2311_v50 = vld [vmem:[#allocation2 + $0x8] sm:$0x11] }
 0x29c   : > { %v6109_v0 = vadd.f32 %v2191_v58, %v2129_v37  ;;  %v2233_v1 = vpop.f32.mrf.mxu1  ;;  %2247 = vrot.lane.b32.xlu0 %v2238_v54, %s4791_s28 }
 0x29d   : > { %v2193_v8 = vpop.f32.mrf.mxu0  ;;  %v2242_v27 = vadd.f32 %v2233_v1, %v2131_v62  ;;  %v4618_v62 = vld [vmem:[%s6550_s3 + $0x108] sm:$0xff]  }
 0x29e   : > { %v2235_v7 = vpop.f32.mrf.mxu1  ;;  %v2241_v11 = vadd.f32 %v2193_v8, %v2130_v10  ;;  %v4619_v8 = vld [vmem:[%s6550_s3 + $0xc0] sm:$0xff]   ;;  %v4621_v10 = vld [vmem:[%s6550_s3 + $0xb8] sm:$0xff]  }
 0x29f   : > { %1771 = vrot.lane.b32.xlu1 %v6040_v53, %s4791_s28  ;;  %v4612_v53 = vld [vmem:[%s6550_s3 + $0x88] sm:$0xff]  }
 0x2a0   : > { %1769 = vrot.lane.b32.xlu0 %v6118_v35, %s4791_s28  ;;  %2453 = vmatpush2.bf16.msra.mxu0 %v4612_v53  ;;  %v4625_v53 = vld [vmem:[%s6550_s3 + $0xa8] sm:$0xff]  }
 0x2a1   : > { %2644 = vmatprep.subr.bf16.mxu0 %v6635_v16 }
 0x2a3   : > { %2253 = vrot.lane.b32.xlu1 %v2242_v27, %s4791_s28  ;;  %v4622_v27 = vld [vmem:[%s6550_s3 + $0xf8] sm:$0xff]  }
 0x2a4   : > { %2251 = vrot.lane.b32.xlu0 %v2241_v11, %s4791_s28 }
 0x30d   : > { %v2250_v21 = vpop.permute.xlu1 %2249 }
 0x30e   : > { %v2262_v25 = vmax.f32 %v2238_v54, %v2250_v21  ;;  %v2248_v26 = vpop.permute.xlu0 %2247 }
 0x30f   : > { %v2255_v28 = vsel %vm1773_vm3, %v2248_v26, %v2250_v21 }
 0x310   : > { %v2266_v31 = vmax.f32 %v1781_v23, %v2262_v25  ;;  %v2261_v34 = vmax.f32 %v6097_v47, %v2255_v28  ;;  %v4632_v23 = vld [vmem:[%s6550_s3 + $0x118] sm:$0xff]   ;;  %v4633_v25 = vld [vmem:[%s6550_s3 + $0xd0] sm:$0xff]   ;;  %v4635_v28 = vld [vmem:[%s6550_s3 + $0x1a0] sm:$0xff]  }
 0x311   : > { %v1772_v46 = vpop.permute.xlu1 %1771 }
 0x312   : > { %v2281_v4 = vadd.f32 %v2277_v24, %v2266_v31  ;;  %v2265_v38 = vmax.f32 %v1780_v30, %v2261_v34  ;;  %v1770_v37 = vpop.permute.xlu0 %1769  ;;  %v1783_v22 = vmax.f32 %v6118_v35, %v1772_v46 }
 0x313   : > { %v1775_v39 = vsel %vm1773_vm3, %v1770_v37, %v1772_v46  ;;  %v4640_v37 = vld [vmem:[%s6550_s3 + $0x190] sm:$0xff]  }
 0x314   : > { %v2280_v2 = vadd.f32 %v2273_v33, %v2265_v38  ;;  %v2285_v59 = vmax.f32 %v2281_v4, 0.0  ;;  %v1782_v36 = vmax.f32 %v6038_v45, %v1775_v39  ;;  %v4638_v4 = vld [vmem:[%s6550_s3 + $0x198] sm:$0xff]   ;;  %v4639_v38 = vld [vmem:[%s6550_s3 + $0x150] sm:$0xff]   ;;  %v4642_v39 = vld [vmem:[%s6550_s3 + $0x188] sm:$0xff]  }
 0x315   : > { %v2254_v61 = vpop.permute.xlu1 %2253 }
 0x316   : > { %v2284_v40 = vmax.f32 %v2280_v2, 0.0  ;;  %v2264_v42 = vmax.f32 %v2241_v11, %v2254_v61  ;;  %v2252_v57 = vpop.permute.xlu0 %2251  ;;  %v4624_v11 = vld [vmem:[%s6550_s3 + $0xf0] sm:$0xff]   ;;  %v4641_v2 = vld [vmem:[%s6550_s3 + $0x148] sm:$0xff]  }
 0x317   : > { %v2256_v55 = vsel %vm1773_vm3, %v2252_v57, %v2254_v61  ;;  %v4643_v61 = vld [vmem:[%s6550_s3 + $0x140] sm:$0xff]   ;;  %v4648_v57 = vld [vmem:[%s6550_s3 + $0x170] sm:$0xff]  }
 0x318   : > { %v4303_v5 = vpack.c.bf16 %v2285_v59, %v2284_v40  ;;  %v2268_v41 = vmax.f32 %v1783_v22, %v2264_v42  ;;  %v2263_v43 = vmax.f32 %v6109_v0, %v2256_v55  ;;  %v4644_v59 = vld [vmem:[%s6550_s3 + $0x180] sm:$0xff]   ;;  %v4645_v40 = vld [vmem:[%s6550_s3 + $0x138] sm:$0xff]   ;;  %v4647_v42 = vld [vmem:[%s6550_s3 + $0x130] sm:$0xff]  }
 0x319   : > { %v4646_v22 = vld [vmem:[%s6550_s3 + $0x178] sm:$0xff]   ;;  %v4649_v55 = vld [vmem:[%s6550_s3 + $0x128] sm:$0xff]  }
 0x31a   : > { %2303 = vst.msk [vmem:[#allocation2] sm:$0xff] %vm2302_vm6, %v4303_v5  ;;  %v2283_v29 = vadd.f32 %v2277_v24, %v2268_v41  ;;  %v2267_v32 = vmax.f32 %v1782_v36, %v2263_v43  ;;  %v4650_v36 = vld [vmem:[%s6550_s3 + $0x168] sm:$0xff]   ;;  %v4651_v43 = vld [vmem:[%s6550_s3 + $0x120] sm:$0xff]  }
 0x31c   : > { %v2282_v44 = vadd.f32 %v2273_v33, %v2267_v32  ;;  %v2287_v47 = vmax.f32 %v2283_v29, 0.0  ;;  %v4637_v33 = vld [vmem:[%s6550_s3 + $0x158] sm:$0xff]   ;;  %v4652_v32 = vld [vmem:[%s6550_s3 + $0x1a8] sm:$0xff]  }
 0x31e   : > { %v2286_v48 = vmax.f32 %v2282_v44, 0.0 }
 0x320   : > { %v4304_v51 = vpack.c.bf16 %v2287_v47, %v2286_v48  ;;  %v4653_v47 = vld [vmem:[%s6550_s3 + $0x160] sm:$0xff]  }
 0x321   : > { %v2314_v52 = vld [vmem:[#allocation2] sm:$0x11]  ;;  %v2559_v54 = vld [vmem:[#allocation2] sm:$0x22]  ;;  %v6211_v17 = vld [vmem:[#allocation2] sm:$0x44] }
 0x322   : > { %v2312_v45 = vsel %vm2310_vm13, %v4304_v51, %v2311_v50  ;;  %v4059_v56 = vcombine.high %v2314_v52, %v2314_v52  ;;  %v4058_v58 = vcombine.low %v2314_v52, %v2314_v52  ;;  %v4099_v63 = vcombine.high %v2559_v54, %v2559_v54  ;;  %v6289_v5 = vld [vmem:[#allocation2] sm:$0x88]  ;;  %v4655_v50 = vld [vmem:[%s6550_s3 + $0x230] sm:$0xff]  }
 0x323   : > { %2313 = vst [vmem:[#allocation2 + $0x8] sm:$0x11] %v2312_v45  ;;  %v4098_v19 = vcombine.low %v2559_v54, %v2559_v54  ;;  %v4157_v21 = vcombine.high %v6211_v17, %v6211_v17  ;;  %v4156_v41 = vcombine.low %v6211_v17, %v6211_v17  ;;  %v4215_v29 = vcombine.high %v6289_v5, %v6289_v5  ;;  %v4657_v54 = vld [vmem:[%s6550_s3 + $0x1e8] sm:$0xff]  }
 0x324   : > { %4079 = vmatprep.mubr.msk.bf16.mxu1 %vm2418_vm14, %v4059_v56  ;;  %v2361_v0 = vshrl.u32 %v4059_v56, 16  ;;  %v2358_v1 = vshrl.u32 %v4058_v58, 16  ;;  %v2709_v35 = vshrl.u32 %v4099_v63, 16  ;;  %v2585_v6 = vrot.slane %v4099_v63, 1  ;;  %v4660_v63 = vld [vmem:[%s6550_s3 + $0x220] sm:$0xff]  }
 0x325   : > { %2552 = vmatmul.mubr.bf16.vlgmr.msra.gmra.mxu1 %v4058_v58  ;;  %v2705_v24 = vshrl.u32 %v4098_v19, 16  ;;  %v2961_v26 = vshrl.u32 %v4157_v21, 16  ;;  %v2584_v34 = vrot.slane %v4098_v19, 1  ;;  %v2837_v46 = vrot.slane %v4157_v21, 2  ;;  %v4658_v58 = vld [vmem:[%s6550_s3 + $0x228] sm:$0xff]   ;;  %v4677_v19 = vld [vmem:[%s6550_s3 + $0x270] sm:$0xff]  }
 0x326   : > { %2771 = vmatpush1.bf16.msra.mxu1 %v4615_v60  ;;  %4069 = vmatprep.mubr.msk.bf16.mxu0 %vm2418_vm14, %v2361_v0  ;;  %v2711_v7 = vrot.slane %v2709_v35, 1  ;;  %v2957_v44 = vshrl.u32 %v4156_v41, 16  ;;  %v3213_v48 = vshrl.u32 %v4215_v29, 16  ;;  %v2836_v45 = vrot.slane %v4156_v41, 2  ;;  %v4659_v60 = vld [vmem:[%s6550_s3 + $0x1e0] sm:$0xff]   ;;  %v4661_v0 = vld [vmem:[%s6550_s3 + $0x1d8] sm:$0xff]  }
 0x327   : > { %2455 = vmatmul.mubr.bf16.vlgmr.msra.gmra.mxu0 %v2358_v1  ;;  %2772 = vmatprep.subr.bf16.mxu1 %v6635_v16  ;;  %v2707_v30 = vrot.slane %v2705_v24, 1  ;;  %v2963_v31 = vrot.slane %v2961_v26, 2  ;;  %v3089_v56 = vrot.slane %v4215_v29, 3  ;;  %v4662_v1 = vld [vmem:[%s6550_s3 + $0x218] sm:$0xff]   ;;  %v4664_v35 = vld [vmem:[%s6550_s3 + $0x210] sm:$0xff]   ;;  %v4679_v21 = vld [vmem:[%s6550_s3 + $0x260] sm:$0xff]  }
 0x328   : > { %2645 = vmatpush1.bf16.msra.mxu0 %v4616_v3  ;;  %4109 = vmatprep.mubr.msk.bf16.mxu0 %vm2418_vm14, %v2585_v6  ;;  %v2959_v51 = vrot.slane %v2957_v44, 2  ;;  %v3215_v52 = vrot.slane %v3213_v48, 3  ;;  %v4663_v3 = vld [vmem:[%s6550_s3 + $0x1d0] sm:$0xff]   ;;  %v4665_v6 = vld [vmem:[%s6550_s3 + $0x1c8] sm:$0xff]   ;;  %v4683_v26 = vld [vmem:[%s6550_s3 + $0x240] sm:$0xff]  }
 0x329   : > { %4137 = vmatprep.mubr.msk.bf16.mxu1 %vm2418_vm14, %v2711_v7  ;;  %2646 = vmatprep.subr.bf16.mxu0 %v6635_v16  ;;  %v4666_v7 = vld [vmem:[%s6550_s3 + $0x208] sm:$0xff]   ;;  %v4681_v24 = vld [vmem:[%s6550_s3 + $0x250] sm:$0xff]  }
 0x32a   : > { %2773 = vmatpush1.bf16.msra.mxu1 %v4618_v62  ;;  %v4667_v62 = vld [vmem:[%s6550_s3 + $0x1c0] sm:$0xff]  }
 0x32b   : > { %2774 = vmatprep.subr.bf16.mxu1 %v6635_v16 }
 0x32c   : > { %2647 = vmatpush1.bf16.msra.mxu0 %v4619_v8  ;;  %v4668_v8 = vld [vmem:[%s6550_s3 + $0x200] sm:$0xff]  }
 0x32d   : > { %2648 = vmatprep.subr.bf16.mxu0 %v6635_v16 }
 0x32e   : > { %2775 = vmatpush1.bf16.msra.mxu1 %v4620_v9  ;;  %v4669_v9 = vld [vmem:[%s6550_s3 + $0x1b8] sm:$0xff]  }
 0x32f   : > { %2776 = vmatprep.subr.bf16.mxu1 %v6635_v16 }
 0x330   : > { %2649 = vmatpush1.bf16.msra.mxu0 %v4621_v10  ;;  %v4670_v10 = vld [vmem:[%s6550_s3 + $0x1f8] sm:$0xff]  }
 0x331   : > { %2650 = vmatprep.subr.bf16.mxu0 %v6635_v16 }
 0x332   : > { %2777 = vmatpush1.bf16.msra.mxu1 %v4622_v27  ;;  %v4214_v27 = vcombine.low %v6289_v5, %v6289_v5  ;;  %v4693_v5 = vld [vmem:[%s6552_s5] sm:$0xff]  }
 0x333   : > { %2778 = vmatprep.subr.bf16.mxu1 %v6635_v16 }
 0x334   : > { %2651 = vmatpush1.bf16.msra.mxu0 %v4623_v49  ;;  %v4671_v49 = vld [vmem:[%s6550_s3 + $0x1b0] sm:$0xff]   ;;  %v3088_v17 = vrot.slane %v4214_v27, 3 }
 0x335   : > { %2652 = vmatprep.subr.bf16.mxu0 %v6635_v16 }
 0x336   : > { %2779 = vmatpush1.bf16.msra.mxu1 %v4624_v11  ;;  %v4672_v11 = vld [vmem:[%s6550_s3 + $0x238] sm:$0xff]  }
 0x337   : > { %2780 = vmatprep.subr.bf16.mxu1 %v6635_v16 }
 0x338   : > { %2653 = vmatpush1.bf16.msra.mxu0 %v4625_v53  ;;  %v3209_v53 = vshrl.u32 %v4214_v27, 16 }
 0x339   : > { %2654 = vmatprep.subr.bf16.mxu0 %v6635_v16 }
 0x33a   : > { %2781 = vmatpush1.bf16.msra.mxu1 %v4626_v12  ;;  %v4673_v12 = vld [vmem:[%s6550_s3 + $0x1f0] sm:$0xff]  }
 0x33b   : > { %2782 = vmatprep.subr.bf16.mxu1 %v6635_v16 }
 0x33c   : > { %2655 = vmatpush1.bf16.msra.mxu0 %v4627_v13  ;;  %v3211_v13 = vrot.slane %v3209_v53, 3 }
 0x33d   : > { %2656 = vmatprep.subr.bf16.mxu0 %v6635_v16 }
 0x33e   : > { %2783 = vmatpush1.bf16.msra.mxu1 %v4628_v14  ;;  %v3315_v14 = vld [vmem:[#allocation2 + $0x8] sm:$0x11] }
 0x33f   : > { %2784 = vmatprep.subr.bf16.mxu1 %v6635_v16 }
 0x340   : > { %2657 = vmatpush1.bf16.msra.mxu0 %v4629_v15  ;;  %v4675_v15 = vld [vmem:[%s6550_s3 + $0x278] sm:$0xff]  }
 0x341   : > { %2658 = vmatprep.subr.bf16.mxu0 %v6635_v16 }
 0x342   : > { %2785 = vmatpush1.bf16.msra.mxu1 %v4630_v18  ;;  %v4273_v18 = vcombine.high %v3315_v14, %v3315_v14 }
 0x343   : > { %2800 = vmatprep.subr.bf16.mxu1 %v6635_v16 }
 0x344   : > { %2659 = vmatpush1.bf16.msra.mxu0 %v4631_v20  ;;  %v4678_v20 = vld [vmem:[%s6550_s3 + $0x268] sm:$0xff]  }
 0x345   : > { %2674 = vmatprep.subr.bf16.mxu0 %v6635_v16 }
 0x346   : > { %2801 = vmatpush2.bf16.msra.mxu1 %v4632_v23  ;;  %v4680_v23 = vld [vmem:[%s6550_s3 + $0x258] sm:$0xff]  }
 0x347   : > { %3022 = vmatprep.subr.bf16.mxu1 %v6635_v16 }
 0x348   : > { %2675 = vmatpush2.bf16.msra.mxu0 %v4633_v25  ;;  %v4682_v25 = vld [vmem:[%s6550_s3 + $0x248] sm:$0xff]  }
 0x349   : > { %2803 = vmatmul.mubr.bf16.vlgmr.msra.gmra.mxu1 %v2707_v30  ;;  %2896 = vmatprep.subr.bf16.mxu0 %v6635_v16  ;;  %v4272_v30 = vcombine.low %v3315_v14, %v3315_v14 }
 0x34a   : > { %3023 = vmatpush1.bf16.msra.mxu1 %v4635_v28  ;;  %4195 = vmatprep.mubr.msk.bf16.mxu1 %vm2418_vm14, %v2963_v31  ;;  %v4684_v28 = vld [vmem:[%s6550_s3 + $0x280] sm:$0xff]   ;;  %v4686_v31 = vld [vmem:[%s6552_s5 + $0x38] sm:$0xff]  }
 0x34b   : > { %2677 = vmatmul.mubr.bf16.vlgmr.msra.gmra.mxu0 %v2584_v34  ;;  %3024 = vmatprep.subr.bf16.mxu1 %v6635_v16  ;;  %v4687_v34 = vld [vmem:[%s6552_s5 + $0x30] sm:$0xff]  }
 0x34c   : > { %2897 = vmatpush1.bf16.msra.mxu0 %v4637_v33  ;;  %4167 = vmatprep.mubr.msk.bf16.mxu0 %vm2418_vm14, %v2837_v46  ;;  %v4792_v33 = vmov 0.0   ;;  %v4689_v46 = vld [vmem:[%s6552_s5 + $0x20] sm:$0xff]  }
 0x34d   : > { %2898 = vmatprep.subr.bf16.mxu0 %v6635_v16 }
 0x34e   : > { %3025 = vmatpush1.bf16.msra.mxu1 %v4638_v4 }
 0x34f   : > { %3026 = vmatprep.subr.bf16.mxu1 %v6635_v16 }
 0x350   : > { %2899 = vmatpush1.bf16.msra.mxu0 %v4639_v38 }
 0x351   : > { %2900 = vmatprep.subr.bf16.mxu0 %v6635_v16 }
 0x352   : > { %3027 = vmatpush1.bf16.msra.mxu1 %v4640_v37 }
 0x353   : > { %3028 = vmatprep.subr.bf16.mxu1 %v6635_v16 }
 0x354   : > { %2901 = vmatpush1.bf16.msra.mxu0 %v4641_v2  ;;  %v4690_v2 = vld [vmem:[%s6552_s5 + $0x18] sm:$0xff]  }
 0x355   : > { %2902 = vmatprep.subr.bf16.mxu0 %v6635_v16 }
 0x356   : > { %3029 = vmatpush1.bf16.msra.mxu1 %v4642_v39 }
 0x357   : > { %3030 = vmatprep.subr.bf16.mxu1 %v6635_v16 }
 0x358   : > { %2903 = vmatpush1.bf16.msra.mxu0 %v4643_v61 }
 0x359   : > { %2904 = vmatprep.subr.bf16.mxu0 %v6635_v16 }
 0x35a   : > { %3031 = vmatpush1.bf16.msra.mxu1 %v4644_v59 }
 0x35b   : > { %3032 = vmatprep.subr.bf16.mxu1 %v6635_v16 }
 0x35c   : > { %2905 = vmatpush1.bf16.msra.mxu0 %v4645_v40 }
 0x35d   : > { %2906 = vmatprep.subr.bf16.mxu0 %v6635_v16 }
 0x35e   : > { %3033 = vmatpush1.bf16.msra.mxu1 %v4646_v22 }
 0x35f   : > { %3034 = vmatprep.subr.bf16.mxu1 %v6635_v16 }
 0x360   : > { %2907 = vmatpush1.bf16.msra.mxu0 %v4647_v42  ;;  %v4691_v42 = vld [vmem:[%s6552_s5 + $0x10] sm:$0xff]  }
 0x361   : > { %2908 = vmatprep.subr.bf16.mxu0 %v6635_v16 }
 0x362   : > { %3035 = vmatpush1.bf16.msra.mxu1 %v4648_v57 }
 0x363   : > { %3036 = vmatprep.subr.bf16.mxu1 %v6635_v16 }
 0x364   : > { %2909 = vmatpush1.bf16.msra.mxu0 %v4649_v55  ;;  %v4692_v55 = vld [vmem:[%s6552_s5 + $0x8] sm:$0xff]  }
 0x365   : > { %2910 = vmatprep.subr.bf16.mxu0 %v6635_v16 }
 0x366   : > { %3037 = vmatpush1.bf16.msra.mxu1 %v4650_v36 }
 0x367   : > { %3052 = vmatprep.subr.bf16.mxu1 %v6635_v16 }
 0x368   : > { %2911 = vmatpush1.bf16.msra.mxu0 %v4651_v43 }
 0x369   : > { %2926 = vmatprep.subr.bf16.mxu0 %v6635_v16 }
 0x36a   : > { %3053 = vmatpush2.bf16.msra.mxu1 %v4652_v32 }
 0x36b   : > { %3274 = vmatprep.subr.bf16.mxu1 %v6635_v16 }
 0x36c   : > { %2927 = vmatpush2.bf16.msra.mxu0 %v4653_v47 }
 0x36d   : > { %3055 = vmatmul.mubr.bf16.vlgmr.msra.gmra.mxu1 %v2959_v51  ;;  %3148 = vmatprep.subr.bf16.mxu0 %v6635_v16 }
 0x36e   : > { %3275 = vmatpush1.bf16.msra.mxu1 %v4655_v50  ;;  %4253 = vmatprep.mubr.msk.bf16.mxu1 %vm2418_vm14, %v3215_v52 }
 0x36f   : > { %2929 = vmatmul.mubr.bf16.vlgmr.msra.gmra.mxu0 %v2836_v45  ;;  %3276 = vmatprep.subr.bf16.mxu1 %v6635_v16 }
 0x370   : > { %3149 = vmatpush1.bf16.msra.mxu0 %v4657_v54  ;;  %4225 = vmatprep.mubr.msk.bf16.mxu0 %vm2418_vm14, %v3089_v56 }
 0x371   : > { %3150 = vmatprep.subr.bf16.mxu0 %v6635_v16 }
 0x372   : > { %3277 = vmatpush1.bf16.msra.mxu1 %v4658_v58 }
 0x373   : > { %3278 = vmatprep.subr.bf16.mxu1 %v6635_v16 }
 0x374   : > { %3151 = vmatpush1.bf16.msra.mxu0 %v4659_v60 }
 0x375   : > { %3152 = vmatprep.subr.bf16.mxu0 %v6635_v16 }
 0x376   : > { %3279 = vmatpush1.bf16.msra.mxu1 %v4660_v63 }
 0x377   : > { %3280 = vmatprep.subr.bf16.mxu1 %v6635_v16 }
 0x378   : > { %3153 = vmatpush1.bf16.msra.mxu0 %v4661_v0 }
 0x379   : > { %3154 = vmatprep.subr.bf16.mxu0 %v6635_v16 }
 0x37a   : > { %3281 = vmatpush1.bf16.msra.mxu1 %v4662_v1 }
 0x37b   : > { %3282 = vmatprep.subr.bf16.mxu1 %v6635_v16 }
 0x37c   : > { %3155 = vmatpush1.bf16.msra.mxu0 %v4663_v3 }
 0x37d   : > { %3156 = vmatprep.subr.bf16.mxu0 %v6635_v16 }
 0x37e   : > { %3283 = vmatpush1.bf16.msra.mxu1 %v4664_v35 }
 0x37f   : > { %3284 = vmatprep.subr.bf16.mxu1 %v6635_v16 }
 0x380   : > { %3157 = vmatpush1.bf16.msra.mxu0 %v4665_v6 }
 0x381   : > { %3158 = vmatprep.subr.bf16.mxu0 %v6635_v16 }
 0x382   : > { %3285 = vmatpush1.bf16.msra.mxu1 %v4666_v7 }
 0x383   : > { %3286 = vmatprep.subr.bf16.mxu1 %v6635_v16 }
 0x384   : > { %3159 = vmatpush1.bf16.msra.mxu0 %v4667_v62 }
 0x385   : > { %3160 = vmatprep.subr.bf16.mxu0 %v6635_v16 }
 0x386   : > { %3287 = vmatpush1.bf16.msra.mxu1 %v4668_v8 }
 0x387   : > { %3288 = vmatprep.subr.bf16.mxu1 %v6635_v16 }
 0x388   : > { %3161 = vmatpush1.bf16.msra.mxu0 %v4669_v9 }
 0x389   : > { %3162 = vmatprep.subr.bf16.mxu0 %v6635_v16 }
 0x38a   : > { %3289 = vmatpush1.bf16.msra.mxu1 %v4670_v10 }
 0x38b   : > { %3304 = vmatprep.subr.bf16.mxu1 %v6635_v16 }
 0x38c   : > { %3163 = vmatpush1.bf16.msra.mxu0 %v4671_v49 }
 0x38d   : > { %3178 = vmatprep.subr.bf16.mxu0 %v6635_v16 }
 0x38e   : > { %3305 = vmatpush2.bf16.msra.mxu1 %v4672_v11 }
 0x38f   : > { %4323 = vmatprep.subr.bf16.mxu1 %v4792_v33 }
 0x390   : > { %3179 = vmatpush2.bf16.msra.mxu0 %v4673_v12  ;;  %v3439_v12 = vld [vmem:[%s6551_s4] sm:$0x1] }
 0x391   : > { %3307 = vmatmul.mubr.bf16.vlgmr.msra.gmra.mxu1 %v3211_v13  ;;  %3398 = vmatprep.subr.bf16.mxu0 %v6635_v16 }
 0x392   : > { %4324 = vmatpush3.bf16.msra.mxu1 %v4686_v31  ;;  %4339 = vmatprep.mubr.msk.bf16.mxu1 %vm4793_vm15, %v4792_v33  ;;  %v4701_v31 = vld [vmem:[%s6554_s7] sm:$0xff]  }
 0x393   : > { %3181 = vmatmul.mubr.bf16.vlgmr.msra.gmra.mxu0 %v3088_v17  ;;  %4325 = vmatprep.subr.bf16.mxu1 %v4792_v33 }
 0x394   : > { %3399 = vmatpush1.bf16.msra.mxu0 %v4675_v15  ;;  %4283 = vmatprep.mubr.msk.bf16.mxu0 %vm2418_vm14, %v4273_v18 }
 0x395   : > { %3400 = vmatprep.subr.bf16.mxu0 %v6635_v16 }
 0x396   : > { %4326 = vmatpush3.bf16.msra.mxu1 %v4687_v34  ;;  %v3459_v34 = vld [vmem:[%s6553_s6] sm:$0x1] }
 0x397   : > { %4327 = vmatprep.subr.bf16.mxu1 %v4792_v33 }
 0x398   : > { %3401 = vmatpush1.bf16.msra.mxu0 %v4677_v19 }
 0x399   : > { %3402 = vmatprep.subr.bf16.mxu0 %v6635_v16 }
 0x39c   : > { %3403 = vmatpush1.bf16.msra.mxu0 %v4678_v20  ;;  %v4694_v20 = vld [vmem:[%s6554_s7 + $0x38] sm:$0xff]  }
 0x39d   : > { %3404 = vmatprep.subr.bf16.mxu0 %v6635_v16 }
 0x3a0   : > { %3405 = vmatpush1.bf16.msra.mxu0 %v4679_v21 }
 0x3a1   : > { %3406 = vmatprep.subr.bf16.mxu0 %v6635_v16 }
 0x3a4   : > { %3407 = vmatpush1.bf16.msra.mxu0 %v4680_v23  ;;  %v4695_v23 = vld [vmem:[%s6554_s7 + $0x30] sm:$0xff]  }
 0x3a5   : > { %3408 = vmatprep.subr.bf16.mxu0 %v6635_v16 }
 0x3a8   : > { %3409 = vmatpush1.bf16.msra.mxu0 %v4681_v24  ;;  %v4696_v24 = vld [vmem:[%s6554_s7 + $0x28] sm:$0xff]  }
 0x3a9   : > { %3410 = vmatprep.subr.bf16.mxu0 %v6635_v16 }
 0x3ac   : > { %3411 = vmatpush1.bf16.msra.mxu0 %v4682_v25  ;;  %v4697_v25 = vld [vmem:[%s6554_s7 + $0x20] sm:$0xff]  }
 0x3ad   : > { %3412 = vmatprep.subr.bf16.mxu0 %v6635_v16 }
 0x3b0   : > { %3413 = vmatpush1.bf16.msra.mxu0 %v4683_v26  ;;  %v4698_v26 = vld [vmem:[%s6554_s7 + $0x18] sm:$0xff]  }
 0x3b1   : > { %3428 = vmatprep.subr.bf16.mxu0 %v6635_v16  ;;  %v4688_v16 = vld [vmem:[%s6552_s5 + $0x28] sm:$0xff]  }
 0x3b2   : > { %4328 = vmatpush3.bf16.msra.mxu1 %v4688_v16 }
 0x3b3   : > { %4329 = vmatprep.subr.bf16.mxu1 %v4792_v33 }
 0x3b4   : > { %3429 = vmatpush2.bf16.msra.mxu0 %v4684_v28  ;;  %v4699_v28 = vld [vmem:[%s6554_s7 + $0x10] sm:$0xff]  }
 0x3b6   : > { %4330 = vmatpush3.bf16.msra.mxu1 %v4689_v46 }
 0x3b7   : > { %3431 = vmatmul.mubr.bf16.vlgmr.msra.gmra.mxu0 %v4272_v30  ;;  %4331 = vmatprep.subr.bf16.mxu1 %v4792_v33  ;;  %v4700_v30 = vld [vmem:[%s6554_s7 + $0x8] sm:$0xff]  }
 0x3ba   : > { %4332 = vmatpush3.bf16.msra.mxu1 %v4690_v2 }
 0x3bb   : > { %4333 = vmatprep.subr.bf16.mxu1 %v4792_v33 }
 0x3be   : > { %4334 = vmatpush3.bf16.msra.mxu1 %v4691_v42 }
 0x3bf   : > { %4335 = vmatprep.subr.bf16.mxu1 %v4792_v33 }
 0x3c2   : > { %4336 = vmatpush3.bf16.msra.mxu1 %v4692_v55 }
 0x3c3   : > { %4337 = vmatprep.subr.bf16.mxu1 %v4792_v33 }
 0x3c6   : > { %4338 = vmatpush3.bf16.msra.mxu1 %v4693_v5 }
 0x3c7   : > { %4343 = vmatprep.subr.bf16.mxu1 %v4792_v33 }
 0x3e5   : > { %v2553_v4 = vpop.f32.mrf.mxu1 }
 0x3e7   : > { %v2456_v38 = vpop.f32.mrf.mxu0  ;;  %v2555_v37 = vpop.f32.mrf.mxu1 }
 0x3e8   : > { %v2554_v39 = vadd.f32 %v2553_v4, %v2456_v38 }
 0x3e9   : > { %v2458_v61 = vpop.f32.mrf.mxu0  ;;  %v2556_v59 = vpop.f32.mrf.mxu1 }
 0x3eb   : > { %v2459_v40 = vpop.f32.mrf.mxu0  ;;  %v2557_v22 = vpop.f32.mrf.mxu1 }
 0x3ed   : > { %v2460_v57 = vpop.f32.mrf.mxu0 }
 0x409   : > { %v2804_v36 = vpop.f32.mrf.mxu1 }
 0x40b   : > { %v2678_v41 = vpop.f32.mrf.mxu0  ;;  %v2806_v43 = vpop.f32.mrf.mxu1 }
 0x40c   : > { %v2684_v29 = vadd.f32 %v2678_v41, %v2554_v39 }
 0x40d   : > { %v2680_v32 = vpop.f32.mrf.mxu0  ;;  %v2807_v44 = vpop.f32.mrf.mxu1 }
 0x40e   : > { %v2810_v47 = vadd.f32 %v2804_v36, %v2684_v29 }
 0x40f   : > { %v2681_v48 = vpop.f32.mrf.mxu0  ;;  %v2808_v50 = vpop.f32.mrf.mxu1 }
 0x411   : > { %v2682_v51 = vpop.f32.mrf.mxu0 }
 0x42d   : > { %v3056_v52 = vpop.f32.mrf.mxu1 }
 0x42f   : > { %v2930_v54 = vpop.f32.mrf.mxu0  ;;  %v3058_v45 = vpop.f32.mrf.mxu1 }
 0x430   : > { %v2936_v56 = vadd.f32 %v2930_v54, %v2810_v47 }
 0x431   : > { %v2932_v58 = vpop.f32.mrf.mxu0  ;;  %v3059_v60 = vpop.f32.mrf.mxu1 }
 0x432   : > { %v3062_v63 = vadd.f32 %v3056_v52, %v2936_v56 }
 0x433   : > { %v2933_v0 = vpop.f32.mrf.mxu0  ;;  %v3060_v1 = vpop.f32.mrf.mxu1 }
 0x435   : > { %v2934_v3 = vpop.f32.mrf.mxu0 }
 0x451   : > { %v3308_v35 = vpop.f32.mrf.mxu1 }
 0x453   : > { %v3182_v6 = vpop.f32.mrf.mxu0  ;;  %v3310_v7 = vpop.f32.mrf.mxu1 }
 0x454   : > { %v3188_v49 = vadd.f32 %v3182_v6, %v3062_v63 }
 0x455   : > { %v3184_v62 = vpop.f32.mrf.mxu0  ;;  %v3311_v8 = vpop.f32.mrf.mxu1 }
 0x456   : > { %v3314_v11 = vadd.f32 %v3308_v35, %v3188_v49 }
 0x457   : > { %v3185_v9 = vpop.f32.mrf.mxu0  ;;  %v3312_v10 = vpop.f32.mrf.mxu1 }
 0x459   : > { %v3186_v27 = vpop.f32.mrf.mxu0 }
 0x477   : > { %v3432_v53 = vpop.f32.mrf.mxu0 }
 0x478   : > { %v3438_v13 = vadd.f32 %v3432_v53, %v3314_v11 }
 0x479   : > { %v3434_v14 = vpop.f32.mrf.mxu0 }
 0x47a   : > { %v3440_v15 = vadd.f32 %v3439_v12, %v3438_v13 }
 0x47b   : > { %v3435_v17 = vpop.f32.mrf.mxu0 }
 0x47c   : > { %v3441_v18 = vmax.f32 %v3440_v15, 0.0 }
 0x47d   : > { %v3436_v19 = vpop.f32.mrf.mxu0 }
 0x47e   : > { %v3442_v21 = vpack.c.bf16 %v3441_v18, %v3441_v18 }
 0x480   : > { %4340 = vmatmul.mubr.bf16.vlgmr.msra.gmra.mxu1 %v3442_v21 }
 0x481   : > { %4344 = vmatpush3.bf16.msra.mxu1 %v4694_v20  ;;  %4359 = vmatprep.mubr.msk.bf16.mxu1 %vm4793_vm15, %v4792_v33 }
 0x482   : > { %4345 = vmatprep.subr.bf16.mxu1 %v4792_v33 }
 0x485   : > { %4346 = vmatpush3.bf16.msra.mxu1 %v4695_v23 }
 0x486   : > { %4347 = vmatprep.subr.bf16.mxu1 %v4792_v33 }
 0x489   : > { %4348 = vmatpush3.bf16.msra.mxu1 %v4696_v24 }
 0x48a   : > { %4349 = vmatprep.subr.bf16.mxu1 %v4792_v33 }
 0x48d   : > { %4350 = vmatpush3.bf16.msra.mxu1 %v4697_v25 }
 0x48e   : > { %4351 = vmatprep.subr.bf16.mxu1 %v4792_v33 }
 0x491   : > { %4352 = vmatpush3.bf16.msra.mxu1 %v4698_v26 }
 0x492   : > { %4353 = vmatprep.subr.bf16.mxu1 %v4792_v33 }
 0x495   : > { %4354 = vmatpush3.bf16.msra.mxu1 %v4699_v28 }
 0x496   : > { %4355 = vmatprep.subr.bf16.mxu1 %v4792_v33 }
 0x499   : > { %4356 = vmatpush3.bf16.msra.mxu1 %v4700_v30 }
 0x49a   : > { %4357 = vmatprep.subr.bf16.mxu1 %v4792_v33  ;;  %v3566_v33 = vld [vmem:[%s6555_s8] sm:$0x1] }
 0x49d   : > { %4358 = vmatpush3.bf16.msra.mxu1 %v4701_v31 }
 0x540   : > { %v3542_v16 = vpop.f32.mrf.mxu1 }
 0x541   : > { %v3543_v46 = vadd.f32 %v3542_v16, %v3459_v34 }
 0x542   : > { %v4341_v4 = vpop.f32.mrf.mxu1 }
 0x543   : > { %v3548_v38 = vmax.f32 %v3543_v46, 0.0 }
 0x544   : > { %v3545_v37 = vpop.f32.mrf.mxu1 }
 0x545   : > { %v3549_v2 = vpack.c.bf16 %v3548_v38, %v3548_v38 }
 0x546   : > { %v4342_v39 = vpop.f32.mrf.mxu1 }
 0x547   : > { %4360 = vmatmul.mubr.bf16.vlgmr.msra.gmra.mxu1 %v3549_v2 }
 0x607   : > { %v3649_v61 = vpop.f32.mrf.mxu1 }
 0x608   : > { %v3650_v59 = vadd.f32 %v3649_v61, %v3566_v33 }
 0x609   : > { %v4361_v40 = vpop.f32.mrf.mxu1 }
 0x60a   : > { %3655 = vst [vmem:[%s324_s16] sm:$0x1] %v3650_v59 }
 0x60b   : > { %v3652_v22 = vpop.f32.mrf.mxu1 }
 0x60c   : > { %4740 = shalt.err (!%p4737_p3)
}
 0x60d   : > { %s4741_s14 = scalar_lea.hbm %s6506_s17, 16  ;;  %s4745_s16 = scalar_lea.hbm %s6556_s9, 32 }
 0x60e   : > { %p4742_p4 = scmp.ne.s32.totalorder %s6506_s17, %s4741_s14  ;;  %p4746_p9 = scmp.lt.s32.totalorder %s6506_s17, %s6556_s9 }
 0x60f   : > { %p4747_p10 = scmp.lt.s32.totalorder %s4745_s16, %s4741_s14 }
 0x610   : > { %p4743_p7 = pnand %p4742_p4, %p4883_p5 }
 0x611   : > { %p4748_p11 = por %p4747_p10, %p4746_p9 }
 0x612   : > { %p4744_p8 = pneg %p4743_p7 }
 0x614   : > { %p4749_p12 = pnand %p4748_p11, %p4744_p8 }
 0x616   : > { %4752 = shalt.err (!%p4749_p12)
}
 0x617   : > { %4364 = dma.vmem_to_hbm [thread:$0]  (%p4883_p5), %s6508_s22, 16, %s6506_s17, %s3657_s24   ;;  %v4362_v42 = vpop.f32.mrf.mxu1 }
 0x618 PF: > { %p4370_p13 = scmp.ge.s32.totalorder %s4787_s12, 2  ;;  %s3681_s26 = sand.u32 1, %s4775_s30  }
 0x619   : > { %s3682_s13 = scalar_lea.sflag [#allocation4], %s3681_s26 }
 0x61a   : > { %p4367_p0 = pnand %p4370_p13, %p4887_p6 }
 0x61c   : > { %p4368_p1 = pneg %p4367_p0 }
 0x61e   : > { %4770 = dma.done.wait (%p4368_p1), %s3682_s13, 16  }
 0x61f   : > { %4772 = vsyncadd (%p4368_p1), %s3682_s13, 4294967280  ;;  %p19_p2 = scmp.ge.s32.totalorder %s4870_s15, 4   ;;  %s6739_s30 = smov %s4779_s10 }
 0x620   : > { %s6740_s10 = smov %s4783_s11  ;;  %s6741_s11 = smov %s4881_s18 }
 0x621   : > { %s6742_s12 = smov %s4870_s15  ;;  %21 = sbr.rel (!%p19_p2) target bundleno = 3 (0x3), region = 103 }
 0x626   :  { %3686 = vsyncpa [#allocation4], 1 }
 0x627   :  { %3688 = vsyncpa [#allocation4 + $0x1], 1 }

</bundles_post_ra>
